<compile_context>
chip_gen: v7x
topology: tpu7x:2x2x1
jax: 0.10.0
libtpu: 0.0.40
codegen_flags: <defaults>
</compile_context>

<pallas_src>
import functools

import jax
import jax.numpy as jnp
from jax import lax
from jax.experimental import pallas as pl
from jax.experimental.pallas import tpu as pltpu

LRELU_SLOPE = 0.2
BN_EPS = 1e-5
CP = 128  # lane-dense output width; Cout <= 64 everywhere, keep at 128 (review item)


def _rup(x, m):
    return ((x + m - 1) // m) * m


def _pick_tm_parallel(M, cap=1024, min_steps=2):
    # Divisor-aware row tile for the no-BN matmul: largest multiple of 16 dividing
    # round_up(M,16) exactly while leaving >= min_steps grid steps (both v7x TCs busy).
    Mr = _rup(M, 16)
    if Mr <= 16:
        return 16
    best, t = None, 16
    while t <= min(Mr // min_steps, cap):
        if Mr % t == 0:
            best = t
        t += 16
    if best is not None:
        return best
    return min(cap, _rup((Mr + min_steps - 1) // min_steps, 16))


def _pick_tm_bn(M, cap=512):
    # Row tile for the fused conv+BN kernel: a single tile when it fits (typical here),
    # otherwise the largest multiple-of-16 divisor <= cap (Mr is always a multiple of 16).
    Mr = _rup(M, 16)
    if Mr <= cap:
        return Mr
    best, t = 16, 16
    while t <= cap:
        if Mr % t == 0:
            best = t
        t += 16
    return best


# ----------------------------------------------------------------------------
# im2col (JAX glue) — operates directly on bf16 activations
# ----------------------------------------------------------------------------
def _im2col(x, kh, kw, stride, pad):
    # x: (N, H, W, C) -> patches (N*OH*OW, kh*kw*C); feature order = (kh, kw, C)
    N, H, W, C = x.shape
    xp = jnp.pad(x, ((0, 0), (pad, pad), (pad, pad), (0, 0)))
    OH = (H + 2 * pad - kh) // stride + 1
    OW = (W + 2 * pad - kw) // stride + 1
    cols = []
    for i in range(kh):
        for j in range(kw):
            cols.append(xp[:, i:i + stride * OH:stride, j:j + stride * OW:stride, :])
    patches = jnp.concatenate(cols, axis=-1)
    return patches.reshape(N * OH * OW, kh * kw * C), (N, OH, OW)


# ----------------------------------------------------------------------------
# Kernel 1: plain matmul + elementwise activation (layer 1, no BN)
# ----------------------------------------------------------------------------
def _matmul_act_kernel(p_ref, w_ref, o_ref, *, act):
    y = jnp.dot(p_ref[...], w_ref[...], preferred_element_type=jnp.float32)
    if act == "leaky":
        y = jnp.where(y > 0, y, LRELU_SLOPE * y)
    elif act == "sigmoid":
        y = jax.nn.sigmoid(y)
    o_ref[...] = y.astype(o_ref.dtype)


def conv_act(x, w_pad, cout, stride, pad, act):
    # x NHWC bf16; w_pad (K, CP) bf16 (zero-padded columns)
    K, Cp = w_pad.shape
    patches, (N, OH, OW) = _im2col(x, 4, 4, stride, pad)
    M = patches.shape[0]
    tm = _pick_tm_parallel(M)
    Mp = _rup(_rup(M, 16), tm)
    p_pad = jnp.pad(patches, ((0, Mp - M), (0, 0)))

    y_pad = pl.pallas_call(
        functools.partial(_matmul_act_kernel, act=act),
        out_shape=jax.ShapeDtypeStruct((Mp, Cp), jnp.bfloat16),
        grid_spec=pltpu.PrefetchScalarGridSpec(
            num_scalar_prefetch=0,
            grid=(Mp // tm,),
            in_specs=[
                pl.BlockSpec((tm, K), lambda i: (i, 0)),
                pl.BlockSpec((K, Cp), lambda i: (0, 0)),
            ],
            out_specs=pl.BlockSpec((tm, Cp), lambda i: (i, 0)),
        ),
        compiler_params=pltpu.CompilerParams(dimension_semantics=("parallel",)),
    )(p_pad, w_pad)
    return y_pad[:M, :cout].reshape(N, OH, OW, cout)


# ----------------------------------------------------------------------------
# Kernel 2: fused conv + BatchNorm(train) + leaky-relu (layers 2, 3)
#   2-pass grid (2, Mtiles): pass 0 = matmul + stats + stash in VMEM,
#   pass 1 = compute scale/bias once, apply BN + lrelu, write bf16.
# ----------------------------------------------------------------------------
def _conv_bn_lrelu_kernel(p_ref, w_ref, g_ref, b_ref, o_ref,
                          y_all, sum_ref, ssq_ref, scale_ref, bias_ref, *, m_true):
    p = pl.program_id(0)
    i = pl.program_id(1)
    tm = o_ref.shape[0]
    idx = pl.multiple_of(i * tm, 16)

    @pl.when(p == 0)
    def _pass0():
        y = jnp.dot(p_ref[...], w_ref[...], preferred_element_type=jnp.float32)
        y_all[pl.ds(idx, tm), :] = y

        @pl.when(i == 0)
        def _():
            sum_ref[...] = jnp.zeros_like(sum_ref)
            ssq_ref[...] = jnp.zeros_like(ssq_ref)

        # Padded rows / Cout columns are exactly zero -> contribute 0 to both sums.
        sum_ref[...] += jnp.sum(y, axis=0, keepdims=True)
        ssq_ref[...] += jnp.sum(y * y, axis=0, keepdims=True)

    @pl.when(p == 1)
    def _pass1():
        @pl.when(i == 0)
        def _():
            mean = sum_ref[...] / m_true
            var = jnp.maximum(ssq_ref[...] / m_true - mean * mean, 0.0)
            scale = g_ref[...] * lax.rsqrt(var + BN_EPS)
            scale_ref[...] = scale
            bias_ref[...] = b_ref[...] - mean * scale

        y = y_all[pl.ds(idx, tm), :]
        h = y * scale_ref[...] + bias_ref[...]
        o_ref[...] = jnp.where(h > 0, h, LRELU_SLOPE * h).astype(o_ref.dtype)


def conv_bn_lrelu(x, w_pad, g_pad, b_pad, cout, stride, pad):
    K, Cp = w_pad.shape
    patches, (N, OH, OW) = _im2col(x, 4, 4, stride, pad)
    M = patches.shape[0]
    tm = _pick_tm_bn(M)
    Mp = _rup(M, 16)          # _pick_tm_bn always divides round_up(M,16)
    p_pad = jnp.pad(patches, ((0, Mp - M), (0, 0)))
    mtiles = Mp // tm

    y_pad = pl.pallas_call(
        functools.partial(_conv_bn_lrelu_kernel, m_true=float(M)),
        out_shape=jax.ShapeDtypeStruct((Mp, Cp), jnp.bfloat16),
        grid_spec=pltpu.PrefetchScalarGridSpec(
            num_scalar_prefetch=0,
            grid=(2, mtiles),
            in_specs=[
                # pass 0 walks the M tiles; pass 1 pins to block 0 (no redundant DMA)
                pl.BlockSpec((tm, K), lambda p, i: ((1 - p) * i, 0)),
                pl.BlockSpec((K, Cp), lambda p, i: (0, 0)),
                pl.BlockSpec((1, Cp), lambda p, i: (0, 0)),
                pl.BlockSpec((1, Cp), lambda p, i: (0, 0)),
            ],
            # pass 0 pins to block 0 (never written / never flushed); pass 1 writes tiles
            out_specs=pl.BlockSpec((tm, Cp), lambda p, i: (p * i, 0)),
            scratch_shapes=[
                pltpu.VMEM((Mp, Cp), jnp.float32),  # stashed f32 conv output
                pltpu.VMEM((1, Cp), jnp.float32),   # per-channel sum
                pltpu.VMEM((1, Cp), jnp.float32),   # per-channel sum of squares
                pltpu.VMEM((1, Cp), jnp.float32),   # folded BN scale
                pltpu.VMEM((1, Cp), jnp.float32),   # folded BN bias
            ],
        ),
        compiler_params=pltpu.CompilerParams(
            dimension_semantics=("arbitrary", "arbitrary")),
    )(p_pad, w_pad, g_pad, b_pad)
    return y_pad[:M, :cout].reshape(N, OH, OW, cout)


# ----------------------------------------------------------------------------
# Kernel 3: fused tail = layer4 conv + BN + lrelu + layer5 4x4 conv + sigmoid.
#   Single invocation; everything fits in a few hundred KB of VMEM.
#   layer5 (full 4x4 receptive field, single output) == per-batch weighted sum of the
#   layer4 activation rows, realised as a selector matmul + lane reduction.
# ----------------------------------------------------------------------------
def _tail_kernel(p_ref, w4_ref, g_ref, b_ref, w5_ref, sel_ref, o_ref, *, m_true):
    y = jnp.dot(p_ref[...], w4_ref[...], preferred_element_type=jnp.float32)  # (M4, CP)
    mean = jnp.sum(y, axis=0, keepdims=True) / m_true
    var = jnp.maximum(jnp.sum(y * y, axis=0, keepdims=True) / m_true - mean * mean, 0.0)
    scale = g_ref[...] * lax.rsqrt(var + BN_EPS)
    bias = b_ref[...] - mean * scale
    h = y * scale + bias
    h = jnp.where(h > 0, h, LRELU_SLOPE * h)
    prod = h * w5_ref[...]                                                    # (M4, CP)
    per_batch = jnp.dot(sel_ref[...], prod, preferred_element_type=jnp.float32)  # (Np, CP)
    o_ref[...] = jax.nn.sigmoid(jnp.sum(per_batch, axis=1, keepdims=True))    # (Np, 1)


def tail_forward(x, w4_pad, g_pad, b_pad, w5_row):
    # x: layer3 output NHWC bf16 (N, 7, 7, 4*ndf) for the 56x56 config.
    patches, (N, OH, OW) = _im2col(x, 4, 4, 1, 0)
    # layer5's 4x4 kernel must exactly cover layer4's output (true for 56x56 input).
    assert OH == 4 and OW == 4, "fused tail requires a 4x4 layer-4 output map"
    S = OH * OW
    M = patches.shape[0]                       # N * 16, always a multiple of 16
    Cp = w4_pad.shape[1]

    w5_big = jnp.tile(w5_row, (N, 1))          # (M, CP): row n*S+s = w5[s, :]
    Np = max(8, _rup(N, 8))
    sel = (jnp.arange(Np)[:, None] == (jnp.arange(M)[None, :] // S)).astype(jnp.float32)

    out = pl.pallas_call(
        functools.partial(_tail_kernel, m_true=float(M)),
        out_shape=jax.ShapeDtypeStruct((Np, 1), jnp.float32),
    )(patches, w4_pad, g_pad, b_pad, w5_big, sel)
    return out[:N]                             # (N, 1)


# ----------------------------------------------------------------------------
# Parameters: PyTorch-layout init + one-time Pallas-layout prep
# ----------------------------------------------------------------------------
def init_params(key, num_out_ch, num_labels, ndf):
    ks = jax.random.split(key, 6)
    nrm = lambda k, shp: (0.02 * jax.random.normal(k, shp)).astype(jnp.float32)
    half = ndf // 2
    return {
        "w1":  nrm(ks[0], (half, num_out_ch, 4, 4)),
        "w1l": nrm(ks[1], (half, num_labels, 4, 4)),
        "w2":  nrm(ks[2], (ndf * 2, ndf, 4, 4)),
        "g2":  jnp.ones((ndf * 2,), jnp.float32), "b2": jnp.zeros((ndf * 2,), jnp.float32),
        "w3":  nrm(ks[3], (ndf * 4, ndf * 2, 4, 4)),
        "g3":  jnp.ones((ndf * 4,), jnp.float32), "b3": jnp.zeros((ndf * 4,), jnp.float32),
        "w4":  nrm(ks[4], (ndf * 8, ndf * 4, 4, 4)),
        "g4":  jnp.ones((ndf * 8,), jnp.float32), "b4": jnp.zeros((ndf * 8,), jnp.float32),
        "w5":  nrm(ks[5], (1, ndf * 8, 4, 4)),
    }


def prepare_params(p):
    # One-time weight prep (hoisted out of the per-step graph, per review).
    def wmat(w):  # (Cout, Cin, KH, KW) -> (KH*KW*Cin, CP) bf16, zero-padded columns
        Cout, Cin, KH, KW = w.shape
        m = jnp.transpose(w, (2, 3, 1, 0)).reshape(KH * KW * Cin, Cout)
        return jnp.pad(m, ((0, 0), (0, CP - Cout))).astype(jnp.bfloat16)

    # Fused layer1/layer1Label: block-diagonal weight over (Cin, Cout).
    w1, w1l = p["w1"], p["w1l"]
    half, c_img, KH, KW = w1.shape
    c_lab = w1l.shape[1]
    big = jnp.zeros((KH, KW, c_img + c_lab, 2 * half), jnp.float32)
    big = big.at[:, :, :c_img, :half].set(jnp.transpose(w1, (2, 3, 1, 0)))
    big = big.at[:, :, c_img:, half:].set(jnp.transpose(w1l, (2, 3, 1, 0)))
    w1c = jnp.pad(big.reshape(KH * KW * (c_img + c_lab), 2 * half),
                  ((0, 0), (0, CP - 2 * half))).astype(jnp.bfloat16)

    def gb(g, b):  # gamma/beta padded with zeros -> padded channels produce exact 0
        C = g.shape[0]
        return (jnp.pad(g, (0, CP - C)).reshape(1, CP).astype(jnp.float32),
                jnp.pad(b, (0, CP - C)).reshape(1, CP).astype(jnp.float32))

    g2, b2 = gb(p["g2"], p["b2"])
    g3, b3 = gb(p["g3"], p["b3"])
    g4, b4 = gb(p["g4"], p["b4"])

    w5 = p["w5"]                                   # (1, 8*ndf, 4, 4)
    c5 = w5.shape[1]
    w5_mat = jnp.transpose(w5, (2, 3, 1, 0)).reshape(16, c5)   # row s = (kh*4+kw)
    w5_row = jnp.pad(w5_mat, ((0, 0), (0, CP - c5))).astype(jnp.float32)

    return {"w1c": w1c,
            "w2m": wmat(p["w2"]), "g2": g2, "b2": b2,
            "w3m": wmat(p["w3"]), "g3": g3, "b3": b3,
            "w4m": wmat(p["w4"]), "g4": g4, "b4": b4,
            "w5_row": w5_row}


# ----------------------------------------------------------------------------
# Discriminator forward
# ----------------------------------------------------------------------------
def discriminator_forward(prepped, x_nchw, c_nchw, *, ndf):
    # Cast to bf16 BEFORE im2col (patch matrices are 16x the activation size).
    x = jnp.transpose(x_nchw, (0, 2, 3, 1)).astype(jnp.bfloat16)   # NCHW -> NHWC
    c = jnp.transpose(c_nchw, (0, 2, 3, 1)).astype(jnp.bfloat16)
    xc = jnp.concatenate([x, c], axis=-1)

    # layer1 + layer1Label fused (block-diag weight) + leaky-relu
    h = conv_act(xc, prepped["w1c"], ndf, stride=2, pad=1, act="leaky")
    # layer2/layer3: conv + BN(train) + leaky-relu, fully fused per layer
    h = conv_bn_lrelu(h, prepped["w2m"], prepped["g2"], prepped["b2"], 2 * ndf, 2, 1)
    h = conv_bn_lrelu(h, prepped["w3m"], prepped["g3"], prepped["b3"], 4 * ndf, 2, 1)
    # layer4 (conv+BN+lrelu) + layer5 (conv+sigmoid) fused tail
    out = tail_forward(h, prepped["w4m"], prepped["g4"], prepped["b4"], prepped["w5_row"])
    return out                                                      # (N, 1)


# ----------------------------------------------------------------------------
# Pure-JAX reference (correctness check)
# ----------------------------------------------------------------------------
def _ref_conv(x, w_pt, stride, pad):
    w = jnp.transpose(w_pt, (2, 3, 1, 0))  # HWIO
    return lax.conv_general_dilated(
        x, w, (stride, stride), [(pad, pad), (pad, pad)],
        dimension_numbers=("NHWC", "HWIO", "NHWC"))


def _ref_bn_lrelu(y, gamma, beta):
    mean = jnp.mean(y, axis=(0, 1, 2))
    var = jnp.mean((y - mean) ** 2, axis=(0, 1, 2))
    y = (y - mean) / jnp.sqrt(var + BN_EPS) * gamma + beta
    return jnp.where(y > 0, y, LRELU_SLOPE * y)


def reference_forward(params, x_nchw, c_nchw):
    x = jnp.transpose(x_nchw, (0, 2, 3, 1))
    c = jnp.transpose(c_nchw, (0, 2, 3, 1))
    lr = lambda v: jnp.where(v > 0, v, LRELU_SLOPE * v)
    h1 = lr(_ref_conv(x, params["w1"], 2, 1))
    hc = lr(_ref_conv(c, params["w1l"], 2, 1))
    h = jnp.concatenate([h1, hc], axis=-1)
    h = _ref_bn_lrelu(_ref_conv(h, params["w2"], 2, 1), params["g2"], params["b2"])
    h = _ref_bn_lrelu(_ref_conv(h, params["w3"], 2, 1), params["g3"], params["b3"])
    h = _ref_bn_lrelu(_ref_conv(h, params["w4"], 1, 0), params["g4"], params["b4"])
    h = jax.nn.sigmoid(_ref_conv(h, params["w5"], 1, 0))
    return h.reshape(-1, 1)


if __name__ == "__main__":
    numOutputChannels, numLabels, numDiscFilter = 3, 4, 8
    N, H, W = 2, 56, 56  # 56 -> 28 -> 14 -> 7 -> 4 -> 1

    key = jax.random.PRNGKey(0)
    kp, kx, kc = jax.random.split(key, 3)
    params = init_params(kp, numOutputChannels, numLabels, numDiscFilter)
    x = jax.random.normal(kx, (N, numOutputChannels, H, W), jnp.float32)
    c = jax.random.normal(kc, (N, numLabels, H, W), jnp.float32)

    prepped = prepare_params(params)                     # one-time weight transform
    fwd = jax.jit(functools.partial(discriminator_forward, ndf=numDiscFilter))
    out = jax.block_until_ready(fwd(prepped, x, c))

    ref = jax.block_until_ready(reference_forward(params, x, c))
    assert out.shape == (N, 1), out.shape
    assert bool(jnp.all(jnp.isfinite(out)))
    assert bool(jnp.allclose(out, ref, rtol=5e-2, atol=5e-2)), (out, ref)
    print("KERNEL_OK")
</pallas_src>

<mosaic_0001>
module attributes {stable_mosaic.version = 11 : i64} {
  func.func @_matmul_act_kernel(%arg0: i32, %arg1: memref<784x112xbf16, #tpu.memory_space<vmem>>, %arg2: memref<112x128xbf16, #tpu.memory_space<vmem>>, %arg3: memref<784x128xbf16, #tpu.memory_space<vmem>>) attributes {dimension_semantics = [#tpu.dimension_semantics<parallel>], iteration_bounds = array<i64: 2>, scalar_prefetch = 0 : i64, scratch_operands = 0 : i64, tpu.core_type = #tpu.core_type<tc>, window_params = [{transform_indices = @transform_0, window_bounds = array<i64: 784, 112>}, {pipeline_mode = #tpu.pipeline_mode<synchronous>, transform_indices = @transform_1, window_bounds = array<i64: 112, 128>}, {transform_indices = @transform_2, window_bounds = array<i64: 784, 128>}]} {
    %c0 = arith.constant 0 : index
    %c0_0 = arith.constant 0 : index
    %0 = vector.load %arg1[%c0, %c0_0] : memref<784x112xbf16, #tpu.memory_space<vmem>>, vector<784x112xbf16>
    %c0_1 = arith.constant 0 : index
    %c0_2 = arith.constant 0 : index
    %1 = vector.load %arg2[%c0_1, %c0_2] : memref<112x128xbf16, #tpu.memory_space<vmem>>, vector<112x128xbf16>
    %cst = arith.constant dense<0.000000e+00> : vector<784x128xf32>
    %2 = tpu.matmul %0, %1, %cst {dimension_numbers = #tpu.dot_dimension_numbers<[1], [0], [0], [1], [0, 0, 1, 1], [], []>} : vector<784x112xbf16>, vector<112x128xbf16>, vector<784x128xf32> -> vector<784x128xf32>
    %cst_3 = arith.constant 0.000000e+00 : f32
    %3 = vector.broadcast %cst_3 : f32 to vector<784x128xf32>
    %4 = arith.cmpf ogt, %2, %3 : vector<784x128xf32>
    %cst_4 = arith.constant 2.000000e-01 : f32
    %5 = vector.broadcast %cst_4 : f32 to vector<784x128xf32>
    %6 = arith.mulf %5, %2 : vector<784x128xf32>
    %7 = arith.select %4, %2, %6 : vector<784x128xi1>, vector<784x128xf32>
    %8 = arith.truncf %7 : vector<784x128xf32> to vector<784x128xbf16>
    %c0_5 = arith.constant 0 : index
    %c0_6 = arith.constant 0 : index
    %9 = vector.load %arg3[%c0_5, %c0_6] : memref<784x128xbf16, #tpu.memory_space<vmem>>, vector<784x128xbf16>
    tpu.vector_store %arg3[%c0_5, %c0_6], %8 {strides = array<i32>} : memref<784x128xbf16, #tpu.memory_space<vmem>>, vector<784x128xbf16>,
    return
  }
  func.func @transform_0(%arg0: i32) -> (i32, i32) {
    %c0_i32 = arith.constant 0 : i32
    %c0_i32_0 = arith.constant 0 : i32
    return %arg0, %c0_i32 : i32, i32
  }
  func.func @transform_1(%arg0: i32) -> (i32, i32) {
    %c0_i32 = arith.constant 0 : i32
    %c0_i32_0 = arith.constant 0 : i32
    %c0_i32_1 = arith.constant 0 : i32
    return %c0_i32, %c0_i32_0 : i32, i32
  }
  func.func @transform_2(%arg0: i32) -> (i32, i32) {
    %c0_i32 = arith.constant 0 : i32
    %c0_i32_0 = arith.constant 0 : i32
    return %arg0, %c0_i32 : i32, i32
  }
}

module attributes {stable_mosaic.version = 11 : i64} {
  func.func @_conv_bn_lrelu_kernel(%arg0: i32, %arg1: i32, %arg2: memref<400x128xbf16, #tpu.memory_space<vmem>>, %arg3: memref<128x128xbf16, #tpu.memory_space<vmem>>, %arg4: memref<1x128xf32, #tpu.memory_space<vmem>>, %arg5: memref<1x128xf32, #tpu.memory_space<vmem>>, %arg6: memref<400x128xbf16, #tpu.memory_space<vmem>>, %arg7: memref<400x128xf32, #tpu.memory_space<vmem>>, %arg8: memref<1x128xf32, #tpu.memory_space<vmem>>, %arg9: memref<1x128xf32, #tpu.memory_space<vmem>>, %arg10: memref<1x128xf32, #tpu.memory_space<vmem>>, %arg11: memref<1x128xf32, #tpu.memory_space<vmem>>) attributes {dimension_semantics = [#tpu.dimension_semantics<arbitrary>, #tpu.dimension_semantics<arbitrary>], iteration_bounds = array<i64: 2, 1>, scalar_prefetch = 0 : i64, scratch_operands = 5 : i64, tpu.core_type = #tpu.core_type<tc>, window_params = [{transform_indices = @transform_0, window_bounds = array<i64: 400, 128>}, {pipeline_mode = #tpu.pipeline_mode<synchronous>, transform_indices = @transform_1, window_bounds = array<i64: 128, 128>}, {pipeline_mode = #tpu.pipeline_mode<synchronous>, transform_indices = @transform_2, window_bounds = array<i64: 1, 128>}, {pipeline_mode = #tpu.pipeline_mode<synchronous>, transform_indices = @transform_3, window_bounds = array<i64: 1, 128>}, {transform_indices = @transform_4, window_bounds = array<i64: 400, 128>}]} {
    %c400_i32 = arith.constant 400 : i32
    %0 = arith.muli %arg1, %c400_i32 : i32
    %1 = tpu.assume_multiple %0, 16 : i32
    %c0_i32 = arith.constant 0 : i32
    %2 = arith.cmpi eq, %arg0, %c0_i32 : i32
    %3 = arith.extui %2 : i1 to i32
    %c0_i32_0 = arith.constant 0 : i32
    %4 = arith.cmpi ne, %3, %c0_i32_0 : i32
    scf.if %4 {
      %c0 = arith.constant 0 : index
      %c0_2 = arith.constant 0 : index
      %8 = vector.load %arg2[%c0, %c0_2] : memref<400x128xbf16, #tpu.memory_space<vmem>>, vector<400x128xbf16>
      %c0_3 = arith.constant 0 : index
      %c0_4 = arith.constant 0 : index
      %9 = vector.load %arg3[%c0_3, %c0_4] : memref<128x128xbf16, #tpu.memory_space<vmem>>, vector<128x128xbf16>
      %cst = arith.constant dense<0.000000e+00> : vector<400x128xf32>
      %10 = tpu.matmul %8, %9, %cst {dimension_numbers = #tpu.dot_dimension_numbers<[1], [0], [0], [1], [0, 0, 1, 1], [], []>} : vector<400x128xbf16>, vector<128x128xbf16>, vector<400x128xf32> -> vector<400x128xf32>
      %11 = arith.index_cast %1 : i32 to index
      %c0_5 = arith.constant 0 : index
      %12 = vector.load %arg7[%11, %c0_5] : memref<400x128xf32, #tpu.memory_space<vmem>>, vector<400x128xf32>
      tpu.vector_store %arg7[%11, %c0_5], %10 {strides = array<i32>} : memref<400x128xf32, #tpu.memory_space<vmem>>, vector<400x128xf32>,
      %c0_i32_6 = arith.constant 0 : i32
      %13 = arith.cmpi eq, %arg1, %c0_i32_6 : i32
      %14 = arith.extui %13 : i1 to i32
      %c0_i32_7 = arith.constant 0 : i32
      %15 = arith.cmpi ne, %14, %c0_i32_7 : i32
      scf.if %15 {
        %cst_18 = arith.constant 0.000000e+00 : f32
        %27 = vector.broadcast %cst_18 : f32 to vector<1x128xf32>
        %c0_19 = arith.constant 0 : index
        %c0_20 = arith.constant 0 : index
        %28 = vector.load %arg8[%c0_19, %c0_20] : memref<1x128xf32, #tpu.memory_space<vmem>>, vector<1x128xf32>
        tpu.vector_store %arg8[%c0_19, %c0_20], %27 {strides = array<i32>} : memref<1x128xf32, #tpu.memory_space<vmem>>, vector<1x128xf32>,
        %cst_21 = arith.constant 0.000000e+00 : f32
        %29 = vector.broadcast %cst_21 : f32 to vector<1x128xf32>
        %c0_22 = arith.constant 0 : index
        %c0_23 = arith.constant 0 : index
        %30 = vector.load %arg9[%c0_22, %c0_23] : memref<1x128xf32, #tpu.memory_space<vmem>>, vector<1x128xf32>
        tpu.vector_store %arg9[%c0_22, %c0_23], %29 {strides = array<i32>} : memref<1x128xf32, #tpu.memory_space<vmem>>, vector<1x128xf32>,
      } else {
      }
      %c0_8 = arith.constant 0 : index
      %c0_9 = arith.constant 0 : index
      %16 = vector.load %arg8[%c0_8, %c0_9] : memref<1x128xf32, #tpu.memory_space<vmem>>, vector<1x128xf32>
      %cst_10 = arith.constant dense<0.000000e+00> : vector<128xf32>
      %17 = vector.multi_reduction <add>, %10, %cst_10 [0] : vector<400x128xf32> to vector<128xf32>
      %18 = vector.shape_cast %17 : vector<128xf32> to vector<1x128xf32>
      %19 = arith.addf %16, %18 : vector<1x128xf32>
      %c0_11 = arith.constant 0 : index
      %c0_12 = arith.constant 0 : index
      %20 = vector.load %arg8[%c0_11, %c0_12] : memref<1x128xf32, #tpu.memory_space<vmem>>, vector<1x128xf32>
      tpu.vector_store %arg8[%c0_11, %c0_12], %19 {strides = array<i32>} : memref<1x128xf32, #tpu.memory_space<vmem>>, vector<1x128xf32>,
      %c0_13 = arith.constant 0 : index
      %c0_14 = arith.constant 0 : index
      %21 = vector.load %arg9[%c0_13, %c0_14] : memref<1x128xf32, #tpu.memory_space<vmem>>, vector<1x128xf32>
      %22 = arith.mulf %10, %10 : vector<400x128xf32>
      %cst_15 = arith.constant dense<0.000000e+00> : vector<128xf32>
      %23 = vector.multi_reduction <add>, %22, %cst_15 [0] : vector<400x128xf32> to vector<128xf32>
      %24 = vector.shape_cast %23 : vector<128xf32> to vector<1x128xf32>
      %25 = arith.addf %21, %24 : vector<1x128xf32>
      %c0_16 = arith.constant 0 : index
      %c0_17 = arith.constant 0 : index
      %26 = vector.load %arg9[%c0_16, %c0_17] : memref<1x128xf32, #tpu.memory_space<vmem>>, vector<1x128xf32>
      tpu.vector_store %arg9[%c0_16, %c0_17], %25 {strides = array<i32>} : memref<1x128xf32, #tpu.memory_space<vmem>>, vector<1x128xf32>,
    } else {
    }
    %c1_i32 = arith.constant 1 : i32
    %5 = arith.cmpi eq, %arg0, %c1_i32 : i32
    %6 = arith.extui %5 : i1 to i32
    %c0_i32_1 = arith.constant 0 : i32
    %7 = arith.cmpi ne, %6, %c0_i32_1 : i32
    scf.if %7 {
      %c0_i32_2 = arith.constant 0 : i32
      %8 = arith.cmpi eq, %arg1, %c0_i32_2 : i32
      %9 = arith.extui %8 : i1 to i32
      %c0_i32_3 = arith.constant 0 : i32
      %10 = arith.cmpi ne, %9, %c0_i32_3 : i32
      scf.if %10 {
        %c0_11 = arith.constant 0 : index
        %c0_12 = arith.constant 0 : index
        %26 = vector.load %arg8[%c0_11, %c0_12] : memref<1x128xf32, #tpu.memory_space<vmem>>, vector<1x128xf32>
        %cst_13 = arith.constant 3.920000e+02 : f32
        %27 = vector.broadcast %cst_13 : f32 to vector<1x128xf32>
        %28 = arith.divf %26, %27 : vector<1x128xf32>
        %c0_14 = arith.constant 0 : index
        %c0_15 = arith.constant 0 : index
        %29 = vector.load %arg9[%c0_14, %c0_15] : memref<1x128xf32, #tpu.memory_space<vmem>>, vector<1x128xf32>
        %cst_16 = arith.constant 3.920000e+02 : f32
        %30 = vector.broadcast %cst_16 : f32 to vector<1x128xf32>
        %31 = arith.divf %29, %30 : vector<1x128xf32>
        %32 = arith.mulf %28, %28 : vector<1x128xf32>
        %33 = arith.subf %31, %32 : vector<1x128xf32>
        %cst_17 = arith.constant 0.000000e+00 : f32
        %34 = vector.broadcast %cst_17 : f32 to vector<1x128xf32>
        %35 = arith.maximumf %33, %34 : vector<1x128xf32>
        %c0_18 = arith.constant 0 : index
        %c0_19 = arith.constant 0 : index
        %36 = vector.load %arg4[%c0_18, %c0_19] : memref<1x128xf32, #tpu.memory_space<vmem>>, vector<1x128xf32>
        %cst_20 = arith.constant 9.99999974E-6 : f32
        %37 = vector.broadcast %cst_20 : f32 to vector<1x128xf32>
        %38 = arith.addf %35, %37 : vector<1x128xf32>
        %39 = math.rsqrt %38 : vector<1x128xf32>
        %40 = arith.mulf %36, %39 : vector<1x128xf32>
        %c0_21 = arith.constant 0 : index
        %c0_22 = arith.constant 0 : index
        %41 = vector.load %arg10[%c0_21, %c0_22] : memref<1x128xf32, #tpu.memory_space<vmem>>, vector<1x128xf32>
        tpu.vector_store %arg10[%c0_21, %c0_22], %40 {strides = array<i32>} : memref<1x128xf32, #tpu.memory_space<vmem>>, vector<1x128xf32>,
        %c0_23 = arith.constant 0 : index
        %c0_24 = arith.constant 0 : index
        %42 = vector.load %arg5[%c0_23, %c0_24] : memref<1x128xf32, #tpu.memory_space<vmem>>, vector<1x128xf32>
        %43 = arith.mulf %28, %40 : vector<1x128xf32>
        %44 = arith.subf %42, %43 : vector<1x128xf32>
        %c0_25 = arith.constant 0 : index
        %c0_26 = arith.constant 0 : index
        %45 = vector.load %arg11[%c0_25, %c0_26] : memref<1x128xf32, #tpu.memory_space<vmem>>, vector<1x128xf32>
        tpu.vector_store %arg11[%c0_25, %c0_26], %44 {strides = array<i32>} : memref<1x128xf32, #tpu.memory_space<vmem>>, vector<1x128xf32>,
      } else {
      }
      %11 = arith.index_cast %1 : i32 to index
      %c0 = arith.constant 0 : index
      %12 = vector.load %arg7[%11, %c0] : memref<400x128xf32, #tpu.memory_space<vmem>>, vector<400x128xf32>
      %c0_4 = arith.constant 0 : index
      %c0_5 = arith.constant 0 : index
      %13 = vector.load %arg10[%c0_4, %c0_5] : memref<1x128xf32, #tpu.memory_space<vmem>>, vector<1x128xf32>
      %14 = vector.broadcast %13 : vector<1x128xf32> to vector<400x128xf32>
      %15 = arith.mulf %12, %14 : vector<400x128xf32>
      %c0_6 = arith.constant 0 : index
      %c0_7 = arith.constant 0 : index
      %16 = vector.load %arg11[%c0_6, %c0_7] : memref<1x128xf32, #tpu.memory_space<vmem>>, vector<1x128xf32>
      %17 = vector.broadcast %16 : vector<1x128xf32> to vector<400x128xf32>
      %18 = arith.addf %15, %17 : vector<400x128xf32>
      %cst = arith.constant 0.000000e+00 : f32
      %19 = vector.broadcast %cst : f32 to vector<400x128xf32>
      %20 = arith.cmpf ogt, %18, %19 : vector<400x128xf32>
      %cst_8 = arith.constant 2.000000e-01 : f32
      %21 = vector.broadcast %cst_8 : f32 to vector<400x128xf32>
      %22 = arith.mulf %21, %18 : vector<400x128xf32>
      %23 = arith.select %20, %18, %22 : vector<400x128xi1>, vector<400x128xf32>
      %24 = arith.truncf %23 : vector<400x128xf32> to vector<400x128xbf16>
      %c0_9 = arith.constant 0 : index
      %c0_10 = arith.constant 0 : index
      %25 = vector.load %arg6[%c0_9, %c0_10] : memref<400x128xbf16, #tpu.memory_space<vmem>>, vector<400x128xbf16>
      tpu.vector_store %arg6[%c0_9, %c0_10], %24 {strides = array<i32>} : memref<400x128xbf16, #tpu.memory_space<vmem>>, vector<400x128xbf16>,
    } else {
    }
    return
  }
  func.func @transform_0(%arg0: i32, %arg1: i32) -> (i32, i32) {
    %c1_i32 = arith.constant 1 : i32
    %0 = arith.subi %c1_i32, %arg0 : i32
    %1 = arith.muli %0, %arg1 : i32
    %c0_i32 = arith.constant 0 : i32
    %c0_i32_0 = arith.constant 0 : i32
    return %1, %c0_i32 : i32, i32
  }
  func.func @transform_1(%arg0: i32, %arg1: i32) -> (i32, i32) {
    %c0_i32 = arith.constant 0 : i32
    %c0_i32_0 = arith.constant 0 : i32
    %c0_i32_1 = arith.constant 0 : i32
    return %c0_i32, %c0_i32_0 : i32, i32
  }
  func.func @transform_2(%arg0: i32, %arg1: i32) -> (i32, i32) {
    %c0_i32 = arith.constant 0 : i32
    %c0_i32_0 = arith.constant 0 : i32
    %c0_i32_1 = arith.constant 0 : i32
    return %c0_i32, %c0_i32_0 : i32, i32
  }
  func.func @transform_3(%arg0: i32, %arg1: i32) -> (i32, i32) {
    %c0_i32 = arith.constant 0 : i32
    %c0_i32_0 = arith.constant 0 : i32
    %c0_i32_1 = arith.constant 0 : i32
    return %c0_i32, %c0_i32_0 : i32, i32
  }
  func.func @transform_4(%arg0: i32, %arg1: i32) -> (i32, i32) {
    %0 = arith.muli %arg0, %arg1 : i32
    %c0_i32 = arith.constant 0 : i32
    %c0_i32_0 = arith.constant 0 : i32
    return %0, %c0_i32 : i32, i32
  }
}

module attributes {stable_mosaic.version = 11 : i64} {
  func.func @_conv_bn_lrelu_kernel(%arg0: i32, %arg1: i32, %arg2: memref<112x256xbf16, #tpu.memory_space<vmem>>, %arg3: memref<256x128xbf16, #tpu.memory_space<vmem>>, %arg4: memref<1x128xf32, #tpu.memory_space<vmem>>, %arg5: memref<1x128xf32, #tpu.memory_space<vmem>>, %arg6: memref<112x128xbf16, #tpu.memory_space<vmem>>, %arg7: memref<112x128xf32, #tpu.memory_space<vmem>>, %arg8: memref<1x128xf32, #tpu.memory_space<vmem>>, %arg9: memref<1x128xf32, #tpu.memory_space<vmem>>, %arg10: memref<1x128xf32, #tpu.memory_space<vmem>>, %arg11: memref<1x128xf32, #tpu.memory_space<vmem>>) attributes {dimension_semantics = [#tpu.dimension_semantics<arbitrary>, #tpu.dimension_semantics<arbitrary>], iteration_bounds = array<i64: 2, 1>, scalar_prefetch = 0 : i64, scratch_operands = 5 : i64, tpu.core_type = #tpu.core_type<tc>, window_params = [{transform_indices = @transform_0, window_bounds = array<i64: 112, 256>}, {pipeline_mode = #tpu.pipeline_mode<synchronous>, transform_indices = @transform_1, window_bounds = array<i64: 256, 128>}, {pipeline_mode = #tpu.pipeline_mode<synchronous>, transform_indices = @transform_2, window_bounds = array<i64: 1, 128>}, {pipeline_mode = #tpu.pipeline_mode<synchronous>, transform_indices = @transform_3, window_bounds = array<i64: 1, 128>}, {transform_indices = @transform_4, window_bounds = array<i64: 112, 128>}]} {
    %c112_i32 = arith.constant 112 : i32
    %0 = arith.muli %arg1, %c112_i32 : i32
    %1 = tpu.assume_multiple %0, 16 : i32
    %c0_i32 = arith.constant 0 : i32
    %2 = arith.cmpi eq, %arg0, %c0_i32 : i32
    %3 = arith.extui %2 : i1 to i32
    %c0_i32_0 = arith.constant 0 : i32
    %4 = arith.cmpi ne, %3, %c0_i32_0 : i32
    scf.if %4 {
      %c0 = arith.constant 0 : index
      %c0_2 = arith.constant 0 : index
      %8 = vector.load %arg2[%c0, %c0_2] : memref<112x256xbf16, #tpu.memory_space<vmem>>, vector<112x256xbf16>
      %c0_3 = arith.constant 0 : index
      %c0_4 = arith.constant 0 : index
      %9 = vector.load %arg3[%c0_3, %c0_4] : memref<256x128xbf16, #tpu.memory_space<vmem>>, vector<256x128xbf16>
      %cst = arith.constant dense<0.000000e+00> : vector<112x128xf32>
      %10 = tpu.matmul %8, %9, %cst {dimension_numbers = #tpu.dot_dimension_numbers<[1], [0], [0], [1], [0, 0, 1, 1], [], []>} : vector<112x256xbf16>, vector<256x128xbf16>, vector<112x128xf32> -> vector<112x128xf32>
      %11 = arith.index_cast %1 : i32 to index
      %c0_5 = arith.constant 0 : index
      %12 = vector.load %arg7[%11, %c0_5] : memref<112x128xf32, #tpu.memory_space<vmem>>, vector<112x128xf32>
      tpu.vector_store %arg7[%11, %c0_5], %10 {strides = array<i32>} : memref<112x128xf32, #tpu.memory_space<vmem>>, vector<112x128xf32>,
      %c0_i32_6 = arith.constant 0 : i32
      %13 = arith.cmpi eq, %arg1, %c0_i32_6 : i32
      %14 = arith.extui %13 : i1 to i32
      %c0_i32_7 = arith.constant 0 : i32
      %15 = arith.cmpi ne, %14, %c0_i32_7 : i32
      scf.if %15 {
        %cst_18 = arith.constant 0.000000e+00 : f32
        %27 = vector.broadcast %cst_18 : f32 to vector<1x128xf32>
        %c0_19 = arith.constant 0 : index
        %c0_20 = arith.constant 0 : index
        %28 = vector.load %arg8[%c0_19, %c0_20] : memref<1x128xf32, #tpu.memory_space<vmem>>, vector<1x128xf32>
        tpu.vector_store %arg8[%c0_19, %c0_20], %27 {strides = array<i32>} : memref<1x128xf32, #tpu.memory_space<vmem>>, vector<1x128xf32>,
        %cst_21 = arith.constant 0.000000e+00 : f32
        %29 = vector.broadcast %cst_21 : f32 to vector<1x128xf32>
        %c0_22 = arith.constant 0 : index
        %c0_23 = arith.constant 0 : index
        %30 = vector.load %arg9[%c0_22, %c0_23] : memref<1x128xf32, #tpu.memory_space<vmem>>, vector<1x128xf32>
        tpu.vector_store %arg9[%c0_22, %c0_23], %29 {strides = array<i32>} : memref<1x128xf32, #tpu.memory_space<vmem>>, vector<1x128xf32>,
      } else {
      }
      %c0_8 = arith.constant 0 : index
      %c0_9 = arith.constant 0 : index
      %16 = vector.load %arg8[%c0_8, %c0_9] : memref<1x128xf32, #tpu.memory_space<vmem>>, vector<1x128xf32>
      %cst_10 = arith.constant dense<0.000000e+00> : vector<128xf32>
      %17 = vector.multi_reduction <add>, %10, %cst_10 [0] : vector<112x128xf32> to vector<128xf32>
      %18 = vector.shape_cast %17 : vector<128xf32> to vector<1x128xf32>
      %19 = arith.addf %16, %18 : vector<1x128xf32>
      %c0_11 = arith.constant 0 : index
      %c0_12 = arith.constant 0 : index
      %20 = vector.load %arg8[%c0_11, %c0_12] : memref<1x128xf32, #tpu.memory_space<vmem>>, vector<1x128xf32>
      tpu.vector_store %arg8[%c0_11, %c0_12], %19 {strides = array<i32>} : memref<1x128xf32, #tpu.memory_space<vmem>>, vector<1x128xf32>,
      %c0_13 = arith.constant 0 : index
      %c0_14 = arith.constant 0 : index
      %21 = vector.load %arg9[%c0_13, %c0_14] : memref<1x128xf32, #tpu.memory_space<vmem>>, vector<1x128xf32>
      %22 = arith.mulf %10, %10 : vector<112x128xf32>
      %cst_15 = arith.constant dense<0.000000e+00> : vector<128xf32>
      %23 = vector.multi_reduction <add>, %22, %cst_15 [0] : vector<112x128xf32> to vector<128xf32>
      %24 = vector.shape_cast %23 : vector<128xf32> to vector<1x128xf32>
      %25 = arith.addf %21, %24 : vector<1x128xf32>
      %c0_16 = arith.constant 0 : index
      %c0_17 = arith.constant 0 : index
      %26 = vector.load %arg9[%c0_16, %c0_17] : memref<1x128xf32, #tpu.memory_space<vmem>>, vector<1x128xf32>
      tpu.vector_store %arg9[%c0_16, %c0_17], %25 {strides = array<i32>} : memref<1x128xf32, #tpu.memory_space<vmem>>, vector<1x128xf32>,
    } else {
    }
    %c1_i32 = arith.constant 1 : i32
    %5 = arith.cmpi eq, %arg0, %c1_i32 : i32
    %6 = arith.extui %5 : i1 to i32
    %c0_i32_1 = arith.constant 0 : i32
    %7 = arith.cmpi ne, %6, %c0_i32_1 : i32
    scf.if %7 {
      %c0_i32_2 = arith.constant 0 : i32
      %8 = arith.cmpi eq, %arg1, %c0_i32_2 : i32
      %9 = arith.extui %8 : i1 to i32
      %c0_i32_3 = arith.constant 0 : i32
      %10 = arith.cmpi ne, %9, %c0_i32_3 : i32
      scf.if %10 {
        %c0_11 = arith.constant 0 : index
        %c0_12 = arith.constant 0 : index
        %26 = vector.load %arg8[%c0_11, %c0_12] : memref<1x128xf32, #tpu.memory_space<vmem>>, vector<1x128xf32>
        %cst_13 = arith.constant 9.800000e+01 : f32
        %27 = vector.broadcast %cst_13 : f32 to vector<1x128xf32>
        %28 = arith.divf %26, %27 : vector<1x128xf32>
        %c0_14 = arith.constant 0 : index
        %c0_15 = arith.constant 0 : index
        %29 = vector.load %arg9[%c0_14, %c0_15] : memref<1x128xf32, #tpu.memory_space<vmem>>, vector<1x128xf32>
        %cst_16 = arith.constant 9.800000e+01 : f32
        %30 = vector.broadcast %cst_16 : f32 to vector<1x128xf32>
        %31 = arith.divf %29, %30 : vector<1x128xf32>
        %32 = arith.mulf %28, %28 : vector<1x128xf32>
        %33 = arith.subf %31, %32 : vector<1x128xf32>
        %cst_17 = arith.constant 0.000000e+00 : f32
        %34 = vector.broadcast %cst_17 : f32 to vector<1x128xf32>
        %35 = arith.maximumf %33, %34 : vector<1x128xf32>
        %c0_18 = arith.constant 0 : index
        %c0_19 = arith.constant 0 : index
        %36 = vector.load %arg4[%c0_18, %c0_19] : memref<1x128xf32, #tpu.memory_space<vmem>>, vector<1x128xf32>
        %cst_20 = arith.constant 9.99999974E-6 : f32
        %37 = vector.broadcast %cst_20 : f32 to vector<1x128xf32>
        %38 = arith.addf %35, %37 : vector<1x128xf32>
        %39 = math.rsqrt %38 : vector<1x128xf32>
        %40 = arith.mulf %36, %39 : vector<1x128xf32>
        %c0_21 = arith.constant 0 : index
        %c0_22 = arith.constant 0 : index
        %41 = vector.load %arg10[%c0_21, %c0_22] : memref<1x128xf32, #tpu.memory_space<vmem>>, vector<1x128xf32>
        tpu.vector_store %arg10[%c0_21, %c0_22], %40 {strides = array<i32>} : memref<1x128xf32, #tpu.memory_space<vmem>>, vector<1x128xf32>,
        %c0_23 = arith.constant 0 : index
        %c0_24 = arith.constant 0 : index
        %42 = vector.load %arg5[%c0_23, %c0_24] : memref<1x128xf32, #tpu.memory_space<vmem>>, vector<1x128xf32>
        %43 = arith.mulf %28, %40 : vector<1x128xf32>
        %44 = arith.subf %42, %43 : vector<1x128xf32>
        %c0_25 = arith.constant 0 : index
        %c0_26 = arith.constant 0 : index
        %45 = vector.load %arg11[%c0_25, %c0_26] : memref<1x128xf32, #tpu.memory_space<vmem>>, vector<1x128xf32>
        tpu.vector_store %arg11[%c0_25, %c0_26], %44 {strides = array<i32>} : memref<1x128xf32, #tpu.memory_space<vmem>>, vector<1x128xf32>,
      } else {
      }
      %11 = arith.index_cast %1 : i32 to index
      %c0 = arith.constant 0 : index
      %12 = vector.load %arg7[%11, %c0] : memref<112x128xf32, #tpu.memory_space<vmem>>, vector<112x128xf32>
      %c0_4 = arith.constant 0 : index
      %c0_5 = arith.constant 0 : index
      %13 = vector.load %arg10[%c0_4, %c0_5] : memref<1x128xf32, #tpu.memory_space<vmem>>, vector<1x128xf32>
      %14 = vector.broadcast %13 : vector<1x128xf32> to vector<112x128xf32>
      %15 = arith.mulf %12, %14 : vector<112x128xf32>
      %c0_6 = arith.constant 0 : index
      %c0_7 = arith.constant 0 : index
      %16 = vector.load %arg11[%c0_6, %c0_7] : memref<1x128xf32, #tpu.memory_space<vmem>>, vector<1x128xf32>
      %17 = vector.broadcast %16 : vector<1x128xf32> to vector<112x128xf32>
      %18 = arith.addf %15, %17 : vector<112x128xf32>
      %cst = arith.constant 0.000000e+00 : f32
      %19 = vector.broadcast %cst : f32 to vector<112x128xf32>
      %20 = arith.cmpf ogt, %18, %19 : vector<112x128xf32>
      %cst_8 = arith.constant 2.000000e-01 : f32
      %21 = vector.broadcast %cst_8 : f32 to vector<112x128xf32>
      %22 = arith.mulf %21, %18 : vector<112x128xf32>
      %23 = arith.select %20, %18, %22 : vector<112x128xi1>, vector<112x128xf32>
      %24 = arith.truncf %23 : vector<112x128xf32> to vector<112x128xbf16>
      %c0_9 = arith.constant 0 : index
      %c0_10 = arith.constant 0 : index
      %25 = vector.load %arg6[%c0_9, %c0_10] : memref<112x128xbf16, #tpu.memory_space<vmem>>, vector<112x128xbf16>
      tpu.vector_store %arg6[%c0_9, %c0_10], %24 {strides = array<i32>} : memref<112x128xbf16, #tpu.memory_space<vmem>>, vector<112x128xbf16>,
    } else {
    }
    return
  }
  func.func @transform_0(%arg0: i32, %arg1: i32) -> (i32, i32) {
    %c1_i32 = arith.constant 1 : i32
    %0 = arith.subi %c1_i32, %arg0 : i32
    %1 = arith.muli %0, %arg1 : i32
    %c0_i32 = arith.constant 0 : i32
    %c0_i32_0 = arith.constant 0 : i32
    return %1, %c0_i32 : i32, i32
  }
  func.func @transform_1(%arg0: i32, %arg1: i32) -> (i32, i32) {
    %c0_i32 = arith.constant 0 : i32
    %c0_i32_0 = arith.constant 0 : i32
    %c0_i32_1 = arith.constant 0 : i32
    return %c0_i32, %c0_i32_0 : i32, i32
  }
  func.func @transform_2(%arg0: i32, %arg1: i32) -> (i32, i32) {
    %c0_i32 = arith.constant 0 : i32
    %c0_i32_0 = arith.constant 0 : i32
    %c0_i32_1 = arith.constant 0 : i32
    return %c0_i32, %c0_i32_0 : i32, i32
  }
  func.func @transform_3(%arg0: i32, %arg1: i32) -> (i32, i32) {
    %c0_i32 = arith.constant 0 : i32
    %c0_i32_0 = arith.constant 0 : i32
    %c0_i32_1 = arith.constant 0 : i32
    return %c0_i32, %c0_i32_0 : i32, i32
  }
  func.func @transform_4(%arg0: i32, %arg1: i32) -> (i32, i32) {
    %0 = arith.muli %arg0, %arg1 : i32
    %c0_i32 = arith.constant 0 : i32
    %c0_i32_0 = arith.constant 0 : i32
    return %0, %c0_i32 : i32, i32
  }
}

module attributes {stable_mosaic.version = 11 : i64} {
  func.func @_tail_kernel(%arg0: memref<32x512xbf16, #tpu.memory_space<vmem>>, %arg1: memref<512x128xbf16, #tpu.memory_space<vmem>>, %arg2: memref<1x128xf32, #tpu.memory_space<vmem>>, %arg3: memref<1x128xf32, #tpu.memory_space<vmem>>, %arg4: memref<32x128xf32, #tpu.memory_space<vmem>>, %arg5: memref<8x32xf32, #tpu.memory_space<vmem>>, %arg6: memref<8x1xf32, #tpu.memory_space<vmem>>) attributes {dimension_semantics = [], scalar_prefetch = 0 : i64, scratch_operands = 0 : i64, tpu.core_type = #tpu.core_type<tc>} {
    %c0 = arith.constant 0 : index
    %c0_0 = arith.constant 0 : index
    %0 = vector.load %arg0[%c0, %c0_0] : memref<32x512xbf16, #tpu.memory_space<vmem>>, vector<32x512xbf16>
    %c0_1 = arith.constant 0 : index
    %c0_2 = arith.constant 0 : index
    %1 = vector.load %arg1[%c0_1, %c0_2] : memref<512x128xbf16, #tpu.memory_space<vmem>>, vector<512x128xbf16>
    %cst = arith.constant dense<0.000000e+00> : vector<32x128xf32>
    %2 = tpu.matmul %0, %1, %cst {dimension_numbers = #tpu.dot_dimension_numbers<[1], [0], [0], [1], [0, 0, 1, 1], [], []>} : vector<32x512xbf16>, vector<512x128xbf16>, vector<32x128xf32> -> vector<32x128xf32>
    %cst_3 = arith.constant dense<0.000000e+00> : vector<128xf32>
    %3 = vector.multi_reduction <add>, %2, %cst_3 [0] : vector<32x128xf32> to vector<128xf32>
    %4 = vector.shape_cast %3 : vector<128xf32> to vector<1x128xf32>
    %cst_4 = arith.constant 3.200000e+01 : f32
    %5 = vector.broadcast %cst_4 : f32 to vector<1x128xf32>
    %6 = arith.divf %4, %5 : vector<1x128xf32>
    %7 = arith.mulf %2, %2 : vector<32x128xf32>
    %cst_5 = arith.constant dense<0.000000e+00> : vector<128xf32>
    %8 = vector.multi_reduction <add>, %7, %cst_5 [0] : vector<32x128xf32> to vector<128xf32>
    %9 = vector.shape_cast %8 : vector<128xf32> to vector<1x128xf32>
    %cst_6 = arith.constant 3.200000e+01 : f32
    %10 = vector.broadcast %cst_6 : f32 to vector<1x128xf32>
    %11 = arith.divf %9, %10 : vector<1x128xf32>
    %12 = arith.mulf %6, %6 : vector<1x128xf32>
    %13 = arith.subf %11, %12 : vector<1x128xf32>
    %cst_7 = arith.constant 0.000000e+00 : f32
    %14 = vector.broadcast %cst_7 : f32 to vector<1x128xf32>
    %15 = arith.maximumf %13, %14 : vector<1x128xf32>
    %c0_8 = arith.constant 0 : index
    %c0_9 = arith.constant 0 : index
    %16 = vector.load %arg2[%c0_8, %c0_9] : memref<1x128xf32, #tpu.memory_space<vmem>>, vector<1x128xf32>
    %cst_10 = arith.constant 9.99999974E-6 : f32
    %17 = vector.broadcast %cst_10 : f32 to vector<1x128xf32>
    %18 = arith.addf %15, %17 : vector<1x128xf32>
    %19 = math.rsqrt %18 : vector<1x128xf32>
    %20 = arith.mulf %16, %19 : vector<1x128xf32>
    %c0_11 = arith.constant 0 : index
    %c0_12 = arith.constant 0 : index
    %21 = vector.load %arg3[%c0_11, %c0_12] : memref<1x128xf32, #tpu.memory_space<vmem>>, vector<1x128xf32>
    %22 = arith.mulf %6, %20 : vector<1x128xf32>
    %23 = arith.subf %21, %22 : vector<1x128xf32>
    %24 = vector.broadcast %20 : vector<1x128xf32> to vector<32x128xf32>
    %25 = arith.mulf %2, %24 : vector<32x128xf32>
    %26 = vector.broadcast %23 : vector<1x128xf32> to vector<32x128xf32>
    %27 = arith.addf %25, %26 : vector<32x128xf32>
    %cst_13 = arith.constant 0.000000e+00 : f32
    %28 = vector.broadcast %cst_13 : f32 to vector<32x128xf32>
    %29 = arith.cmpf ogt, %27, %28 : vector<32x128xf32>
    %cst_14 = arith.constant 2.000000e-01 : f32
    %30 = vector.broadcast %cst_14 : f32 to vector<32x128xf32>
    %31 = arith.mulf %30, %27 : vector<32x128xf32>
    %32 = arith.select %29, %27, %31 : vector<32x128xi1>, vector<32x128xf32>
    %c0_15 = arith.constant 0 : index
    %c0_16 = arith.constant 0 : index
    %33 = vector.load %arg4[%c0_15, %c0_16] : memref<32x128xf32, #tpu.memory_space<vmem>>, vector<32x128xf32>
    %34 = arith.mulf %32, %33 : vector<32x128xf32>
    %c0_17 = arith.constant 0 : index
    %c0_18 = arith.constant 0 : index
    %35 = vector.load %arg5[%c0_17, %c0_18] : memref<8x32xf32, #tpu.memory_space<vmem>>, vector<8x32xf32>
    %cst_19 = arith.constant dense<0.000000e+00> : vector<8x128xf32>
    %36 = tpu.matmul %35, %34, %cst_19 {dimension_numbers = #tpu.dot_dimension_numbers<[1], [0], [0], [1], [0, 0, 1, 1], [], []>} : vector<8x32xf32>, vector<32x128xf32>, vector<8x128xf32> -> vector<8x128xf32>
    %cst_20 = arith.constant dense<0.000000e+00> : vector<8xf32>
    %37 = vector.multi_reduction <add>, %36, %cst_20 [1] : vector<8x128xf32> to vector<8xf32>
    %38 = vector.shape_cast %37 : vector<8xf32> to vector<8x1xf32>
    %39 = arith.negf %38 : vector<8x1xf32>
    %40 = math.exp %39 : vector<8x1xf32>
    %cst_21 = arith.constant 1.000000e+00 : f32
    %41 = vector.broadcast %cst_21 : f32 to vector<8x1xf32>
    %42 = arith.addf %41, %40 : vector<8x1xf32>
    %43 = arith.divf %41, %42 : vector<8x1xf32>
    %c0_22 = arith.constant 0 : index
    %c0_23 = arith.constant 0 : index
    %44 = vector.load %arg6[%c0_22, %c0_23] : memref<8x1xf32, #tpu.memory_space<vmem>>, vector<8x1xf32>
    tpu.vector_store %arg6[%c0_22, %c0_23], %43 {strides = array<i32>} : memref<8x1xf32, #tpu.memory_space<vmem>>, vector<8x1xf32>,
    return
  }
}

</mosaic_0001>

<bundles_post_ra>
// kernel: discriminator_forward.4
= control target key start
LH: loop header
LB: loop body
LE: loop exit
PB: predicated region body
PF: predicated region fallthrough
CT: control target
= control target key end

     0   :  { %s2934_s9 = smov 0   ;;  %s3242_s0 = inlined_call_operand.vmem [shape: bf16[1568,112], index: 0, kind: input, shape index: {}]   ;;  %s3243_s1 = inlined_call_operand.vmem [shape: bf16[112,128], index: 1, kind: input, shape index: {}]   ;;  %s3244_s2 = inlined_call_operand.vmem [shape: bf16[1568,128], index: 2, kind: output, shape index: {}]  }
   0x1 LB: > { %s1960_s10 = sadd.s32 4294967295, %s2915_s9   ;;  %p1964_p0 = scmp.ge.s32.totalorder %s2915_s9, 1  ;;  %s2915_s9 = sphi %s2934_s9, %s12_s9  }
   0x2   : > { %p113_p1 = scmp.lt.s32.totalorder %s2915_s9, 3 }
   0x4   : > { %p114_p2 = pnand %p1964_p0, %p113_p1 }
   0x5   : > { %v2853_v0 = vld [vmem:[%s3243_s1] sm:$0xff] (!%p114_p2)   ;;  %v2917_v1 = vmov (!%p114_p2), 0.0   ;;  %v2854_v2 = vld [vmem:[%s3243_s1 + $0x8] sm:$0xff] (!%p114_p2)   ;;  %s135_s15 = smul.u32 (!%p114_p2), 98, %s1960_s10  ;;  %vm2918_vm0 = vmmov (!%p114_p2), 0   ;;  %v2855_v3 = vld [vmem:[%s3243_s1 + $0x10] sm:$0xff] (!%p114_p2)  }
   0x6   : > { %117 = sbr.rel (%p114_p2) target bundleno = 446 (0x1be), region = 28  ;;  %2619 = vmatprep.subr.bf16.mxu0 (!%p114_p2), %v2917_v1  ;;  %2829 = vmatprep.subr.bf16.mxu1 (!%p114_p2), %v2917_v1  ;;  %v2856_v4 = vld [vmem:[%s3243_s1 + $0x18] sm:$0xff] (!%p114_p2)   ;;  %v2857_v5 = vld [vmem:[%s3243_s1 + $0x20] sm:$0xff] (!%p114_p2)   ;;  %v2858_v6 = vld [vmem:[%s3243_s1 + $0x28] sm:$0xff] (!%p114_p2)   ;;  %vm547_vm1 = vcmask (!%p114_p2), 916480  }
   0x7   : > { %2620 = vmatpush3.bf16.msra.mxu0 (!%p114_p2), %v2853_v0  ;;  %2836 = vmatpush3.bf16.msra.mxu1 (!%p114_p2), %v2853_v0  ;;  %p136_p3 = scmp.lt.s32.totalorder (!%p114_p2), %s135_s15, 195  ;;  %v2859_v7 = vld [vmem:[%s3243_s1 + $0x30] sm:$0xff] (!%p114_p2)  }
   0x8   : > { %2621 = vmatprep.subr.bf16.mxu0 (!%p114_p2), %v2917_v1  ;;  %2830 = vmatprep.subr.bf16.mxu1 (!%p114_p2), %v2917_v1 }
   0x9   : > { %2633 = vmatprep.mubr.msk.bf16.mxu0 (!%p114_p2), %vm2918_vm0, %v2917_v1  ;;  %2733 = vmatprep.mubr.msk.bf16.mxu1 (!%p114_p2), %vm2918_vm0, %v2917_v1 }
   0xb   : > { %2622 = vmatpush3.bf16.msra.mxu0 (!%p114_p2), %v2854_v2  ;;  %2837 = vmatpush3.bf16.msra.mxu1 (!%p114_p2), %v2854_v2 }
   0xc   : > { %2623 = vmatprep.subr.bf16.mxu0 (!%p114_p2), %v2917_v1  ;;  %2831 = vmatprep.subr.bf16.mxu1 (!%p114_p2), %v2917_v1 }
   0xd   : > { %s3246_s15 = smov (!%p136_p3, %s135_s15), 195 }
   0xe   : > { %s1965_s18 = sshll.u32 %s3246_s15, 2 }
   0xf   : > { %s2969_s21 = scalar_lea.vmem %s3242_s0, %s1965_s18  ;;  %2624 = vmatpush3.bf16.msra.mxu0 %v2855_v3  ;;  %2838 = vmatpush3.bf16.msra.mxu1 %v2855_v3  ;;  %s3188_s4 = scalar_lea.vmem %s3244_s2, %s1965_s18 }
  0x10   : > { %2625 = vmatprep.subr.bf16.mxu0 %v2917_v1  ;;  %2832 = vmatprep.subr.bf16.mxu1 %v2917_v1  ;;  %v2860_v8 = vld [vmem:[%s2969_s21] sm:$0xff]   ;;  %v2861_v9 = vld [vmem:[%s2969_s21 + $0xc8] sm:$0xff]   ;;  %v2863_v11 = vld [vmem:[%s2969_s21 + $0xd0] sm:$0xff]  }
  0x11   : > { %v2862_v10 = vld [vmem:[%s2969_s21 + $0x8] sm:$0xff]   ;;  %v2864_v12 = vld [vmem:[%s2969_s21 + $0x10] sm:$0xff]   ;;  %v2865_v13 = vld [vmem:[%s2969_s21 + $0xd8] sm:$0xff]  }
  0x12   : > { %v2866_v14 = vld [vmem:[%s2969_s21 + $0x18] sm:$0xff]   ;;  %v2867_v15 = vld [vmem:[%s2969_s21 + $0xe0] sm:$0xff]   ;;  %v2869_v17 = vld [vmem:[%s2969_s21 + $0xe8] sm:$0xff]  }
  0x13   : > { %2626 = vmatpush3.bf16.msra.mxu0 %v2856_v4  ;;  %2839 = vmatpush3.bf16.msra.mxu1 %v2856_v4  ;;  %v2868_v16 = vld [vmem:[%s2969_s21 + $0x20] sm:$0xff]   ;;  %v2870_v18 = vld [vmem:[%s2969_s21 + $0x28] sm:$0xff]   ;;  %v2871_v19 = vld [vmem:[%s2969_s21 + $0xf0] sm:$0xff]  }
  0x14   : > { %2627 = vmatprep.subr.bf16.mxu0 %v2917_v1  ;;  %2833 = vmatprep.subr.bf16.mxu1 %v2917_v1  ;;  %v2872_v20 = vld [vmem:[%s2969_s21 + $0x30] sm:$0xff]   ;;  %v2873_v21 = vld [vmem:[%s2969_s21 + $0xf8] sm:$0xff]   ;;  %v2875_v23 = vld [vmem:[%s2969_s21 + $0x100] sm:$0xff]  }
  0x15   : > { %v2874_v22 = vld [vmem:[%s2969_s21 + $0x38] sm:$0xff]   ;;  %v2876_v24 = vld [vmem:[%s2969_s21 + $0x40] sm:$0xff]   ;;  %v2877_v25 = vld [vmem:[%s2969_s21 + $0x108] sm:$0xff]  }
  0x16   : > { %v2878_v26 = vld [vmem:[%s2969_s21 + $0x48] sm:$0xff]   ;;  %v2879_v27 = vld [vmem:[%s2969_s21 + $0x110] sm:$0xff]   ;;  %v2881_v29 = vld [vmem:[%s2969_s21 + $0x118] sm:$0xff]  }
  0x17   : > { %2628 = vmatpush3.bf16.msra.mxu0 %v2857_v5  ;;  %2840 = vmatpush3.bf16.msra.mxu1 %v2857_v5  ;;  %v2880_v28 = vld [vmem:[%s2969_s21 + $0x50] sm:$0xff]   ;;  %v2882_v30 = vld [vmem:[%s2969_s21 + $0x58] sm:$0xff]   ;;  %v2883_v31 = vld [vmem:[%s2969_s21 + $0x120] sm:$0xff]  }
  0x18   : > { %2629 = vmatprep.subr.bf16.mxu0 %v2917_v1  ;;  %2834 = vmatprep.subr.bf16.mxu1 %v2917_v1  ;;  %v2884_v32 = vld [vmem:[%s2969_s21 + $0x60] sm:$0xff]   ;;  %v2885_v33 = vld [vmem:[%s2969_s21 + $0x128] sm:$0xff]   ;;  %v2887_v35 = vld [vmem:[%s2969_s21 + $0x130] sm:$0xff]  }
  0x19   : > { %v2886_v34 = vld [vmem:[%s2969_s21 + $0x68] sm:$0xff]   ;;  %v2888_v36 = vld [vmem:[%s2969_s21 + $0x70] sm:$0xff]   ;;  %v2889_v37 = vld [vmem:[%s2969_s21 + $0x138] sm:$0xff]  }
  0x1a   : > { %v2890_v38 = vld [vmem:[%s2969_s21 + $0x78] sm:$0xff]   ;;  %v2891_v39 = vld [vmem:[%s2969_s21 + $0x140] sm:$0xff]   ;;  %v2893_v41 = vld [vmem:[%s2969_s21 + $0x148] sm:$0xff]  }
  0x1b   : > { %2630 = vmatpush3.bf16.msra.mxu0 %v2858_v6  ;;  %2841 = vmatpush3.bf16.msra.mxu1 %v2858_v6  ;;  %v2892_v40 = vld [vmem:[%s2969_s21 + $0x80] sm:$0xff]   ;;  %v2894_v42 = vld [vmem:[%s2969_s21 + $0x88] sm:$0xff]   ;;  %v2895_v43 = vld [vmem:[%s2969_s21 + $0x150] sm:$0xff]  }
  0x1c   : > { %2631 = vmatprep.subr.bf16.mxu0 %v2917_v1  ;;  %2835 = vmatprep.subr.bf16.mxu1 %v2917_v1  ;;  %v2896_v44 = vld [vmem:[%s2969_s21 + $0x90] sm:$0xff]   ;;  %v2897_v45 = vld [vmem:[%s2969_s21 + $0x158] sm:$0xff]   ;;  %v2899_v47 = vld [vmem:[%s2969_s21 + $0x160] sm:$0xff]  }
  0x1d   : > { %v2898_v46 = vld [vmem:[%s2969_s21 + $0x98] sm:$0xff]   ;;  %v2900_v48 = vld [vmem:[%s2969_s21 + $0xa0] sm:$0xff]   ;;  %v2901_v49 = vld [vmem:[%s2969_s21 + $0x168] sm:$0xff]  }
  0x1e   : > { %v2902_v50 = vld [vmem:[%s2969_s21 + $0xa8] sm:$0xff]   ;;  %v2903_v51 = vld [vmem:[%s2969_s21 + $0x170] sm:$0xff]   ;;  %v2905_v53 = vld [vmem:[%s2969_s21 + $0x178] sm:$0xff]  }
  0x1f   : > { %2632 = vmatpush3.bf16.msra.mxu0 %v2859_v7  ;;  %2842 = vmatpush3.bf16.msra.mxu1 %v2859_v7  ;;  %v2904_v52 = vld [vmem:[%s2969_s21 + $0xb0] sm:$0xff]   ;;  %v2906_v54 = vld [vmem:[%s2969_s21 + $0xb8] sm:$0xff]   ;;  %v2907_v55 = vld [vmem:[%s2969_s21 + $0x180] sm:$0xff]  }
  0x20   : > { %v2908_v56 = vld [vmem:[%s2969_s21 + $0xc0] sm:$0xff]  }
  0x22   : > { %2634 = vmatmul.mubr.msk.bf16.vlgmr.msra.gmra.mrb[0].mxu0 %vm547_vm1, %v2860_v8  ;;  %2734 = vmatmul.mubr.msk.bf16.vlgmr.msra.gmra.mrb[0].mxu1 %vm547_vm1, %v2861_v9 }
  0x23   : > { %2637 = vmatprep.mubr.msk.bf16.mxu0 %vm2918_vm0, %v2917_v1  ;;  %2737 = vmatprep.mubr.msk.bf16.mxu1 %vm2918_vm0, %v2917_v1 }
  0x2a   : > { %2638 = vmatmul.mubr.msk.bf16.gmra.mrb[4].mxu0 %vm547_vm1, %v2862_v10  ;;  %2738 = vmatmul.mubr.msk.bf16.gmra.mrb[4].mxu1 %vm547_vm1, %v2863_v11 }
  0x2b   : > { %2641 = vmatprep.mubr.msk.bf16.mxu0 %vm2918_vm0, %v2917_v1  ;;  %2741 = vmatprep.mubr.msk.bf16.mxu1 %vm2918_vm0, %v2917_v1 }
  0x32   : > { %2642 = vmatmul.mubr.msk.bf16.gmra.mrb[8].mxu0 %vm547_vm1, %v2864_v12  ;;  %2742 = vmatmul.mubr.msk.bf16.gmra.mrb[8].mxu1 %vm547_vm1, %v2865_v13 }
  0x33   : > { %2645 = vmatprep.mubr.msk.bf16.mxu0 %vm2918_vm0, %v2917_v1  ;;  %2745 = vmatprep.mubr.msk.bf16.mxu1 %vm2918_vm0, %v2917_v1 }
  0x3a   : > { %2646 = vmatmul.mubr.msk.bf16.gmra.mrb[12].mxu0 %vm547_vm1, %v2866_v14  ;;  %2746 = vmatmul.mubr.msk.bf16.gmra.mrb[12].mxu1 %vm547_vm1, %v2867_v15 }
  0x3b   : > { %2649 = vmatprep.mubr.msk.bf16.mxu0 %vm2918_vm0, %v2917_v1  ;;  %2749 = vmatprep.mubr.msk.bf16.mxu1 %vm2918_vm0, %v2917_v1 }
  0x42   : > { %2650 = vmatmul.mubr.msk.bf16.gmra.mrb[16].mxu0 %vm547_vm1, %v2868_v16  ;;  %2750 = vmatmul.mubr.msk.bf16.gmra.mrb[16].mxu1 %vm547_vm1, %v2869_v17 }
  0x43   : > { %2653 = vmatprep.mubr.msk.bf16.mxu0 %vm2918_vm0, %v2917_v1  ;;  %2753 = vmatprep.mubr.msk.bf16.mxu1 %vm2918_vm0, %v2917_v1 }
  0x4a   : > { %2654 = vmatmul.mubr.msk.bf16.gmra.mrb[20].mxu0 %vm547_vm1, %v2870_v18  ;;  %2754 = vmatmul.mubr.msk.bf16.gmra.mrb[20].mxu1 %vm547_vm1, %v2871_v19 }
  0x4b   : > { %2657 = vmatprep.mubr.msk.bf16.mxu0 %vm2918_vm0, %v2917_v1  ;;  %2757 = vmatprep.mubr.msk.bf16.mxu1 %vm2918_vm0, %v2917_v1 }
  0x52   : > { %2658 = vmatmul.mubr.msk.bf16.gmra.mrb[24].mxu0 %vm547_vm1, %v2872_v20  ;;  %2758 = vmatmul.mubr.msk.bf16.gmra.mrb[24].mxu1 %vm547_vm1, %v2873_v21 }
  0x53   : > { %2661 = vmatprep.mubr.msk.bf16.mxu0 %vm2918_vm0, %v2917_v1  ;;  %2761 = vmatprep.mubr.msk.bf16.mxu1 %vm2918_vm0, %v2917_v1 }
  0x5a   : > { %2662 = vmatmul.mubr.msk.bf16.gmra.mrb[28].mxu0 %vm547_vm1, %v2874_v22  ;;  %2762 = vmatmul.mubr.msk.bf16.gmra.mrb[28].mxu1 %vm547_vm1, %v2875_v23 }
  0x5b   : > { %2665 = vmatprep.mubr.msk.bf16.mxu0 %vm2918_vm0, %v2917_v1  ;;  %2765 = vmatprep.mubr.msk.bf16.mxu1 %vm2918_vm0, %v2917_v1 }
  0x62   : > { %2666 = vmatmul.mubr.msk.bf16.gmra.mrb[32].mxu0 %vm547_vm1, %v2876_v24  ;;  %2766 = vmatmul.mubr.msk.bf16.gmra.mrb[32].mxu1 %vm547_vm1, %v2877_v25 }
  0x63   : > { %2669 = vmatprep.mubr.msk.bf16.mxu0 %vm2918_vm0, %v2917_v1  ;;  %2769 = vmatprep.mubr.msk.bf16.mxu1 %vm2918_vm0, %v2917_v1 }
  0x6a   : > { %2670 = vmatmul.mubr.msk.bf16.gmra.mrb[36].mxu0 %vm547_vm1, %v2878_v26  ;;  %2770 = vmatmul.mubr.msk.bf16.gmra.mrb[36].mxu1 %vm547_vm1, %v2879_v27 }
  0x6b   : > { %2673 = vmatprep.mubr.msk.bf16.mxu0 %vm2918_vm0, %v2917_v1  ;;  %2773 = vmatprep.mubr.msk.bf16.mxu1 %vm2918_vm0, %v2917_v1 }
  0x72   : > { %2674 = vmatmul.mubr.msk.bf16.gmra.mrb[40].mxu0 %vm547_vm1, %v2880_v28  ;;  %2774 = vmatmul.mubr.msk.bf16.gmra.mrb[40].mxu1 %vm547_vm1, %v2881_v29 }
  0x73   : > { %2677 = vmatprep.mubr.msk.bf16.mxu0 %vm2918_vm0, %v2917_v1  ;;  %2777 = vmatprep.mubr.msk.bf16.mxu1 %vm2918_vm0, %v2917_v1 }
  0x7a   : > { %2678 = vmatmul.mubr.msk.bf16.gmra.mrb[44].mxu0 %vm547_vm1, %v2882_v30  ;;  %2778 = vmatmul.mubr.msk.bf16.gmra.mrb[44].mxu1 %vm547_vm1, %v2883_v31 }
  0x7b   : > { %2681 = vmatprep.mubr.msk.bf16.mxu0 %vm2918_vm0, %v2917_v1  ;;  %2781 = vmatprep.mubr.msk.bf16.mxu1 %vm2918_vm0, %v2917_v1 }
  0x82   : > { %2682 = vmatmul.mubr.msk.bf16.gmra.mrb[48].mxu0 %vm547_vm1, %v2884_v32  ;;  %2782 = vmatmul.mubr.msk.bf16.gmra.mrb[48].mxu1 %vm547_vm1, %v2885_v33 }
  0x83   : > { %2685 = vmatprep.mubr.msk.bf16.mxu0 %vm2918_vm0, %v2917_v1  ;;  %2785 = vmatprep.mubr.msk.bf16.mxu1 %vm2918_vm0, %v2917_v1 }
  0x8a   : > { %2686 = vmatmul.mubr.msk.bf16.gmra.mrb[52].mxu0 %vm547_vm1, %v2886_v34  ;;  %2786 = vmatmul.mubr.msk.bf16.gmra.mrb[52].mxu1 %vm547_vm1, %v2887_v35 }
  0x8b   : > { %2689 = vmatprep.mubr.msk.bf16.mxu0 %vm2918_vm0, %v2917_v1  ;;  %2789 = vmatprep.mubr.msk.bf16.mxu1 %vm2918_vm0, %v2917_v1 }
  0x92   : > { %2690 = vmatmul.mubr.msk.bf16.gmra.mrb[56].mxu0 %vm547_vm1, %v2888_v36  ;;  %2790 = vmatmul.mubr.msk.bf16.gmra.mrb[56].mxu1 %vm547_vm1, %v2889_v37 }
  0x93   : > { %2693 = vmatprep.mubr.msk.bf16.mxu0 %vm2918_vm0, %v2917_v1  ;;  %2793 = vmatprep.mubr.msk.bf16.mxu1 %vm2918_vm0, %v2917_v1 }
  0x9a   : > { %2694 = vmatmul.mubr.msk.bf16.gmra.mrb[60].mxu0 %vm547_vm1, %v2890_v38  ;;  %2794 = vmatmul.mubr.msk.bf16.gmra.mrb[60].mxu1 %vm547_vm1, %v2891_v39 }
  0x9b   : > { %2697 = vmatprep.mubr.msk.bf16.mxu0 %vm2918_vm0, %v2917_v1  ;;  %2797 = vmatprep.mubr.msk.bf16.mxu1 %vm2918_vm0, %v2917_v1 }
  0xa2   : > { %2698 = vmatmul.mubr.msk.bf16.gmra.mrb[64].mxu0 %vm547_vm1, %v2892_v40  ;;  %2798 = vmatmul.mubr.msk.bf16.gmra.mrb[64].mxu1 %vm547_vm1, %v2893_v41 }
  0xa3   : > { %2701 = vmatprep.mubr.msk.bf16.mxu0 %vm2918_vm0, %v2917_v1  ;;  %2801 = vmatprep.mubr.msk.bf16.mxu1 %vm2918_vm0, %v2917_v1 }
  0xaa   : > { %2702 = vmatmul.mubr.msk.bf16.gmra.mrb[68].mxu0 %vm547_vm1, %v2894_v42  ;;  %2802 = vmatmul.mubr.msk.bf16.gmra.mrb[68].mxu1 %vm547_vm1, %v2895_v43 }
  0xab   : > { %2705 = vmatprep.mubr.msk.bf16.mxu0 %vm2918_vm0, %v2917_v1  ;;  %2805 = vmatprep.mubr.msk.bf16.mxu1 %vm2918_vm0, %v2917_v1 }
  0xb2   : > { %2706 = vmatmul.mubr.msk.bf16.gmra.mrb[72].mxu0 %vm547_vm1, %v2896_v44  ;;  %2806 = vmatmul.mubr.msk.bf16.gmra.mrb[72].mxu1 %vm547_vm1, %v2897_v45 }
  0xb3   : > { %2709 = vmatprep.mubr.msk.bf16.mxu0 %vm2918_vm0, %v2917_v1  ;;  %2809 = vmatprep.mubr.msk.bf16.mxu1 %vm2918_vm0, %v2917_v1 }
  0xba   : > { %2710 = vmatmul.mubr.msk.bf16.gmra.mrb[76].mxu0 %vm547_vm1, %v2898_v46  ;;  %2810 = vmatmul.mubr.msk.bf16.gmra.mrb[76].mxu1 %vm547_vm1, %v2899_v47 }
  0xbb   : > { %2713 = vmatprep.mubr.msk.bf16.mxu0 %vm2918_vm0, %v2917_v1  ;;  %2813 = vmatprep.mubr.msk.bf16.mxu1 %vm2918_vm0, %v2917_v1 }
  0xc2   : > { %2714 = vmatmul.mubr.msk.bf16.gmra.mrb[80].mxu0 %vm547_vm1, %v2900_v48  ;;  %2814 = vmatmul.mubr.msk.bf16.gmra.mrb[80].mxu1 %vm547_vm1, %v2901_v49 }
  0xc3   : > { %2717 = vmatprep.mubr.msk.bf16.mxu0 %vm2918_vm0, %v2917_v1  ;;  %2817 = vmatprep.mubr.msk.bf16.mxu1 %vm2918_vm0, %v2917_v1 }
  0xca   : > { %2718 = vmatmul.mubr.msk.bf16.gmra.mrb[84].mxu0 %vm547_vm1, %v2902_v50  ;;  %2818 = vmatmul.mubr.msk.bf16.gmra.mrb[84].mxu1 %vm547_vm1, %v2903_v51 }
  0xcb   : > { %2721 = vmatprep.mubr.msk.bf16.mxu0 %vm2918_vm0, %v2917_v1  ;;  %2821 = vmatprep.mubr.msk.bf16.mxu1 %vm2918_vm0, %v2917_v1 }
  0xd2   : > { %2722 = vmatmul.mubr.msk.bf16.gmra.mrb[88].mxu0 %vm547_vm1, %v2904_v52  ;;  %2822 = vmatmul.mubr.msk.bf16.gmra.mrb[88].mxu1 %vm547_vm1, %v2905_v53 }
  0xd3   : > { %2725 = vmatprep.mubr.msk.bf16.mxu0 %vm2918_vm0, %v2917_v1  ;;  %2825 = vmatprep.mubr.msk.bf16.mxu1 %vm2918_vm0, %v2917_v1 }
  0xda   : > { %2726 = vmatmul.mubr.msk.bf16.gmra.mrb[92].mxu0 %vm547_vm1, %v2906_v54  ;;  %2826 = vmatmul.mubr.msk.bf16.gmra.mrb[92].mxu1 %vm547_vm1, %v2907_v55 }
  0xdb   : > { %2729 = vmatprep.mubr.msk.bf16.mxu0 %vm2918_vm0, %v2917_v1 }
  0xe2   : > { %2730 = vmatmul.mubr.msk.bf16.gmra.mrb[96].mxu0 %vm547_vm1, %v2908_v56 }
  0xf5   : > { %v729_v57 = vpop.f32.mrb[0].mxu0  ;;  %v929_v58 = vpop.f32.mrb[0].mxu1 }
  0xf6   : > { %v1218_v59 = vmul.f32 0.2, %v729_v57  ;;  %v2635_v60 = vpop.f32.mrb[1].mxu0  ;;  %vm1170_vm2 = vcmp.gt.f32.partialorder %v929_v58, 0.0  ;;  %v2735_v61 = vpop.f32.mrb[1].mxu1  ;;  %vm1120_vm3 = vcmp.gt.f32.partialorder %v729_v57, 0.0 }
  0xf7   : > { %v732_v62 = vpop.f32.mrb[2].mxu0  ;;  %v1268_v63 = vmul.f32 0.2, %v929_v58  ;;  %v932_v0 = vpop.f32.mrb[2].mxu1 }
  0xf8   : > { %vm1121_vm4 = vcmp.gt.f32.partialorder %v732_v62, 0.0  ;;  %v1219_v2 = vmul.f32 0.2, %v732_v62  ;;  %v2636_v3 = vpop.f32.mrb[3].mxu0  ;;  %vm1171_vm5 = vcmp.gt.f32.partialorder %v932_v0, 0.0  ;;  %v2736_v4 = vpop.f32.mrb[3].mxu1  ;;  %v1316_v6 = vsel %vm1120_vm3, %v729_v57, %v1218_v59 }
  0xf9   : > { %v1366_v1 = vsel %vm1170_vm2, %v929_v58, %v1268_v63  ;;  %v1269_v5 = vmul.f32 0.2, %v932_v0 }
  0xfa   : > { %v1317_v7 = vsel %vm1121_vm4, %v732_v62, %v1219_v2 }
  0xfb   : > { %v2273_v8 = vpack.c.bf16 %v1317_v7, %v1316_v6  ;;  %v1367_v9 = vsel %vm1171_vm5, %v932_v0, %v1269_v5 }
  0xfc   : > { %v2398_v10 = vpack.c.bf16 %v1367_v9, %v1366_v1 }
  0xfd   : > { %2274 = vst [vmem:[%s3188_s4] sm:$0xff] %v2273_v8   ;;  %v737_v11 = vpop.f32.mrb[4].mxu0  ;;  %v937_v12 = vpop.f32.mrb[4].mxu1 }
  0xfe   : > { %2539 = vst [vmem:[%s3188_s4 + $0xc8] sm:$0xff] %v2398_v10   ;;  %v1220_v13 = vmul.f32 0.2, %v737_v11  ;;  %v2639_v14 = vpop.f32.mrb[5].mxu0  ;;  %vm1172_vm6 = vcmp.gt.f32.partialorder %v937_v12, 0.0  ;;  %v2739_v15 = vpop.f32.mrb[5].mxu1 }
  0xff   : > { %vm1122_vm7 = vcmp.gt.f32.partialorder %v737_v11, 0.0  ;;  %v740_v16 = vpop.f32.mrb[6].mxu0  ;;  %v1270_v17 = vmul.f32 0.2, %v937_v12  ;;  %v940_v18 = vpop.f32.mrb[6].mxu1 }
 0x100   : > { %vm1123_vm8 = vcmp.gt.f32.partialorder %v740_v16, 0.0  ;;  %v1221_v19 = vmul.f32 0.2, %v740_v16  ;;  %v2640_v20 = vpop.f32.mrb[7].mxu0  ;;  %vm1173_vm9 = vcmp.gt.f32.partialorder %v940_v18, 0.0  ;;  %v2740_v21 = vpop.f32.mrb[7].mxu1  ;;  %v1318_v24 = vsel %vm1122_vm7, %v737_v11, %v1220_v13 }
 0x101   : > { %v1368_v22 = vsel %vm1172_vm6, %v937_v12, %v1270_v17  ;;  %v1271_v23 = vmul.f32 0.2, %v940_v18 }
 0x102   : > { %v1319_v25 = vsel %vm1123_vm8, %v740_v16, %v1221_v19 }
 0x103   : > { %v2278_v26 = vpack.c.bf16 %v1319_v25, %v1318_v24  ;;  %v1369_v27 = vsel %vm1173_vm9, %v940_v18, %v1271_v23 }
 0x104   : > { %v2403_v28 = vpack.c.bf16 %v1369_v27, %v1368_v22 }
 0x105   : > { %2515 = vst [vmem:[%s3188_s4 + $0x8] sm:$0xff] %v2278_v26   ;;  %v745_v29 = vpop.f32.mrb[8].mxu0  ;;  %v945_v30 = vpop.f32.mrb[8].mxu1 }
 0x106   : > { %2540 = vst [vmem:[%s3188_s4 + $0xd0] sm:$0xff] %v2403_v28   ;;  %v1222_v31 = vmul.f32 0.2, %v745_v29  ;;  %v2643_v32 = vpop.f32.mrb[9].mxu0  ;;  %vm1174_vm10 = vcmp.gt.f32.partialorder %v945_v30, 0.0  ;;  %v2743_v33 = vpop.f32.mrb[9].mxu1 }
 0x107   : > { %vm1124_vm11 = vcmp.gt.f32.partialorder %v745_v29, 0.0  ;;  %v748_v34 = vpop.f32.mrb[10].mxu0  ;;  %v1272_v35 = vmul.f32 0.2, %v945_v30  ;;  %v948_v36 = vpop.f32.mrb[10].mxu1 }
 0x108   : > { %vm1125_vm12 = vcmp.gt.f32.partialorder %v748_v34, 0.0  ;;  %v1223_v37 = vmul.f32 0.2, %v748_v34  ;;  %v2644_v38 = vpop.f32.mrb[11].mxu0  ;;  %vm1175_vm13 = vcmp.gt.f32.partialorder %v948_v36, 0.0  ;;  %v2744_v39 = vpop.f32.mrb[11].mxu1  ;;  %v1320_v42 = vsel %vm1124_vm11, %v745_v29, %v1222_v31 }
 0x109   : > { %v1370_v40 = vsel %vm1174_vm10, %v945_v30, %v1272_v35  ;;  %v1273_v41 = vmul.f32 0.2, %v948_v36 }
 0x10a   : > { %v1321_v43 = vsel %vm1125_vm12, %v748_v34, %v1223_v37 }
 0x10b   : > { %v2283_v44 = vpack.c.bf16 %v1321_v43, %v1320_v42  ;;  %v1371_v45 = vsel %vm1175_vm13, %v948_v36, %v1273_v41 }
 0x10c   : > { %v2408_v46 = vpack.c.bf16 %v1371_v45, %v1370_v40 }
 0x10d   : > { %2516 = vst [vmem:[%s3188_s4 + $0x10] sm:$0xff] %v2283_v44   ;;  %v753_v47 = vpop.f32.mrb[12].mxu0  ;;  %v953_v48 = vpop.f32.mrb[12].mxu1 }
 0x10e   : > { %2541 = vst [vmem:[%s3188_s4 + $0xd8] sm:$0xff] %v2408_v46   ;;  %v1224_v49 = vmul.f32 0.2, %v753_v47  ;;  %v2647_v50 = vpop.f32.mrb[13].mxu0  ;;  %vm1176_vm14 = vcmp.gt.f32.partialorder %v953_v48, 0.0  ;;  %v2747_v51 = vpop.f32.mrb[13].mxu1 }
 0x10f   : > { %vm1126_vm15 = vcmp.gt.f32.partialorder %v753_v47, 0.0  ;;  %v756_v52 = vpop.f32.mrb[14].mxu0  ;;  %v1274_v53 = vmul.f32 0.2, %v953_v48  ;;  %v956_v54 = vpop.f32.mrb[14].mxu1 }
 0x110   : > { %vm1127_vm0 = vcmp.gt.f32.partialorder %v756_v52, 0.0  ;;  %v1225_v55 = vmul.f32 0.2, %v756_v52  ;;  %v2648_v56 = vpop.f32.mrb[15].mxu0  ;;  %vm1177_vm1 = vcmp.gt.f32.partialorder %v956_v54, 0.0  ;;  %v2748_v57 = vpop.f32.mrb[15].mxu1  ;;  %v1322_v60 = vsel %vm1126_vm15, %v753_v47, %v1224_v49 }
 0x111   : > { %v1372_v58 = vsel %vm1176_vm14, %v953_v48, %v1274_v53  ;;  %v1275_v59 = vmul.f32 0.2, %v956_v54 }
 0x112   : > { %v1323_v61 = vsel %vm1127_vm0, %v756_v52, %v1225_v55 }
 0x113   : > { %v2288_v62 = vpack.c.bf16 %v1323_v61, %v1322_v60  ;;  %v1373_v63 = vsel %vm1177_vm1, %v956_v54, %v1275_v59 }
 0x114   : > { %v2413_v0 = vpack.c.bf16 %v1373_v63, %v1372_v58 }
 0x115   : > { %2517 = vst [vmem:[%s3188_s4 + $0x18] sm:$0xff] %v2288_v62   ;;  %v761_v2 = vpop.f32.mrb[16].mxu0  ;;  %v961_v3 = vpop.f32.mrb[16].mxu1 }
 0x116   : > { %2542 = vst [vmem:[%s3188_s4 + $0xe0] sm:$0xff] %v2413_v0   ;;  %v1226_v4 = vmul.f32 0.2, %v761_v2  ;;  %v2651_v1 = vpop.f32.mrb[17].mxu0  ;;  %vm1178_vm2 = vcmp.gt.f32.partialorder %v961_v3, 0.0  ;;  %v2751_v5 = vpop.f32.mrb[17].mxu1 }
 0x117   : > { %vm1128_vm3 = vcmp.gt.f32.partialorder %v761_v2, 0.0  ;;  %v764_v6 = vpop.f32.mrb[18].mxu0  ;;  %v1276_v7 = vmul.f32 0.2, %v961_v3  ;;  %v964_v8 = vpop.f32.mrb[18].mxu1 }
 0x118   : > { %vm1129_vm4 = vcmp.gt.f32.partialorder %v764_v6, 0.0  ;;  %v1227_v9 = vmul.f32 0.2, %v764_v6  ;;  %v2652_v10 = vpop.f32.mrb[19].mxu0  ;;  %vm1179_vm5 = vcmp.gt.f32.partialorder %v964_v8, 0.0  ;;  %v2752_v11 = vpop.f32.mrb[19].mxu1  ;;  %v1324_v14 = vsel %vm1128_vm3, %v761_v2, %v1226_v4 }
 0x119   : > { %v1374_v12 = vsel %vm1178_vm2, %v961_v3, %v1276_v7  ;;  %v1277_v13 = vmul.f32 0.2, %v964_v8 }
 0x11a   : > { %v1325_v15 = vsel %vm1129_vm4, %v764_v6, %v1227_v9 }
 0x11b   : > { %v2293_v16 = vpack.c.bf16 %v1325_v15, %v1324_v14  ;;  %v1375_v17 = vsel %vm1179_vm5, %v964_v8, %v1277_v13 }
 0x11c   : > { %v2418_v18 = vpack.c.bf16 %v1375_v17, %v1374_v12 }
 0x11d   : > { %2518 = vst [vmem:[%s3188_s4 + $0x20] sm:$0xff] %v2293_v16   ;;  %v769_v19 = vpop.f32.mrb[20].mxu0  ;;  %v969_v20 = vpop.f32.mrb[20].mxu1 }
 0x11e   : > { %2543 = vst [vmem:[%s3188_s4 + $0xe8] sm:$0xff] %v2418_v18   ;;  %v1228_v21 = vmul.f32 0.2, %v769_v19  ;;  %v2655_v22 = vpop.f32.mrb[21].mxu0  ;;  %vm1180_vm6 = vcmp.gt.f32.partialorder %v969_v20, 0.0  ;;  %v2755_v23 = vpop.f32.mrb[21].mxu1 }
 0x11f   : > { %vm1130_vm7 = vcmp.gt.f32.partialorder %v769_v19, 0.0  ;;  %v772_v24 = vpop.f32.mrb[22].mxu0  ;;  %v1278_v25 = vmul.f32 0.2, %v969_v20  ;;  %v972_v26 = vpop.f32.mrb[22].mxu1 }
 0x120   : > { %vm1131_vm8 = vcmp.gt.f32.partialorder %v772_v24, 0.0  ;;  %v1229_v27 = vmul.f32 0.2, %v772_v24  ;;  %v2656_v28 = vpop.f32.mrb[23].mxu0  ;;  %vm1181_vm9 = vcmp.gt.f32.partialorder %v972_v26, 0.0  ;;  %v2756_v29 = vpop.f32.mrb[23].mxu1  ;;  %v1326_v32 = vsel %vm1130_vm7, %v769_v19, %v1228_v21 }
 0x121   : > { %v1376_v30 = vsel %vm1180_vm6, %v969_v20, %v1278_v25  ;;  %v1279_v31 = vmul.f32 0.2, %v972_v26 }
 0x122   : > { %v1327_v33 = vsel %vm1131_vm8, %v772_v24, %v1229_v27 }
 0x123   : > { %v2298_v34 = vpack.c.bf16 %v1327_v33, %v1326_v32  ;;  %v1377_v35 = vsel %vm1181_vm9, %v972_v26, %v1279_v31 }
 0x124   : > { %v2423_v36 = vpack.c.bf16 %v1377_v35, %v1376_v30 }
 0x125   : > { %2519 = vst [vmem:[%s3188_s4 + $0x28] sm:$0xff] %v2298_v34   ;;  %v777_v37 = vpop.f32.mrb[24].mxu0  ;;  %v977_v38 = vpop.f32.mrb[24].mxu1 }
 0x126   : > { %2544 = vst [vmem:[%s3188_s4 + $0xf0] sm:$0xff] %v2423_v36   ;;  %v1230_v39 = vmul.f32 0.2, %v777_v37  ;;  %v2659_v40 = vpop.f32.mrb[25].mxu0  ;;  %vm1182_vm10 = vcmp.gt.f32.partialorder %v977_v38, 0.0  ;;  %v2759_v41 = vpop.f32.mrb[25].mxu1 }
 0x127   : > { %vm1132_vm11 = vcmp.gt.f32.partialorder %v777_v37, 0.0  ;;  %v780_v42 = vpop.f32.mrb[26].mxu0  ;;  %v1280_v43 = vmul.f32 0.2, %v977_v38  ;;  %v980_v44 = vpop.f32.mrb[26].mxu1 }
 0x128   : > { %vm1133_vm12 = vcmp.gt.f32.partialorder %v780_v42, 0.0  ;;  %v1231_v45 = vmul.f32 0.2, %v780_v42  ;;  %v2660_v46 = vpop.f32.mrb[27].mxu0  ;;  %vm1183_vm13 = vcmp.gt.f32.partialorder %v980_v44, 0.0  ;;  %v2760_v47 = vpop.f32.mrb[27].mxu1  ;;  %v1328_v50 = vsel %vm1132_vm11, %v777_v37, %v1230_v39 }
 0x129   : > { %v1378_v48 = vsel %vm1182_vm10, %v977_v38, %v1280_v43  ;;  %v1281_v49 = vmul.f32 0.2, %v980_v44 }
 0x12a   : > { %v1329_v51 = vsel %vm1133_vm12, %v780_v42, %v1231_v45 }
 0x12b   : > { %v2303_v52 = vpack.c.bf16 %v1329_v51, %v1328_v50  ;;  %v1379_v53 = vsel %vm1183_vm13, %v980_v44, %v1281_v49 }
 0x12c   : > { %v2428_v54 = vpack.c.bf16 %v1379_v53, %v1378_v48 }
 0x12d   : > { %2520 = vst [vmem:[%s3188_s4 + $0x30] sm:$0xff] %v2303_v52   ;;  %v785_v55 = vpop.f32.mrb[28].mxu0  ;;  %v985_v56 = vpop.f32.mrb[28].mxu1 }
 0x12e   : > { %2545 = vst [vmem:[%s3188_s4 + $0xf8] sm:$0xff] %v2428_v54   ;;  %v1232_v57 = vmul.f32 0.2, %v785_v55  ;;  %v2663_v58 = vpop.f32.mrb[29].mxu0  ;;  %vm1184_vm14 = vcmp.gt.f32.partialorder %v985_v56, 0.0  ;;  %v2763_v59 = vpop.f32.mrb[29].mxu1 }
 0x12f   : > { %vm1134_vm15 = vcmp.gt.f32.partialorder %v785_v55, 0.0  ;;  %v788_v60 = vpop.f32.mrb[30].mxu0  ;;  %v1282_v61 = vmul.f32 0.2, %v985_v56  ;;  %v988_v62 = vpop.f32.mrb[30].mxu1 }
 0x130   : > { %vm1135_vm0 = vcmp.gt.f32.partialorder %v788_v60, 0.0  ;;  %v1233_v63 = vmul.f32 0.2, %v788_v60  ;;  %v2664_v0 = vpop.f32.mrb[31].mxu0  ;;  %vm1185_vm1 = vcmp.gt.f32.partialorder %v988_v62, 0.0  ;;  %v2764_v2 = vpop.f32.mrb[31].mxu1  ;;  %v1330_v1 = vsel %vm1134_vm15, %v785_v55, %v1232_v57 }
 0x131   : > { %v1380_v3 = vsel %vm1184_vm14, %v985_v56, %v1282_v61  ;;  %v1283_v4 = vmul.f32 0.2, %v988_v62 }
 0x132   : > { %v1331_v5 = vsel %vm1135_vm0, %v788_v60, %v1233_v63 }
 0x133   : > { %v2308_v6 = vpack.c.bf16 %v1331_v5, %v1330_v1  ;;  %v1381_v7 = vsel %vm1185_vm1, %v988_v62, %v1283_v4 }
 0x134   : > { %v2433_v8 = vpack.c.bf16 %v1381_v7, %v1380_v3 }
 0x135   : > { %2521 = vst [vmem:[%s3188_s4 + $0x38] sm:$0xff] %v2308_v6   ;;  %v793_v9 = vpop.f32.mrb[32].mxu0  ;;  %v993_v10 = vpop.f32.mrb[32].mxu1 }
 0x136   : > { %2546 = vst [vmem:[%s3188_s4 + $0x100] sm:$0xff] %v2433_v8   ;;  %v1234_v11 = vmul.f32 0.2, %v793_v9  ;;  %v2667_v12 = vpop.f32.mrb[33].mxu0  ;;  %vm1186_vm2 = vcmp.gt.f32.partialorder %v993_v10, 0.0  ;;  %v2767_v13 = vpop.f32.mrb[33].mxu1 }
 0x137   : > { %vm1136_vm3 = vcmp.gt.f32.partialorder %v793_v9, 0.0  ;;  %v796_v14 = vpop.f32.mrb[34].mxu0  ;;  %v1284_v15 = vmul.f32 0.2, %v993_v10  ;;  %v996_v16 = vpop.f32.mrb[34].mxu1 }
 0x138   : > { %vm1137_vm4 = vcmp.gt.f32.partialorder %v796_v14, 0.0  ;;  %v1235_v17 = vmul.f32 0.2, %v796_v14  ;;  %v2668_v18 = vpop.f32.mrb[35].mxu0  ;;  %vm1187_vm5 = vcmp.gt.f32.partialorder %v996_v16, 0.0  ;;  %v2768_v19 = vpop.f32.mrb[35].mxu1  ;;  %v1332_v22 = vsel %vm1136_vm3, %v793_v9, %v1234_v11 }
 0x139   : > { %v1382_v20 = vsel %vm1186_vm2, %v993_v10, %v1284_v15  ;;  %v1285_v21 = vmul.f32 0.2, %v996_v16 }
 0x13a   : > { %v1333_v23 = vsel %vm1137_vm4, %v796_v14, %v1235_v17 }
 0x13b   : > { %v2313_v24 = vpack.c.bf16 %v1333_v23, %v1332_v22  ;;  %v1383_v25 = vsel %vm1187_vm5, %v996_v16, %v1285_v21 }
 0x13c   : > { %v2438_v26 = vpack.c.bf16 %v1383_v25, %v1382_v20 }
 0x13d   : > { %2522 = vst [vmem:[%s3188_s4 + $0x40] sm:$0xff] %v2313_v24   ;;  %v801_v27 = vpop.f32.mrb[36].mxu0  ;;  %v1001_v28 = vpop.f32.mrb[36].mxu1 }
 0x13e   : > { %2547 = vst [vmem:[%s3188_s4 + $0x108] sm:$0xff] %v2438_v26   ;;  %v1236_v29 = vmul.f32 0.2, %v801_v27  ;;  %v2671_v30 = vpop.f32.mrb[37].mxu0  ;;  %vm1188_vm6 = vcmp.gt.f32.partialorder %v1001_v28, 0.0  ;;  %v2771_v31 = vpop.f32.mrb[37].mxu1 }
 0x13f   : > { %vm1138_vm7 = vcmp.gt.f32.partialorder %v801_v27, 0.0  ;;  %v804_v32 = vpop.f32.mrb[38].mxu0  ;;  %v1286_v33 = vmul.f32 0.2, %v1001_v28  ;;  %v1004_v34 = vpop.f32.mrb[38].mxu1 }
 0x140   : > { %vm1139_vm8 = vcmp.gt.f32.partialorder %v804_v32, 0.0  ;;  %v1237_v35 = vmul.f32 0.2, %v804_v32  ;;  %v2672_v36 = vpop.f32.mrb[39].mxu0  ;;  %vm1189_vm9 = vcmp.gt.f32.partialorder %v1004_v34, 0.0  ;;  %v2772_v37 = vpop.f32.mrb[39].mxu1  ;;  %v1334_v40 = vsel %vm1138_vm7, %v801_v27, %v1236_v29 }
 0x141   : > { %v1384_v38 = vsel %vm1188_vm6, %v1001_v28, %v1286_v33  ;;  %v1287_v39 = vmul.f32 0.2, %v1004_v34 }
 0x142   : > { %v1335_v41 = vsel %vm1139_vm8, %v804_v32, %v1237_v35 }
 0x143   : > { %v2318_v42 = vpack.c.bf16 %v1335_v41, %v1334_v40  ;;  %v1385_v43 = vsel %vm1189_vm9, %v1004_v34, %v1287_v39 }
 0x144   : > { %v2443_v44 = vpack.c.bf16 %v1385_v43, %v1384_v38 }
 0x145   : > { %2523 = vst [vmem:[%s3188_s4 + $0x48] sm:$0xff] %v2318_v42   ;;  %v809_v45 = vpop.f32.mrb[40].mxu0  ;;  %v1009_v46 = vpop.f32.mrb[40].mxu1 }
 0x146   : > { %2548 = vst [vmem:[%s3188_s4 + $0x110] sm:$0xff] %v2443_v44   ;;  %v1238_v47 = vmul.f32 0.2, %v809_v45  ;;  %v2675_v48 = vpop.f32.mrb[41].mxu0  ;;  %vm1190_vm10 = vcmp.gt.f32.partialorder %v1009_v46, 0.0  ;;  %v2775_v49 = vpop.f32.mrb[41].mxu1 }
 0x147   : > { %vm1140_vm11 = vcmp.gt.f32.partialorder %v809_v45, 0.0  ;;  %v812_v50 = vpop.f32.mrb[42].mxu0  ;;  %v1288_v51 = vmul.f32 0.2, %v1009_v46  ;;  %v1012_v52 = vpop.f32.mrb[42].mxu1 }
 0x148   : > { %vm1141_vm12 = vcmp.gt.f32.partialorder %v812_v50, 0.0  ;;  %v1239_v53 = vmul.f32 0.2, %v812_v50  ;;  %v2676_v54 = vpop.f32.mrb[43].mxu0  ;;  %vm1191_vm13 = vcmp.gt.f32.partialorder %v1012_v52, 0.0  ;;  %v2776_v55 = vpop.f32.mrb[43].mxu1  ;;  %v1336_v58 = vsel %vm1140_vm11, %v809_v45, %v1238_v47 }
 0x149   : > { %v1386_v56 = vsel %vm1190_vm10, %v1009_v46, %v1288_v51  ;;  %v1289_v57 = vmul.f32 0.2, %v1012_v52 }
 0x14a   : > { %v1337_v59 = vsel %vm1141_vm12, %v812_v50, %v1239_v53 }
 0x14b   : > { %v2323_v60 = vpack.c.bf16 %v1337_v59, %v1336_v58  ;;  %v1387_v61 = vsel %vm1191_vm13, %v1012_v52, %v1289_v57 }
 0x14c   : > { %v2448_v62 = vpack.c.bf16 %v1387_v61, %v1386_v56 }
 0x14d   : > { %2524 = vst [vmem:[%s3188_s4 + $0x50] sm:$0xff] %v2323_v60   ;;  %v817_v63 = vpop.f32.mrb[44].mxu0  ;;  %v1017_v0 = vpop.f32.mrb[44].mxu1 }
 0x14e   : > { %2549 = vst [vmem:[%s3188_s4 + $0x118] sm:$0xff] %v2448_v62   ;;  %v1240_v2 = vmul.f32 0.2, %v817_v63  ;;  %v2679_v3 = vpop.f32.mrb[45].mxu0  ;;  %vm1192_vm14 = vcmp.gt.f32.partialorder %v1017_v0, 0.0  ;;  %v2779_v4 = vpop.f32.mrb[45].mxu1 }
 0x14f   : > { %vm1142_vm15 = vcmp.gt.f32.partialorder %v817_v63, 0.0  ;;  %v820_v1 = vpop.f32.mrb[46].mxu0  ;;  %v1290_v5 = vmul.f32 0.2, %v1017_v0  ;;  %v1020_v6 = vpop.f32.mrb[46].mxu1 }
 0x150   : > { %vm1143_vm0 = vcmp.gt.f32.partialorder %v820_v1, 0.0  ;;  %v1241_v7 = vmul.f32 0.2, %v820_v1  ;;  %v2680_v8 = vpop.f32.mrb[47].mxu0  ;;  %vm1193_vm1 = vcmp.gt.f32.partialorder %v1020_v6, 0.0  ;;  %v2780_v9 = vpop.f32.mrb[47].mxu1  ;;  %v1338_v12 = vsel %vm1142_vm15, %v817_v63, %v1240_v2 }
 0x151   : > { %v1388_v10 = vsel %vm1192_vm14, %v1017_v0, %v1290_v5  ;;  %v1291_v11 = vmul.f32 0.2, %v1020_v6 }
 0x152   : > { %v1339_v13 = vsel %vm1143_vm0, %v820_v1, %v1241_v7 }
 0x153   : > { %v2328_v14 = vpack.c.bf16 %v1339_v13, %v1338_v12  ;;  %v1389_v15 = vsel %vm1193_vm1, %v1020_v6, %v1291_v11 }
 0x154   : > { %v2453_v16 = vpack.c.bf16 %v1389_v15, %v1388_v10 }
 0x155   : > { %2525 = vst [vmem:[%s3188_s4 + $0x58] sm:$0xff] %v2328_v14   ;;  %v825_v17 = vpop.f32.mrb[48].mxu0  ;;  %v1025_v18 = vpop.f32.mrb[48].mxu1 }
 0x156   : > { %2550 = vst [vmem:[%s3188_s4 + $0x120] sm:$0xff] %v2453_v16   ;;  %v1242_v19 = vmul.f32 0.2, %v825_v17  ;;  %v2683_v20 = vpop.f32.mrb[49].mxu0  ;;  %vm1194_vm2 = vcmp.gt.f32.partialorder %v1025_v18, 0.0  ;;  %v2783_v21 = vpop.f32.mrb[49].mxu1 }
 0x157   : > { %vm1144_vm3 = vcmp.gt.f32.partialorder %v825_v17, 0.0  ;;  %v828_v22 = vpop.f32.mrb[50].mxu0  ;;  %v1292_v23 = vmul.f32 0.2, %v1025_v18  ;;  %v1028_v24 = vpop.f32.mrb[50].mxu1 }
 0x158   : > { %vm1145_vm4 = vcmp.gt.f32.partialorder %v828_v22, 0.0  ;;  %v1243_v25 = vmul.f32 0.2, %v828_v22  ;;  %v2684_v26 = vpop.f32.mrb[51].mxu0  ;;  %vm1195_vm5 = vcmp.gt.f32.partialorder %v1028_v24, 0.0  ;;  %v2784_v27 = vpop.f32.mrb[51].mxu1  ;;  %v1340_v30 = vsel %vm1144_vm3, %v825_v17, %v1242_v19 }
 0x159   : > { %v1390_v28 = vsel %vm1194_vm2, %v1025_v18, %v1292_v23  ;;  %v1293_v29 = vmul.f32 0.2, %v1028_v24 }
 0x15a   : > { %v1341_v31 = vsel %vm1145_vm4, %v828_v22, %v1243_v25 }
 0x15b   : > { %v2333_v32 = vpack.c.bf16 %v1341_v31, %v1340_v30  ;;  %v1391_v33 = vsel %vm1195_vm5, %v1028_v24, %v1293_v29 }
 0x15c   : > { %v2458_v34 = vpack.c.bf16 %v1391_v33, %v1390_v28 }
 0x15d   : > { %2526 = vst [vmem:[%s3188_s4 + $0x60] sm:$0xff] %v2333_v32   ;;  %v833_v35 = vpop.f32.mrb[52].mxu0  ;;  %v1033_v36 = vpop.f32.mrb[52].mxu1 }
 0x15e   : > { %2551 = vst [vmem:[%s3188_s4 + $0x128] sm:$0xff] %v2458_v34   ;;  %v1244_v37 = vmul.f32 0.2, %v833_v35  ;;  %v2687_v38 = vpop.f32.mrb[53].mxu0  ;;  %vm1196_vm6 = vcmp.gt.f32.partialorder %v1033_v36, 0.0  ;;  %v2787_v39 = vpop.f32.mrb[53].mxu1 }
 0x15f   : > { %vm1146_vm7 = vcmp.gt.f32.partialorder %v833_v35, 0.0  ;;  %v836_v40 = vpop.f32.mrb[54].mxu0  ;;  %v1294_v41 = vmul.f32 0.2, %v1033_v36  ;;  %v1036_v42 = vpop.f32.mrb[54].mxu1 }
 0x160   : > { %vm1147_vm8 = vcmp.gt.f32.partialorder %v836_v40, 0.0  ;;  %v1245_v43 = vmul.f32 0.2, %v836_v40  ;;  %v2688_v44 = vpop.f32.mrb[55].mxu0  ;;  %vm1197_vm9 = vcmp.gt.f32.partialorder %v1036_v42, 0.0  ;;  %v2788_v45 = vpop.f32.mrb[55].mxu1  ;;  %v1342_v48 = vsel %vm1146_vm7, %v833_v35, %v1244_v37 }
 0x161   : > { %v1392_v46 = vsel %vm1196_vm6, %v1033_v36, %v1294_v41  ;;  %v1295_v47 = vmul.f32 0.2, %v1036_v42 }
 0x162   : > { %v1343_v49 = vsel %vm1147_vm8, %v836_v40, %v1245_v43 }
 0x163   : > { %v2338_v50 = vpack.c.bf16 %v1343_v49, %v1342_v48  ;;  %v1393_v51 = vsel %vm1197_vm9, %v1036_v42, %v1295_v47 }
 0x164   : > { %v2463_v52 = vpack.c.bf16 %v1393_v51, %v1392_v46 }
 0x165   : > { %2527 = vst [vmem:[%s3188_s4 + $0x68] sm:$0xff] %v2338_v50   ;;  %v841_v53 = vpop.f32.mrb[56].mxu0  ;;  %v1041_v54 = vpop.f32.mrb[56].mxu1 }
 0x166   : > { %2552 = vst [vmem:[%s3188_s4 + $0x130] sm:$0xff] %v2463_v52   ;;  %v1246_v55 = vmul.f32 0.2, %v841_v53  ;;  %v2691_v56 = vpop.f32.mrb[57].mxu0  ;;  %vm1198_vm10 = vcmp.gt.f32.partialorder %v1041_v54, 0.0  ;;  %v2791_v57 = vpop.f32.mrb[57].mxu1 }
 0x167   : > { %vm1148_vm11 = vcmp.gt.f32.partialorder %v841_v53, 0.0  ;;  %v844_v58 = vpop.f32.mrb[58].mxu0  ;;  %v1296_v59 = vmul.f32 0.2, %v1041_v54  ;;  %v1044_v60 = vpop.f32.mrb[58].mxu1 }
 0x168   : > { %vm1149_vm12 = vcmp.gt.f32.partialorder %v844_v58, 0.0  ;;  %v1247_v61 = vmul.f32 0.2, %v844_v58  ;;  %v2692_v62 = vpop.f32.mrb[59].mxu0  ;;  %vm1199_vm13 = vcmp.gt.f32.partialorder %v1044_v60, 0.0  ;;  %v2792_v63 = vpop.f32.mrb[59].mxu1  ;;  %v1344_v3 = vsel %vm1148_vm11, %v841_v53, %v1246_v55 }
 0x169   : > { %v1394_v0 = vsel %vm1198_vm10, %v1041_v54, %v1296_v59  ;;  %v1297_v2 = vmul.f32 0.2, %v1044_v60 }
 0x16a   : > { %v1345_v4 = vsel %vm1149_vm12, %v844_v58, %v1247_v61 }
 0x16b   : > { %v2343_v1 = vpack.c.bf16 %v1345_v4, %v1344_v3  ;;  %v1395_v5 = vsel %vm1199_vm13, %v1044_v60, %v1297_v2 }
 0x16c   : > { %v2468_v6 = vpack.c.bf16 %v1395_v5, %v1394_v0 }
 0x16d   : > { %2528 = vst [vmem:[%s3188_s4 + $0x70] sm:$0xff] %v2343_v1   ;;  %v849_v7 = vpop.f32.mrb[60].mxu0  ;;  %v1049_v8 = vpop.f32.mrb[60].mxu1 }
 0x16e   : > { %2553 = vst [vmem:[%s3188_s4 + $0x138] sm:$0xff] %v2468_v6   ;;  %v1248_v9 = vmul.f32 0.2, %v849_v7  ;;  %v2695_v10 = vpop.f32.mrb[61].mxu0  ;;  %vm1200_vm14 = vcmp.gt.f32.partialorder %v1049_v8, 0.0  ;;  %v2795_v11 = vpop.f32.mrb[61].mxu1 }
 0x16f   : > { %vm1150_vm15 = vcmp.gt.f32.partialorder %v849_v7, 0.0  ;;  %v852_v12 = vpop.f32.mrb[62].mxu0  ;;  %v1298_v13 = vmul.f32 0.2, %v1049_v8  ;;  %v1052_v14 = vpop.f32.mrb[62].mxu1 }
 0x170   : > { %vm1151_vm0 = vcmp.gt.f32.partialorder %v852_v12, 0.0  ;;  %v1249_v15 = vmul.f32 0.2, %v852_v12  ;;  %v2696_v16 = vpop.f32.mrb[63].mxu0  ;;  %vm1201_vm1 = vcmp.gt.f32.partialorder %v1052_v14, 0.0  ;;  %v2796_v17 = vpop.f32.mrb[63].mxu1  ;;  %v1346_v20 = vsel %vm1150_vm15, %v849_v7, %v1248_v9 }
 0x171   : > { %v1396_v18 = vsel %vm1200_vm14, %v1049_v8, %v1298_v13  ;;  %v1299_v19 = vmul.f32 0.2, %v1052_v14 }
 0x172   : > { %v1347_v21 = vsel %vm1151_vm0, %v852_v12, %v1249_v15 }
 0x173   : > { %v2348_v22 = vpack.c.bf16 %v1347_v21, %v1346_v20  ;;  %v1397_v23 = vsel %vm1201_vm1, %v1052_v14, %v1299_v19 }
 0x174   : > { %v2473_v24 = vpack.c.bf16 %v1397_v23, %v1396_v18 }
 0x175   : > { %2529 = vst [vmem:[%s3188_s4 + $0x78] sm:$0xff] %v2348_v22   ;;  %v857_v25 = vpop.f32.mrb[64].mxu0  ;;  %v1057_v26 = vpop.f32.mrb[64].mxu1 }
 0x176   : > { %2554 = vst [vmem:[%s3188_s4 + $0x140] sm:$0xff] %v2473_v24   ;;  %v1250_v27 = vmul.f32 0.2, %v857_v25  ;;  %v2699_v28 = vpop.f32.mrb[65].mxu0  ;;  %vm1202_vm2 = vcmp.gt.f32.partialorder %v1057_v26, 0.0  ;;  %v2799_v29 = vpop.f32.mrb[65].mxu1 }
 0x177   : > { %vm1152_vm3 = vcmp.gt.f32.partialorder %v857_v25, 0.0  ;;  %v860_v30 = vpop.f32.mrb[66].mxu0  ;;  %v1300_v31 = vmul.f32 0.2, %v1057_v26  ;;  %v1060_v32 = vpop.f32.mrb[66].mxu1 }
 0x178   : > { %vm1153_vm4 = vcmp.gt.f32.partialorder %v860_v30, 0.0  ;;  %v1251_v33 = vmul.f32 0.2, %v860_v30  ;;  %v2700_v34 = vpop.f32.mrb[67].mxu0  ;;  %vm1203_vm5 = vcmp.gt.f32.partialorder %v1060_v32, 0.0  ;;  %v2800_v35 = vpop.f32.mrb[67].mxu1  ;;  %v1348_v38 = vsel %vm1152_vm3, %v857_v25, %v1250_v27 }
 0x179   : > { %v1398_v36 = vsel %vm1202_vm2, %v1057_v26, %v1300_v31  ;;  %v1301_v37 = vmul.f32 0.2, %v1060_v32 }
 0x17a   : > { %v1349_v39 = vsel %vm1153_vm4, %v860_v30, %v1251_v33 }
 0x17b   : > { %v2353_v40 = vpack.c.bf16 %v1349_v39, %v1348_v38  ;;  %v1399_v41 = vsel %vm1203_vm5, %v1060_v32, %v1301_v37 }
 0x17c   : > { %v2478_v42 = vpack.c.bf16 %v1399_v41, %v1398_v36 }
 0x17d   : > { %2530 = vst [vmem:[%s3188_s4 + $0x80] sm:$0xff] %v2353_v40   ;;  %v865_v43 = vpop.f32.mrb[68].mxu0  ;;  %v1065_v44 = vpop.f32.mrb[68].mxu1 }
 0x17e   : > { %2555 = vst [vmem:[%s3188_s4 + $0x148] sm:$0xff] %v2478_v42   ;;  %v1252_v45 = vmul.f32 0.2, %v865_v43  ;;  %v2703_v46 = vpop.f32.mrb[69].mxu0  ;;  %vm1204_vm6 = vcmp.gt.f32.partialorder %v1065_v44, 0.0  ;;  %v2803_v47 = vpop.f32.mrb[69].mxu1 }
 0x17f   : > { %vm1154_vm7 = vcmp.gt.f32.partialorder %v865_v43, 0.0  ;;  %v868_v48 = vpop.f32.mrb[70].mxu0  ;;  %v1302_v49 = vmul.f32 0.2, %v1065_v44  ;;  %v1068_v50 = vpop.f32.mrb[70].mxu1 }
 0x180   : > { %vm1155_vm8 = vcmp.gt.f32.partialorder %v868_v48, 0.0  ;;  %v1253_v51 = vmul.f32 0.2, %v868_v48  ;;  %v2704_v52 = vpop.f32.mrb[71].mxu0  ;;  %vm1205_vm9 = vcmp.gt.f32.partialorder %v1068_v50, 0.0  ;;  %v2804_v53 = vpop.f32.mrb[71].mxu1  ;;  %v1350_v56 = vsel %vm1154_vm7, %v865_v43, %v1252_v45 }
 0x181   : > { %v1400_v54 = vsel %vm1204_vm6, %v1065_v44, %v1302_v49  ;;  %v1303_v55 = vmul.f32 0.2, %v1068_v50 }
 0x182   : > { %v1351_v57 = vsel %vm1155_vm8, %v868_v48, %v1253_v51 }
 0x183   : > { %v2358_v58 = vpack.c.bf16 %v1351_v57, %v1350_v56  ;;  %v1401_v59 = vsel %vm1205_vm9, %v1068_v50, %v1303_v55 }
 0x184   : > { %v2483_v60 = vpack.c.bf16 %v1401_v59, %v1400_v54 }
 0x185   : > { %2531 = vst [vmem:[%s3188_s4 + $0x88] sm:$0xff] %v2358_v58   ;;  %v873_v61 = vpop.f32.mrb[72].mxu0  ;;  %v1073_v62 = vpop.f32.mrb[72].mxu1 }
 0x186   : > { %2556 = vst [vmem:[%s3188_s4 + $0x150] sm:$0xff] %v2483_v60   ;;  %v1254_v63 = vmul.f32 0.2, %v873_v61  ;;  %v2707_v0 = vpop.f32.mrb[73].mxu0  ;;  %vm1206_vm10 = vcmp.gt.f32.partialorder %v1073_v62, 0.0  ;;  %v2807_v2 = vpop.f32.mrb[73].mxu1 }
 0x187   : > { %vm1156_vm11 = vcmp.gt.f32.partialorder %v873_v61, 0.0  ;;  %v876_v3 = vpop.f32.mrb[74].mxu0  ;;  %v1304_v4 = vmul.f32 0.2, %v1073_v62  ;;  %v1076_v1 = vpop.f32.mrb[74].mxu1 }
 0x188   : > { %vm1157_vm12 = vcmp.gt.f32.partialorder %v876_v3, 0.0  ;;  %v1255_v5 = vmul.f32 0.2, %v876_v3  ;;  %v2708_v6 = vpop.f32.mrb[75].mxu0  ;;  %vm1207_vm13 = vcmp.gt.f32.partialorder %v1076_v1, 0.0  ;;  %v2808_v7 = vpop.f32.mrb[75].mxu1  ;;  %v1352_v10 = vsel %vm1156_vm11, %v873_v61, %v1254_v63 }
 0x189   : > { %v1402_v8 = vsel %vm1206_vm10, %v1073_v62, %v1304_v4  ;;  %v1305_v9 = vmul.f32 0.2, %v1076_v1 }
 0x18a   : > { %v1353_v11 = vsel %vm1157_vm12, %v876_v3, %v1255_v5 }
 0x18b   : > { %v2363_v12 = vpack.c.bf16 %v1353_v11, %v1352_v10  ;;  %v1403_v13 = vsel %vm1207_vm13, %v1076_v1, %v1305_v9 }
 0x18c   : > { %v2488_v14 = vpack.c.bf16 %v1403_v13, %v1402_v8 }
 0x18d   : > { %2532 = vst [vmem:[%s3188_s4 + $0x90] sm:$0xff] %v2363_v12   ;;  %v881_v15 = vpop.f32.mrb[76].mxu0  ;;  %v1081_v16 = vpop.f32.mrb[76].mxu1 }
 0x18e   : > { %2557 = vst [vmem:[%s3188_s4 + $0x158] sm:$0xff] %v2488_v14   ;;  %v1256_v17 = vmul.f32 0.2, %v881_v15  ;;  %v2711_v18 = vpop.f32.mrb[77].mxu0  ;;  %vm1208_vm14 = vcmp.gt.f32.partialorder %v1081_v16, 0.0  ;;  %v2811_v19 = vpop.f32.mrb[77].mxu1 }
 0x18f   : > { %vm1158_vm15 = vcmp.gt.f32.partialorder %v881_v15, 0.0  ;;  %v884_v20 = vpop.f32.mrb[78].mxu0  ;;  %v1306_v21 = vmul.f32 0.2, %v1081_v16  ;;  %v1084_v22 = vpop.f32.mrb[78].mxu1 }
 0x190   : > { %vm1159_vm0 = vcmp.gt.f32.partialorder %v884_v20, 0.0  ;;  %v1257_v23 = vmul.f32 0.2, %v884_v20  ;;  %v2712_v24 = vpop.f32.mrb[79].mxu0  ;;  %vm1209_vm1 = vcmp.gt.f32.partialorder %v1084_v22, 0.0  ;;  %v2812_v25 = vpop.f32.mrb[79].mxu1  ;;  %v1354_v28 = vsel %vm1158_vm15, %v881_v15, %v1256_v17 }
 0x191   : > { %v1404_v26 = vsel %vm1208_vm14, %v1081_v16, %v1306_v21  ;;  %v1307_v27 = vmul.f32 0.2, %v1084_v22 }
 0x192   : > { %v1355_v29 = vsel %vm1159_vm0, %v884_v20, %v1257_v23 }
 0x193   : > { %v2368_v30 = vpack.c.bf16 %v1355_v29, %v1354_v28  ;;  %v1405_v31 = vsel %vm1209_vm1, %v1084_v22, %v1307_v27 }
 0x194   : > { %v2493_v32 = vpack.c.bf16 %v1405_v31, %v1404_v26 }
 0x195   : > { %2533 = vst [vmem:[%s3188_s4 + $0x98] sm:$0xff] %v2368_v30   ;;  %v889_v33 = vpop.f32.mrb[80].mxu0  ;;  %v1089_v34 = vpop.f32.mrb[80].mxu1 }
 0x196   : > { %2558 = vst [vmem:[%s3188_s4 + $0x160] sm:$0xff] %v2493_v32   ;;  %v1258_v35 = vmul.f32 0.2, %v889_v33  ;;  %v2715_v36 = vpop.f32.mrb[81].mxu0  ;;  %vm1210_vm2 = vcmp.gt.f32.partialorder %v1089_v34, 0.0  ;;  %v2815_v37 = vpop.f32.mrb[81].mxu1 }
 0x197   : > { %vm1160_vm3 = vcmp.gt.f32.partialorder %v889_v33, 0.0  ;;  %v892_v38 = vpop.f32.mrb[82].mxu0  ;;  %v1308_v39 = vmul.f32 0.2, %v1089_v34  ;;  %v1092_v40 = vpop.f32.mrb[82].mxu1 }
 0x198   : > { %vm1161_vm4 = vcmp.gt.f32.partialorder %v892_v38, 0.0  ;;  %v1259_v41 = vmul.f32 0.2, %v892_v38  ;;  %v2716_v42 = vpop.f32.mrb[83].mxu0  ;;  %vm1211_vm5 = vcmp.gt.f32.partialorder %v1092_v40, 0.0  ;;  %v2816_v43 = vpop.f32.mrb[83].mxu1  ;;  %v1356_v46 = vsel %vm1160_vm3, %v889_v33, %v1258_v35 }
 0x199   : > { %v1406_v44 = vsel %vm1210_vm2, %v1089_v34, %v1308_v39  ;;  %v1309_v45 = vmul.f32 0.2, %v1092_v40 }
 0x19a   : > { %v1357_v47 = vsel %vm1161_vm4, %v892_v38, %v1259_v41 }
 0x19b   : > { %v2373_v48 = vpack.c.bf16 %v1357_v47, %v1356_v46  ;;  %v1407_v49 = vsel %vm1211_vm5, %v1092_v40, %v1309_v45 }
 0x19c   : > { %v2498_v50 = vpack.c.bf16 %v1407_v49, %v1406_v44 }
 0x19d   : > { %2534 = vst [vmem:[%s3188_s4 + $0xa0] sm:$0xff] %v2373_v48   ;;  %v897_v51 = vpop.f32.mrb[84].mxu0  ;;  %v1097_v52 = vpop.f32.mrb[84].mxu1 }
 0x19e   : > { %2559 = vst [vmem:[%s3188_s4 + $0x168] sm:$0xff] %v2498_v50   ;;  %v1260_v53 = vmul.f32 0.2, %v897_v51  ;;  %v2719_v54 = vpop.f32.mrb[85].mxu0  ;;  %vm1212_vm6 = vcmp.gt.f32.partialorder %v1097_v52, 0.0  ;;  %v2819_v55 = vpop.f32.mrb[85].mxu1 }
 0x19f   : > { %vm1162_vm7 = vcmp.gt.f32.partialorder %v897_v51, 0.0  ;;  %v900_v56 = vpop.f32.mrb[86].mxu0  ;;  %v1310_v57 = vmul.f32 0.2, %v1097_v52  ;;  %v1100_v58 = vpop.f32.mrb[86].mxu1 }
 0x1a0   : > { %vm1163_vm8 = vcmp.gt.f32.partialorder %v900_v56, 0.0  ;;  %v1261_v59 = vmul.f32 0.2, %v900_v56  ;;  %v2720_v60 = vpop.f32.mrb[87].mxu0  ;;  %vm1213_vm9 = vcmp.gt.f32.partialorder %v1100_v58, 0.0  ;;  %v2820_v61 = vpop.f32.mrb[87].mxu1  ;;  %v1358_v0 = vsel %vm1162_vm7, %v897_v51, %v1260_v53 }
 0x1a1   : > { %v1408_v62 = vsel %vm1212_vm6, %v1097_v52, %v1310_v57  ;;  %v1311_v63 = vmul.f32 0.2, %v1100_v58 }
 0x1a2   : > { %v1359_v2 = vsel %vm1163_vm8, %v900_v56, %v1261_v59 }
 0x1a3   : > { %v2378_v3 = vpack.c.bf16 %v1359_v2, %v1358_v0  ;;  %v1409_v4 = vsel %vm1213_vm9, %v1100_v58, %v1311_v63 }
 0x1a4   : > { %v2503_v1 = vpack.c.bf16 %v1409_v4, %v1408_v62 }
 0x1a5   : > { %2535 = vst [vmem:[%s3188_s4 + $0xa8] sm:$0xff] %v2378_v3   ;;  %v905_v5 = vpop.f32.mrb[88].mxu0  ;;  %v1105_v6 = vpop.f32.mrb[88].mxu1 }
 0x1a6   : > { %2560 = vst [vmem:[%s3188_s4 + $0x170] sm:$0xff] %v2503_v1   ;;  %v1262_v7 = vmul.f32 0.2, %v905_v5  ;;  %v2723_v8 = vpop.f32.mrb[89].mxu0  ;;  %vm1214_vm10 = vcmp.gt.f32.partialorder %v1105_v6, 0.0  ;;  %v2823_v9 = vpop.f32.mrb[89].mxu1 }
 0x1a7   : > { %vm1164_vm11 = vcmp.gt.f32.partialorder %v905_v5, 0.0  ;;  %v908_v10 = vpop.f32.mrb[90].mxu0  ;;  %v1312_v11 = vmul.f32 0.2, %v1105_v6  ;;  %v1108_v12 = vpop.f32.mrb[90].mxu1 }
 0x1a8   : > { %vm1165_vm12 = vcmp.gt.f32.partialorder %v908_v10, 0.0  ;;  %v1263_v13 = vmul.f32 0.2, %v908_v10  ;;  %v2724_v14 = vpop.f32.mrb[91].mxu0  ;;  %vm1215_vm13 = vcmp.gt.f32.partialorder %v1108_v12, 0.0  ;;  %v2824_v15 = vpop.f32.mrb[91].mxu1  ;;  %v1360_v18 = vsel %vm1164_vm11, %v905_v5, %v1262_v7 }
 0x1a9   : > { %v1410_v16 = vsel %vm1214_vm10, %v1105_v6, %v1312_v11  ;;  %v1313_v17 = vmul.f32 0.2, %v1108_v12 }
 0x1aa   : > { %v1361_v19 = vsel %vm1165_vm12, %v908_v10, %v1263_v13 }
 0x1ab   : > { %v2383_v20 = vpack.c.bf16 %v1361_v19, %v1360_v18  ;;  %v1411_v21 = vsel %vm1215_vm13, %v1108_v12, %v1313_v17 }
 0x1ac   : > { %v2508_v22 = vpack.c.bf16 %v1411_v21, %v1410_v16 }
 0x1ad   : > { %2536 = vst [vmem:[%s3188_s4 + $0xb0] sm:$0xff] %v2383_v20   ;;  %v913_v23 = vpop.f32.mrb[92].mxu0  ;;  %v1113_v24 = vpop.f32.mrb[92].mxu1 }
 0x1ae   : > { %2561 = vst [vmem:[%s3188_s4 + $0x178] sm:$0xff] %v2508_v22   ;;  %v1264_v25 = vmul.f32 0.2, %v913_v23  ;;  %v2727_v26 = vpop.f32.mrb[93].mxu0  ;;  %vm1216_vm14 = vcmp.gt.f32.partialorder %v1113_v24, 0.0  ;;  %v2827_v27 = vpop.f32.mrb[93].mxu1 }
 0x1af   : > { %vm1166_vm15 = vcmp.gt.f32.partialorder %v913_v23, 0.0  ;;  %v916_v28 = vpop.f32.mrb[94].mxu0  ;;  %v1314_v29 = vmul.f32 0.2, %v1113_v24  ;;  %v1116_v30 = vpop.f32.mrb[94].mxu1 }
 0x1b0   : > { %vm1167_vm0 = vcmp.gt.f32.partialorder %v916_v28, 0.0  ;;  %v1265_v31 = vmul.f32 0.2, %v916_v28  ;;  %v2728_v32 = vpop.f32.mrb[95].mxu0  ;;  %vm1217_vm1 = vcmp.gt.f32.partialorder %v1116_v30, 0.0  ;;  %v2828_v33 = vpop.f32.mrb[95].mxu1  ;;  %v1362_v36 = vsel %vm1166_vm15, %v913_v23, %v1264_v25 }
 0x1b1   : > { %v1412_v34 = vsel %vm1216_vm14, %v1113_v24, %v1314_v29  ;;  %v1315_v35 = vmul.f32 0.2, %v1116_v30 }
 0x1b2   : > { %v1363_v37 = vsel %vm1167_vm0, %v916_v28, %v1265_v31 }
 0x1b3   : > { %v2388_v38 = vpack.c.bf16 %v1363_v37, %v1362_v36  ;;  %v1413_v39 = vsel %vm1217_vm1, %v1116_v30, %v1315_v35 }
 0x1b4   : > { %v2513_v40 = vpack.c.bf16 %v1413_v39, %v1412_v34 }
 0x1b5   : > { %2537 = vst [vmem:[%s3188_s4 + $0xb8] sm:$0xff] %v2388_v38   ;;  %v921_v41 = vpop.f32.mrb[96].mxu0 }
 0x1b6   : > { %2562 = vst [vmem:[%s3188_s4 + $0x180] sm:$0xff] %v2513_v40   ;;  %v1266_v42 = vmul.f32 0.2, %v921_v41  ;;  %v2731_v43 = vpop.f32.mrb[97].mxu0  ;;  %vm1168_vm2 = vcmp.gt.f32.partialorder %v921_v41, 0.0 }
 0x1b7   : > { %v924_v44 = vpop.f32.mrb[98].mxu0 }
 0x1b8   : > { %vm1169_vm3 = vcmp.gt.f32.partialorder %v924_v44, 0.0  ;;  %v1267_v45 = vmul.f32 0.2, %v924_v44  ;;  %v2732_v46 = vpop.f32.mrb[99].mxu0  ;;  %v1364_v47 = vsel %vm1168_vm2, %v921_v41, %v1266_v42 }
 0x1ba   : > { %v1365_v48 = vsel %vm1169_vm3, %v924_v44, %v1267_v45 }
 0x1bb   : > { %v2393_v49 = vpack.c.bf16 %v1365_v48, %v1364_v47 }
 0x1bd   : > { %2538 = vst [vmem:[%s3188_s4 + $0xc0] sm:$0xff] %v2393_v49  }
 0x1be PF: > { %s12_s9 = sadd.s32 1, %s2915_s9  }
 0x1bf   : > { %p9_p4 = scmp.ge.s32.totalorder %s12_s9, 4  }
 0x1c1   :  { %11 = sbr.rel (!%p9_p4) target bundleno = 1 (0x1), region = 58 }

// kernel: discriminator_forward.5
= control target key start
LH: loop header
LB: loop body
LE: loop exit
PB: predicated region body
PF: predicated region fallthrough
CT: control target
= control target key end

     0   :  { %s2193_s15 = smov 0   ;;  %s2195_s16 = smov 0   ;;  %s2723_s0 = inlined_call_operand.vmem [shape: bf16[400,128], index: 0, kind: input, shape index: {}]   ;;  %s2724_s1 = inlined_call_operand.vmem [shape: bf16[128,128], index: 1, kind: input, shape index: {}]   ;;  %s2725_s2 = inlined_call_operand.vmem [shape: f32[1,128], index: 2, kind: input, shape index: {}]   ;;  %s2726_s3 = inlined_call_operand.vmem [shape: f32[1,128], index: 3, kind: input, shape index: {}]   ;;  %s2727_s4 = inlined_call_operand.vmem [shape: bf16[400,128], index: 4, kind: output, shape index: {}]  }
   0x1   :  { %s2197_s17 = smov 0  }
   0x2 LB: > { %s26_s18 = sadd.s32 1, %s2160_s16  ;;  %p1625_p0 = scmp.ge.s32.totalorder %s2164_s17, 1  ;;  %s2164_s17 = sphi %s2197_s17, %s14_s17   ;;  %s2160_s16 = sphi %s2195_s16, %s2729_s16   ;;  %s2156_s15 = sphi %s2193_s15, %s2728_s15  }
   0x3   : > { %p28_p1 = scmp.ge.s32.totalorder %s26_s18, 2  ;;  %p185_p2 = scmp.lt.s32.totalorder %s2164_s17, 3 }
   0x5   : > { %s2731_s18 = smov (%p28_p1, %s26_s18), 0  ;;  %p186_p3 = pnand %p1625_p0, %p185_p2 }
   0x6   : > { %p1626_p4 = scmp.ne.s32.totalorder (!%p186_p3), %s2156_s15, 0 }
   0x7   : > { %189 = sbr.rel (%p186_p3) target bundleno = 534 (0x216), region = 36 }
   0xe   : > { %237 = sbr.rel (%p1626_p4) target bundleno = 424 (0x1a8), region = 40  ;;  %v2107_v0 = vld [vmem:[%s2724_s1] sm:$0xff] (!%p1626_p4)   ;;  %v2166_v1 = vmov (!%p1626_p4), 0.0   ;;  %v2108_v2 = vld [vmem:[%s2724_s1 + $0x8] sm:$0xff] (!%p1626_p4)   ;;  %vm2167_vm0 = vmmov (!%p1626_p4), 0   ;;  %v2109_v3 = vld [vmem:[%s2724_s1 + $0x10] sm:$0xff] (!%p1626_p4)  }
   0xf   : > { %1949 = vmatprep.subr.bf16.mxu0 (!%p1626_p4), %v2166_v1  ;;  %790 = vst [vmem:[#allocation3] sm:$0x1] (!%p1626_p4), %v2166_v1  ;;  %791 = vst [vmem:[#allocation4] sm:$0x1] (!%p1626_p4), %v2166_v1  ;;  %2065 = vmatprep.subr.bf16.mxu1 (!%p1626_p4), %v2166_v1  ;;  %v2110_v4 = vld [vmem:[%s2724_s1 + $0x18] sm:$0xff] (!%p1626_p4)   ;;  %v2111_v5 = vld [vmem:[%s2724_s1 + $0x20] sm:$0xff] (!%p1626_p4)  }
  0x10   : > { %1950 = vmatpush3.bf16.msra.mxu0 (!%p1626_p4), %v2107_v0  ;;  %1965 = vmatprep.mubr.msk.bf16.mxu0 (!%p1626_p4), %vm2167_vm0, %v2166_v1  ;;  %v2112_v6 = vld [vmem:[%s2724_s1 + $0x28] sm:$0xff] (!%p1626_p4)   ;;  %v2113_v7 = vld [vmem:[%s2724_s1 + $0x30] sm:$0xff] (!%p1626_p4)   ;;  %v2114_v8 = vld [vmem:[%s2724_s1 + $0x38] sm:$0xff] (!%p1626_p4)  }
  0x11   : > { %1951 = vmatprep.subr.bf16.mxu0 (!%p1626_p4), %v2166_v1  ;;  %2073 = vmatpush3.bf16.msra.mxu1 (!%p1626_p4), %v2107_v0  ;;  %v2115_v9 = vld [vmem:[%s2723_s0] sm:$0xff] (!%p1626_p4)   ;;  %v2122_v10 = vld [vmem:[%s2723_s0 + $0x68] sm:$0xff] (!%p1626_p4)   ;;  %v2124_v12 = vld [vmem:[%s2723_s0 + $0x70] sm:$0xff] (!%p1626_p4)  }
  0x12   : > { %2066 = vmatprep.subr.bf16.mxu1 (!%p1626_p4), %v2166_v1  ;;  %2017 = vmatprep.mubr.msk.bf16.mxu1 (!%p1626_p4), %vm2167_vm0, %v2166_v1  ;;  %v2116_v11 = vld [vmem:[%s2723_s0 + $0x8] sm:$0xff] (!%p1626_p4)   ;;  %v2117_v13 = vld [vmem:[%s2723_s0 + $0x10] sm:$0xff] (!%p1626_p4)   ;;  %v2126_v14 = vld [vmem:[%s2723_s0 + $0x78] sm:$0xff] (!%p1626_p4)  }
  0x13   : > { %v2118_v15 = vld [vmem:[%s2723_s0 + $0x18] sm:$0xff] (!%p1626_p4)   ;;  %v2128_v16 = vld [vmem:[%s2723_s0 + $0x80] sm:$0xff] (!%p1626_p4)   ;;  %v2130_v18 = vld [vmem:[%s2723_s0 + $0x88] sm:$0xff] (!%p1626_p4)  }
  0x14   : > { %1952 = vmatpush3.bf16.msra.mxu0 (!%p1626_p4), %v2108_v2  ;;  %v2119_v17 = vld [vmem:[%s2723_s0 + $0x20] sm:$0xff] (!%p1626_p4)   ;;  %v2120_v19 = vld [vmem:[%s2723_s0 + $0x28] sm:$0xff] (!%p1626_p4)   ;;  %v2132_v20 = vld [vmem:[%s2723_s0 + $0x90] sm:$0xff] (!%p1626_p4)  }
  0x15   : > { %1953 = vmatprep.subr.bf16.mxu0 %v2166_v1  ;;  %2074 = vmatpush3.bf16.msra.mxu1 %v2108_v2  ;;  %v2121_v21 = vld [vmem:[%s2723_s0 + $0x30] sm:$0xff]   ;;  %v2134_v22 = vld [vmem:[%s2723_s0 + $0x98] sm:$0xff]   ;;  %v2135_v24 = vld [vmem:[%s2723_s0 + $0xa0] sm:$0xff]  }
  0x16   : > { %2067 = vmatprep.subr.bf16.mxu1 %v2166_v1  ;;  %v2123_v23 = vld [vmem:[%s2723_s0 + $0x38] sm:$0xff]   ;;  %v2125_v25 = vld [vmem:[%s2723_s0 + $0x40] sm:$0xff]   ;;  %v2136_v26 = vld [vmem:[%s2723_s0 + $0xa8] sm:$0xff]  }
  0x17   : > { %v2127_v27 = vld [vmem:[%s2723_s0 + $0x48] sm:$0xff]   ;;  %v2137_v28 = vld [vmem:[%s2723_s0 + $0xb0] sm:$0xff]   ;;  %v2138_v30 = vld [vmem:[%s2723_s0 + $0xb8] sm:$0xff]  }
  0x18   : > { %1954 = vmatpush3.bf16.msra.mxu0 %v2109_v3  ;;  %v2129_v29 = vld [vmem:[%s2723_s0 + $0x50] sm:$0xff]   ;;  %v2131_v31 = vld [vmem:[%s2723_s0 + $0x58] sm:$0xff]   ;;  %v2139_v32 = vld [vmem:[%s2723_s0 + $0xc0] sm:$0xff]  }
  0x19   : > { %1955 = vmatprep.subr.bf16.mxu0 %v2166_v1  ;;  %2075 = vmatpush3.bf16.msra.mxu1 %v2109_v3  ;;  %v2133_v33 = vld [vmem:[%s2723_s0 + $0x60] sm:$0xff]  }
  0x1a   : > { %2068 = vmatprep.subr.bf16.mxu1 %v2166_v1 }
  0x1c   : > { %1956 = vmatpush3.bf16.msra.mxu0 %v2110_v4 }
  0x1d   : > { %1957 = vmatprep.subr.bf16.mxu0 %v2166_v1  ;;  %2076 = vmatpush3.bf16.msra.mxu1 %v2110_v4 }
  0x1e   : > { %2069 = vmatprep.subr.bf16.mxu1 %v2166_v1 }
  0x20   : > { %1958 = vmatpush3.bf16.msra.mxu0 %v2111_v5 }
  0x21   : > { %1959 = vmatprep.subr.bf16.mxu0 %v2166_v1  ;;  %2077 = vmatpush3.bf16.msra.mxu1 %v2111_v5 }
  0x22   : > { %2070 = vmatprep.subr.bf16.mxu1 %v2166_v1 }
  0x24   : > { %1960 = vmatpush3.bf16.msra.mxu0 %v2112_v6 }
  0x25   : > { %1961 = vmatprep.subr.bf16.mxu0 %v2166_v1  ;;  %2078 = vmatpush3.bf16.msra.mxu1 %v2112_v6 }
  0x26   : > { %2071 = vmatprep.subr.bf16.mxu1 %v2166_v1 }
  0x28   : > { %1962 = vmatpush3.bf16.msra.mxu0 %v2113_v7 }
  0x29   : > { %1963 = vmatprep.subr.bf16.mxu0 %v2166_v1  ;;  %2079 = vmatpush3.bf16.msra.mxu1 %v2113_v7 }
  0x2a   : > { %2072 = vmatprep.subr.bf16.mxu1 %v2166_v1 }
  0x2c   : > { %1964 = vmatpush3.bf16.msra.mxu0 %v2114_v8 }
  0x2d   : > { %2080 = vmatpush3.bf16.msra.mxu1 %v2114_v8 }
  0x2f   : > { %1966 = vmatmul.mubr.bf16.vlgmr.msra.gmra.mrb[0].mxu0 %v2115_v9 }
  0x30   : > { %1969 = vmatprep.mubr.msk.bf16.mxu0 %vm2167_vm0, %v2166_v1  ;;  %2018 = vmatmul.mubr.bf16.vlgmr.msra.gmra.mrb[0].mxu1 %v2122_v10 }
  0x31   : > { %2021 = vmatprep.mubr.msk.bf16.mxu1 %vm2167_vm0, %v2166_v1 }
  0x37   : > { %1970 = vmatmul.mubr.bf16.gmra.mrb[4].mxu0 %v2116_v11 }
  0x38   : > { %1973 = vmatprep.mubr.msk.bf16.mxu0 %vm2167_vm0, %v2166_v1  ;;  %2022 = vmatmul.mubr.bf16.gmra.mrb[4].mxu1 %v2124_v12 }
  0x39   : > { %2025 = vmatprep.mubr.msk.bf16.mxu1 %vm2167_vm0, %v2166_v1 }
  0x3f   : > { %1974 = vmatmul.mubr.bf16.gmra.mrb[8].mxu0 %v2117_v13 }
  0x40   : > { %1977 = vmatprep.mubr.msk.bf16.mxu0 %vm2167_vm0, %v2166_v1  ;;  %2026 = vmatmul.mubr.bf16.gmra.mrb[8].mxu1 %v2126_v14 }
  0x41   : > { %2029 = vmatprep.mubr.msk.bf16.mxu1 %vm2167_vm0, %v2166_v1 }
  0x47   : > { %1978 = vmatmul.mubr.bf16.gmra.mrb[12].mxu0 %v2118_v15 }
  0x48   : > { %1981 = vmatprep.mubr.msk.bf16.mxu0 %vm2167_vm0, %v2166_v1  ;;  %2030 = vmatmul.mubr.bf16.gmra.mrb[12].mxu1 %v2128_v16 }
  0x49   : > { %2033 = vmatprep.mubr.msk.bf16.mxu1 %vm2167_vm0, %v2166_v1 }
  0x4f   : > { %1982 = vmatmul.mubr.bf16.gmra.mrb[16].mxu0 %v2119_v17 }
  0x50   : > { %1985 = vmatprep.mubr.msk.bf16.mxu0 %vm2167_vm0, %v2166_v1  ;;  %2034 = vmatmul.mubr.bf16.gmra.mrb[16].mxu1 %v2130_v18 }
  0x51   : > { %2037 = vmatprep.mubr.msk.bf16.mxu1 %vm2167_vm0, %v2166_v1 }
  0x57   : > { %1986 = vmatmul.mubr.bf16.gmra.mrb[20].mxu0 %v2120_v19 }
  0x58   : > { %1989 = vmatprep.mubr.msk.bf16.mxu0 %vm2167_vm0, %v2166_v1  ;;  %2038 = vmatmul.mubr.bf16.gmra.mrb[20].mxu1 %v2132_v20 }
  0x59   : > { %2041 = vmatprep.mubr.msk.bf16.mxu1 %vm2167_vm0, %v2166_v1 }
  0x5f   : > { %1990 = vmatmul.mubr.bf16.gmra.mrb[24].mxu0 %v2121_v21 }
  0x60   : > { %1993 = vmatprep.mubr.msk.bf16.mxu0 %vm2167_vm0, %v2166_v1  ;;  %2042 = vmatmul.mubr.bf16.gmra.mrb[24].mxu1 %v2134_v22 }
  0x61   : > { %2045 = vmatprep.mubr.msk.bf16.mxu1 %vm2167_vm0, %v2166_v1 }
  0x67   : > { %1994 = vmatmul.mubr.bf16.gmra.mrb[28].mxu0 %v2123_v23 }
  0x68   : > { %1997 = vmatprep.mubr.msk.bf16.mxu0 %vm2167_vm0, %v2166_v1  ;;  %2046 = vmatmul.mubr.bf16.gmra.mrb[28].mxu1 %v2135_v24 }
  0x69   : > { %2049 = vmatprep.mubr.msk.bf16.mxu1 %vm2167_vm0, %v2166_v1 }
  0x6f   : > { %1998 = vmatmul.mubr.bf16.gmra.mrb[32].mxu0 %v2125_v25 }
  0x70   : > { %2001 = vmatprep.mubr.msk.bf16.mxu0 %vm2167_vm0, %v2166_v1  ;;  %2050 = vmatmul.mubr.bf16.gmra.mrb[32].mxu1 %v2136_v26 }
  0x71   : > { %2053 = vmatprep.mubr.msk.bf16.mxu1 %vm2167_vm0, %v2166_v1 }
  0x77   : > { %2002 = vmatmul.mubr.bf16.gmra.mrb[36].mxu0 %v2127_v27 }
  0x78   : > { %2005 = vmatprep.mubr.msk.bf16.mxu0 %vm2167_vm0, %v2166_v1  ;;  %2054 = vmatmul.mubr.bf16.gmra.mrb[36].mxu1 %v2137_v28 }
  0x79   : > { %2057 = vmatprep.mubr.msk.bf16.mxu1 %vm2167_vm0, %v2166_v1 }
  0x7f   : > { %2006 = vmatmul.mubr.bf16.gmra.mrb[40].mxu0 %v2129_v29 }
  0x80   : > { %2009 = vmatprep.mubr.msk.bf16.mxu0 %vm2167_vm0, %v2166_v1  ;;  %2058 = vmatmul.mubr.bf16.gmra.mrb[40].mxu1 %v2138_v30 }
  0x81   : > { %2061 = vmatprep.mubr.msk.bf16.mxu1 %vm2167_vm0, %v2166_v1 }
  0x87   : > { %2010 = vmatmul.mubr.bf16.gmra.mrb[44].mxu0 %v2131_v31 }
  0x88   : > { %2013 = vmatprep.mubr.msk.bf16.mxu0 %vm2167_vm0, %v2166_v1  ;;  %2062 = vmatmul.mubr.bf16.gmra.mrb[44].mxu1 %v2139_v32 }
  0x8f   : > { %2014 = vmatmul.mubr.bf16.gmra.mrb[48].mxu0 %v2133_v33 }
 0x102   : > { %v536_v34 = vpop.f32.mrb[0].mxu0 }
 0x103   : > { %736 = vst [vmem:[#allocation2] sm:$0xff] %v536_v34  ;;  %v1967_v35 = vpop.f32.mrb[1].mxu0  ;;  %v2381_v36 = vpop.f32.mrb[0].mxu1  ;;  %v851_v39 = vmul.f32 %v536_v34, %v536_v34 }
 0x104   : > { %v539_v37 = vpop.f32.mrb[2].mxu0  ;;  %762 = vst [vmem:[#allocation2 + $0xd0] sm:$0xff] %v2381_v36  ;;  %v2019_v38 = vpop.f32.mrb[1].mxu1 }
 0x105   : > { %737 = vst [vmem:[#allocation2 + $0x8] sm:$0xff] %v539_v37  ;;  %v793_v40 = vadd.f32 %v539_v37, %v536_v34  ;;  %v852_v41 = vmul.f32 %v539_v37, %v539_v37  ;;  %v1968_v42 = vpop.f32.mrb[3].mxu0  ;;  %v2384_v43 = vpop.f32.mrb[2].mxu1 }
 0x106   : > { %763 = vst [vmem:[#allocation2 + $0xd8] sm:$0xff] %v2384_v43  ;;  %v2020_v44 = vpop.f32.mrb[3].mxu1 }
 0x107   : > { %v901_v45 = vadd.f32 %v852_v41, %v851_v39 }
 0x10a   : > { %v544_v46 = vpop.f32.mrb[4].mxu0 }
 0x10b   : > { %738 = vst [vmem:[#allocation2 + $0x10] sm:$0xff] %v544_v46  ;;  %v794_v47 = vadd.f32 %v793_v40, %v544_v46  ;;  %v853_v48 = vmul.f32 %v544_v46, %v544_v46  ;;  %v1971_v49 = vpop.f32.mrb[5].mxu0  ;;  %v2387_v50 = vpop.f32.mrb[4].mxu1 }
 0x10c   : > { %v547_v51 = vpop.f32.mrb[6].mxu0  ;;  %764 = vst [vmem:[#allocation2 + $0xe0] sm:$0xff] %v2387_v50  ;;  %v2023_v52 = vpop.f32.mrb[5].mxu1 }
 0x10d   : > { %v902_v53 = vadd.f32 %v901_v45, %v853_v48  ;;  %739 = vst [vmem:[#allocation2 + $0x18] sm:$0xff] %v547_v51  ;;  %v795_v54 = vadd.f32 %v794_v47, %v547_v51  ;;  %v854_v55 = vmul.f32 %v547_v51, %v547_v51  ;;  %v1972_v56 = vpop.f32.mrb[7].mxu0  ;;  %v2390_v57 = vpop.f32.mrb[6].mxu1 }
 0x10e   : > { %765 = vst [vmem:[#allocation2 + $0xe8] sm:$0xff] %v2390_v57  ;;  %v2024_v58 = vpop.f32.mrb[7].mxu1 }
 0x10f   : > { %v903_v59 = vadd.f32 %v902_v53, %v854_v55 }
 0x112   : > { %v552_v60 = vpop.f32.mrb[8].mxu0 }
 0x113   : > { %740 = vst [vmem:[#allocation2 + $0x20] sm:$0xff] %v552_v60  ;;  %v796_v61 = vadd.f32 %v795_v54, %v552_v60  ;;  %v855_v62 = vmul.f32 %v552_v60, %v552_v60  ;;  %v1975_v63 = vpop.f32.mrb[9].mxu0  ;;  %v2393_v0 = vpop.f32.mrb[8].mxu1 }
 0x114   : > { %v555_v1 = vpop.f32.mrb[10].mxu0  ;;  %766 = vst [vmem:[#allocation2 + $0xf0] sm:$0xff] %v2393_v0  ;;  %v2027_v2 = vpop.f32.mrb[9].mxu1 }
 0x115   : > { %v904_v3 = vadd.f32 %v903_v59, %v855_v62  ;;  %741 = vst [vmem:[#allocation2 + $0x28] sm:$0xff] %v555_v1  ;;  %v797_v4 = vadd.f32 %v796_v61, %v555_v1  ;;  %v856_v5 = vmul.f32 %v555_v1, %v555_v1  ;;  %v1976_v6 = vpop.f32.mrb[11].mxu0  ;;  %v2396_v7 = vpop.f32.mrb[10].mxu1 }
 0x116   : > { %767 = vst [vmem:[#allocation2 + $0xf8] sm:$0xff] %v2396_v7  ;;  %v2028_v8 = vpop.f32.mrb[11].mxu1 }
 0x117   : > { %v905_v9 = vadd.f32 %v904_v3, %v856_v5 }
 0x11a   : > { %v560_v10 = vpop.f32.mrb[12].mxu0 }
 0x11b   : > { %742 = vst [vmem:[#allocation2 + $0x30] sm:$0xff] %v560_v10  ;;  %v798_v11 = vadd.f32 %v797_v4, %v560_v10  ;;  %v857_v12 = vmul.f32 %v560_v10, %v560_v10  ;;  %v1979_v13 = vpop.f32.mrb[13].mxu0  ;;  %v2399_v14 = vpop.f32.mrb[12].mxu1 }
 0x11c   : > { %v563_v15 = vpop.f32.mrb[14].mxu0  ;;  %768 = vst [vmem:[#allocation2 + $0x100] sm:$0xff] %v2399_v14  ;;  %v2031_v16 = vpop.f32.mrb[13].mxu1 }
 0x11d   : > { %v906_v17 = vadd.f32 %v905_v9, %v857_v12  ;;  %743 = vst [vmem:[#allocation2 + $0x38] sm:$0xff] %v563_v15  ;;  %v799_v18 = vadd.f32 %v798_v11, %v563_v15  ;;  %v858_v19 = vmul.f32 %v563_v15, %v563_v15  ;;  %v1980_v20 = vpop.f32.mrb[15].mxu0  ;;  %v2402_v21 = vpop.f32.mrb[14].mxu1 }
 0x11e   : > { %769 = vst [vmem:[#allocation2 + $0x108] sm:$0xff] %v2402_v21  ;;  %v2032_v22 = vpop.f32.mrb[15].mxu1 }
 0x11f   : > { %v907_v23 = vadd.f32 %v906_v17, %v858_v19 }
 0x122   : > { %v568_v24 = vpop.f32.mrb[16].mxu0 }
 0x123   : > { %744 = vst [vmem:[#allocation2 + $0x40] sm:$0xff] %v568_v24  ;;  %v800_v25 = vadd.f32 %v799_v18, %v568_v24  ;;  %v859_v26 = vmul.f32 %v568_v24, %v568_v24  ;;  %v1983_v27 = vpop.f32.mrb[17].mxu0  ;;  %v2405_v28 = vpop.f32.mrb[16].mxu1 }
 0x124   : > { %v571_v29 = vpop.f32.mrb[18].mxu0  ;;  %770 = vst [vmem:[#allocation2 + $0x110] sm:$0xff] %v2405_v28  ;;  %v2035_v30 = vpop.f32.mrb[17].mxu1 }
 0x125   : > { %v908_v31 = vadd.f32 %v907_v23, %v859_v26  ;;  %745 = vst [vmem:[#allocation2 + $0x48] sm:$0xff] %v571_v29  ;;  %v801_v32 = vadd.f32 %v800_v25, %v571_v29  ;;  %v860_v33 = vmul.f32 %v571_v29, %v571_v29  ;;  %v1984_v34 = vpop.f32.mrb[19].mxu0  ;;  %v2408_v35 = vpop.f32.mrb[18].mxu1 }
 0x126   : > { %771 = vst [vmem:[#allocation2 + $0x118] sm:$0xff] %v2408_v35  ;;  %v2036_v37 = vpop.f32.mrb[19].mxu1 }
 0x127   : > { %v909_v38 = vadd.f32 %v908_v31, %v860_v33 }
 0x12a   : > { %v576_v39 = vpop.f32.mrb[20].mxu0 }
 0x12b   : > { %746 = vst [vmem:[#allocation2 + $0x50] sm:$0xff] %v576_v39  ;;  %v802_v40 = vadd.f32 %v801_v32, %v576_v39  ;;  %v861_v41 = vmul.f32 %v576_v39, %v576_v39  ;;  %v1987_v42 = vpop.f32.mrb[21].mxu0  ;;  %v2411_v44 = vpop.f32.mrb[20].mxu1 }
 0x12c   : > { %v579_v45 = vpop.f32.mrb[22].mxu0  ;;  %772 = vst [vmem:[#allocation2 + $0x120] sm:$0xff] %v2411_v44  ;;  %v2039_v46 = vpop.f32.mrb[21].mxu1 }
 0x12d   : > { %v910_v47 = vadd.f32 %v909_v38, %v861_v41  ;;  %747 = vst [vmem:[#allocation2 + $0x58] sm:$0xff] %v579_v45  ;;  %v803_v48 = vadd.f32 %v802_v40, %v579_v45  ;;  %v862_v49 = vmul.f32 %v579_v45, %v579_v45  ;;  %v1988_v51 = vpop.f32.mrb[23].mxu0  ;;  %v2414_v52 = vpop.f32.mrb[22].mxu1 }
 0x12e   : > { %773 = vst [vmem:[#allocation2 + $0x128] sm:$0xff] %v2414_v52  ;;  %v2040_v53 = vpop.f32.mrb[23].mxu1 }
 0x12f   : > { %v911_v54 = vadd.f32 %v910_v47, %v862_v49 }
 0x132   : > { %v584_v55 = vpop.f32.mrb[24].mxu0 }
 0x133   : > { %748 = vst [vmem:[#allocation2 + $0x60] sm:$0xff] %v584_v55  ;;  %v804_v56 = vadd.f32 %v803_v48, %v584_v55  ;;  %v863_v58 = vmul.f32 %v584_v55, %v584_v55  ;;  %v1991_v59 = vpop.f32.mrb[25].mxu0  ;;  %v2417_v60 = vpop.f32.mrb[24].mxu1 }
 0x134   : > { %v587_v61 = vpop.f32.mrb[26].mxu0  ;;  %774 = vst [vmem:[#allocation2 + $0x130] sm:$0xff] %v2417_v60  ;;  %v2043_v62 = vpop.f32.mrb[25].mxu1 }
 0x135   : > { %v912_v63 = vadd.f32 %v911_v54, %v863_v58  ;;  %749 = vst [vmem:[#allocation2 + $0x68] sm:$0xff] %v587_v61  ;;  %v805_v1 = vadd.f32 %v804_v56, %v587_v61  ;;  %v864_v2 = vmul.f32 %v587_v61, %v587_v61  ;;  %v1992_v3 = vpop.f32.mrb[27].mxu0  ;;  %v2420_v4 = vpop.f32.mrb[26].mxu1 }
 0x136   : > { %775 = vst [vmem:[#allocation2 + $0x138] sm:$0xff] %v2420_v4  ;;  %v2044_v5 = vpop.f32.mrb[27].mxu1 }
 0x137   : > { %v913_v6 = vadd.f32 %v912_v63, %v864_v2 }
 0x13a   : > { %v592_v8 = vpop.f32.mrb[28].mxu0 }
 0x13b   : > { %750 = vst [vmem:[#allocation2 + $0x70] sm:$0xff] %v592_v8  ;;  %v806_v9 = vadd.f32 %v805_v1, %v592_v8  ;;  %v865_v10 = vmul.f32 %v592_v8, %v592_v8  ;;  %v1995_v11 = vpop.f32.mrb[29].mxu0  ;;  %v2423_v12 = vpop.f32.mrb[28].mxu1 }
 0x13c   : > { %v595_v13 = vpop.f32.mrb[30].mxu0  ;;  %776 = vst [vmem:[#allocation2 + $0x140] sm:$0xff] %v2423_v12  ;;  %v2047_v15 = vpop.f32.mrb[29].mxu1 }
 0x13d   : > { %v914_v16 = vadd.f32 %v913_v6, %v865_v10  ;;  %751 = vst [vmem:[#allocation2 + $0x78] sm:$0xff] %v595_v13  ;;  %v807_v17 = vadd.f32 %v806_v9, %v595_v13  ;;  %v866_v18 = vmul.f32 %v595_v13, %v595_v13  ;;  %v1996_v19 = vpop.f32.mrb[31].mxu0  ;;  %v2426_v20 = vpop.f32.mrb[30].mxu1 }
 0x13e   : > { %777 = vst [vmem:[#allocation2 + $0x148] sm:$0xff] %v2426_v20  ;;  %v2048_v22 = vpop.f32.mrb[31].mxu1 }
 0x13f   : > { %v915_v23 = vadd.f32 %v914_v16, %v866_v18 }
 0x142   : > { %v600_v24 = vpop.f32.mrb[32].mxu0 }
 0x143   : > { %752 = vst [vmem:[#allocation2 + $0x80] sm:$0xff] %v600_v24  ;;  %v808_v25 = vadd.f32 %v807_v17, %v600_v24  ;;  %v867_v26 = vmul.f32 %v600_v24, %v600_v24  ;;  %v1999_v27 = vpop.f32.mrb[33].mxu0  ;;  %v2429_v29 = vpop.f32.mrb[32].mxu1 }
 0x144   : > { %v603_v30 = vpop.f32.mrb[34].mxu0  ;;  %778 = vst [vmem:[#allocation2 + $0x150] sm:$0xff] %v2429_v29  ;;  %v2051_v31 = vpop.f32.mrb[33].mxu1 }
 0x145   : > { %v916_v32 = vadd.f32 %v915_v23, %v867_v26  ;;  %753 = vst [vmem:[#allocation2 + $0x88] sm:$0xff] %v603_v30  ;;  %v809_v33 = vadd.f32 %v808_v25, %v603_v30  ;;  %v868_v34 = vmul.f32 %v603_v30, %v603_v30  ;;  %v2000_v37 = vpop.f32.mrb[35].mxu0  ;;  %v2432_v38 = vpop.f32.mrb[34].mxu1 }
 0x146   : > { %779 = vst [vmem:[#allocation2 + $0x158] sm:$0xff] %v2432_v38  ;;  %v2052_v39 = vpop.f32.mrb[35].mxu1 }
 0x147   : > { %v917_v40 = vadd.f32 %v916_v32, %v868_v34 }
 0x14a   : > { %v608_v41 = vpop.f32.mrb[36].mxu0 }
 0x14b   : > { %754 = vst [vmem:[#allocation2 + $0x90] sm:$0xff] %v608_v41  ;;  %v810_v42 = vadd.f32 %v809_v33, %v608_v41  ;;  %v869_v45 = vmul.f32 %v608_v41, %v608_v41  ;;  %v2003_v46 = vpop.f32.mrb[37].mxu0  ;;  %v2435_v47 = vpop.f32.mrb[36].mxu1 }
 0x14c   : > { %v611_v48 = vpop.f32.mrb[38].mxu0  ;;  %780 = vst [vmem:[#allocation2 + $0x160] sm:$0xff] %v2435_v47  ;;  %v2055_v49 = vpop.f32.mrb[37].mxu1 }
 0x14d   : > { %v918_v51 = vadd.f32 %v917_v40, %v869_v45  ;;  %755 = vst [vmem:[#allocation2 + $0x98] sm:$0xff] %v611_v48  ;;  %v811_v53 = vadd.f32 %v810_v42, %v611_v48  ;;  %v870_v54 = vmul.f32 %v611_v48, %v611_v48  ;;  %v2004_v55 = vpop.f32.mrb[39].mxu0  ;;  %v2438_v56 = vpop.f32.mrb[38].mxu1  ;;  %v877_v49 = vmul.f32 %v2381_v36, %v2381_v36 }
 0x14e   : > { %781 = vst [vmem:[#allocation2 + $0x168] sm:$0xff] %v2438_v56  ;;  %v2056_v58 = vpop.f32.mrb[39].mxu1 }
 0x14f   : > { %v919_v59 = vadd.f32 %v918_v51, %v870_v54  ;;  %v878_v54 = vmul.f32 %v2384_v43, %v2384_v43 }
 0x152   : > { %v616_v61 = vpop.f32.mrb[40].mxu0 }
 0x153   : > { %756 = vst [vmem:[#allocation2 + $0xa0] sm:$0xff] %v616_v61  ;;  %v812_v62 = vadd.f32 %v811_v53, %v616_v61  ;;  %v871_v63 = vmul.f32 %v616_v61, %v616_v61  ;;  %v2007_v1 = vpop.f32.mrb[41].mxu0  ;;  %v2441_v2 = vpop.f32.mrb[40].mxu1 }
 0x154   : > { %v619_v3 = vpop.f32.mrb[42].mxu0  ;;  %782 = vst [vmem:[#allocation2 + $0x170] sm:$0xff] %v2441_v2  ;;  %v2059_v5 = vpop.f32.mrb[41].mxu1 }
 0x155   : > { %v920_v6 = vadd.f32 %v919_v59, %v871_v63  ;;  %757 = vst [vmem:[#allocation2 + $0xa8] sm:$0xff] %v619_v3  ;;  %v813_v8 = vadd.f32 %v812_v62, %v619_v3  ;;  %v872_v9 = vmul.f32 %v619_v3, %v619_v3  ;;  %v2008_v10 = vpop.f32.mrb[43].mxu0  ;;  %v2444_v11 = vpop.f32.mrb[42].mxu1  ;;  %v879_v59 = vmul.f32 %v2387_v50, %v2387_v50 }
 0x156   : > { %783 = vst [vmem:[#allocation2 + $0x178] sm:$0xff] %v2444_v11  ;;  %v2060_v13 = vpop.f32.mrb[43].mxu1  ;;  %v880_v63 = vmul.f32 %v2390_v57, %v2390_v57 }
 0x157   : > { %v921_v15 = vadd.f32 %v920_v6, %v872_v9 }
 0x15a   : > { %v624_v16 = vpop.f32.mrb[44].mxu0 }
 0x15b   : > { %758 = vst [vmem:[#allocation2 + $0xb0] sm:$0xff] %v624_v16  ;;  %v814_v17 = vadd.f32 %v813_v8, %v624_v16  ;;  %v873_v18 = vmul.f32 %v624_v16, %v624_v16  ;;  %v2011_v19 = vpop.f32.mrb[45].mxu0  ;;  %v2447_v22 = vpop.f32.mrb[44].mxu1 }
 0x15c   : > { %v627_v23 = vpop.f32.mrb[46].mxu0  ;;  %784 = vst [vmem:[#allocation2 + $0x180] sm:$0xff] %v2447_v22  ;;  %v2063_v24 = vpop.f32.mrb[45].mxu1 }
 0x15d   : > { %v922_v25 = vadd.f32 %v921_v15, %v873_v18  ;;  %759 = vst [vmem:[#allocation2 + $0xb8] sm:$0xff] %v627_v23  ;;  %v815_v26 = vadd.f32 %v814_v17, %v627_v23  ;;  %v874_v27 = vmul.f32 %v627_v23, %v627_v23  ;;  %v2012_v30 = vpop.f32.mrb[47].mxu0  ;;  %v2450_v31 = vpop.f32.mrb[46].mxu1 }
 0x15e   : > { %785 = vst [vmem:[#allocation2 + $0x188] sm:$0xff] %v2450_v31  ;;  %v2064_v32 = vpop.f32.mrb[47].mxu1  ;;  %v889_v30 = vmul.f32 %v2417_v60, %v2417_v60 }
 0x15f   : > { %v923_v33 = vadd.f32 %v922_v25, %v874_v27 }
 0x162   : > { %v632_v34 = vpop.f32.mrb[48].mxu0 }
 0x163   : > { %760 = vst [vmem:[#allocation2 + $0xc0] sm:$0xff] %v632_v34  ;;  %v816_v37 = vadd.f32 %v815_v26, %v632_v34  ;;  %v875_v39 = vmul.f32 %v632_v34, %v632_v34  ;;  %v2015_v40 = vpop.f32.mrb[49].mxu0  ;;  %v890_v34 = vmul.f32 %v2420_v4, %v2420_v4 }
 0x164   : > { %v635_v41 = vpop.f32.mrb[50].mxu0 }
 0x165   : > { %v924_v42 = vadd.f32 %v923_v33, %v875_v39  ;;  %761 = vst [vmem:[#allocation2 + $0xc8] sm:$0xff] %v635_v41  ;;  %v817_v45 = vadd.f32 %v816_v37, %v635_v41  ;;  %v876_v46 = vmul.f32 %v635_v41, %v635_v41  ;;  %v2016_v48 = vpop.f32.mrb[51].mxu0  ;;  %v891_v39 = vmul.f32 %v2423_v12, %v2423_v12 }
 0x166   : > { %v892_v41 = vmul.f32 %v2426_v20, %v2426_v20  ;;  %v894_v48 = vmul.f32 %v2432_v38, %v2432_v38 }
 0x167   : > { %v818_v51 = vadd.f32 %v817_v45, %v2381_v36  ;;  %v925_v53 = vadd.f32 %v924_v42, %v876_v46  ;;  %v881_v36 = vmul.f32 %v2393_v0, %v2393_v0  ;;  %v893_v45 = vmul.f32 %v2429_v29, %v2429_v29 }
 0x169   : > { %v819_v55 = vadd.f32 %v818_v51, %v2384_v43  ;;  %v926_v58 = vadd.f32 %v925_v53, %v877_v49  ;;  %v882_v43 = vmul.f32 %v2396_v7, %v2396_v7  ;;  %v895_v51 = vmul.f32 %v2435_v47, %v2435_v47 }
 0x16b   : > { %v820_v61 = vadd.f32 %v819_v55, %v2387_v50  ;;  %v927_v62 = vadd.f32 %v926_v58, %v878_v54  ;;  %v883_v50 = vmul.f32 %v2399_v14, %v2399_v14  ;;  %v896_v54 = vmul.f32 %v2438_v56, %v2438_v56 }
 0x16c   : > { %v897_v58 = vmul.f32 %v2441_v2, %v2441_v2 }
 0x16d   : > { %v821_v1 = vadd.f32 %v820_v61, %v2390_v57  ;;  %v928_v3 = vadd.f32 %v927_v62, %v879_v59  ;;  %v884_v57 = vmul.f32 %v2402_v21, %v2402_v21  ;;  %v898_v61 = vmul.f32 %v2444_v11, %v2444_v11 }
 0x16f   : > { %v822_v5 = vadd.f32 %v821_v1, %v2393_v0  ;;  %v929_v6 = vadd.f32 %v928_v3, %v880_v63  ;;  %v885_v0 = vmul.f32 %v2405_v28, %v2405_v28  ;;  %v900_v3 = vmul.f32 %v2450_v31, %v2450_v31 }
 0x171   : > { %v823_v8 = vadd.f32 %v822_v5, %v2396_v7  ;;  %v930_v9 = vadd.f32 %v929_v6, %v881_v36  ;;  %v886_v7 = vmul.f32 %v2408_v35, %v2408_v35 }
 0x173   : > { %v931_v10 = vadd.f32 %v930_v9, %v882_v43  ;;  %v824_v13 = vadd.f32 %v823_v8, %v2399_v14  ;;  %v887_v14 = vmul.f32 %v2411_v44, %v2411_v44 }
 0x175   : > { %v825_v15 = vadd.f32 %v824_v13, %v2402_v21  ;;  %v932_v16 = vadd.f32 %v931_v10, %v883_v50  ;;  %v888_v21 = vmul.f32 %v2414_v52, %v2414_v52  ;;  %v792_v13 = vld [vmem:[#allocation3] sm:$0x1] }
 0x177   : > { %v826_v17 = vadd.f32 %v825_v15, %v2405_v28  ;;  %v933_v18 = vadd.f32 %v932_v16, %v884_v57 }
 0x179   : > { %v827_v19 = vadd.f32 %v826_v17, %v2408_v35  ;;  %v934_v23 = vadd.f32 %v933_v18, %v885_v0 }
 0x17b   : > { %v828_v24 = vadd.f32 %v827_v19, %v2411_v44  ;;  %v935_v25 = vadd.f32 %v934_v23, %v886_v7 }
 0x17d   : > { %v829_v26 = vadd.f32 %v828_v24, %v2414_v52  ;;  %v936_v27 = vadd.f32 %v935_v25, %v887_v14 }
 0x17f   : > { %v830_v28 = vadd.f32 %v829_v26, %v2417_v60  ;;  %v937_v32 = vadd.f32 %v936_v27, %v888_v21 }
 0x181   : > { %v938_v35 = vadd.f32 %v937_v32, %v889_v30  ;;  %v831_v33 = vadd.f32 %v830_v28, %v2420_v4 }
 0x183   : > { %v939_v44 = vadd.f32 %v938_v35, %v890_v34  ;;  %v832_v37 = vadd.f32 %v831_v33, %v2423_v12 }
 0x185   : > { %v940_v52 = vadd.f32 %v939_v44, %v891_v39  ;;  %v833_v40 = vadd.f32 %v832_v37, %v2426_v20 }
 0x187   : > { %v941_v60 = vadd.f32 %v940_v52, %v892_v41  ;;  %v834_v42 = vadd.f32 %v833_v40, %v2429_v29 }
 0x189   : > { %v942_v46 = vadd.f32 %v941_v60, %v893_v45  ;;  %v835_v4 = vadd.f32 %v834_v42, %v2432_v38 }
 0x18b   : > { %v943_v49 = vadd.f32 %v942_v46, %v894_v48  ;;  %v836_v12 = vadd.f32 %v835_v4, %v2435_v47  ;;  %v899_v47 = vmul.f32 %v2447_v22, %v2447_v22 }
 0x18d   : > { %v944_v53 = vadd.f32 %v943_v49, %v895_v51  ;;  %v837_v20 = vadd.f32 %v836_v12, %v2438_v56 }
 0x18f   : > { %v945_v55 = vadd.f32 %v944_v53, %v896_v54  ;;  %v838_v29 = vadd.f32 %v837_v20, %v2441_v2 }
 0x191   : > { %v946_v59 = vadd.f32 %v945_v55, %v897_v58  ;;  %v839_v38 = vadd.f32 %v838_v29, %v2444_v11 }
 0x193   : > { %v947_v62 = vadd.f32 %v946_v59, %v898_v61  ;;  %v840_v63 = vadd.f32 %v839_v38, %v2447_v22  ;;  %v850_v22 = vld [vmem:[#allocation4] sm:$0x1] }
 0x195   : > { %v948_v1 = vadd.f32 %v947_v62, %v899_v47  ;;  %v841_v56 = vadd.f32 %v840_v63, %v2450_v31 }
 0x197   : > { %v842_v36 = vrot.slane %v841_v56, 4  ;;  %v949_v2 = vadd.f32 %v948_v1, %v900_v3 }
 0x199   : > { %v843_v5 = vadd.f32 %v842_v36, %v841_v56  ;;  %v950_v6 = vrot.slane %v949_v2, 4 }
 0x19b   : > { %v844_v43 = vrot.slane %v843_v5, 2  ;;  %v951_v8 = vadd.f32 %v950_v6, %v949_v2 }
 0x19d   : > { %v845_v9 = vadd.f32 %v844_v43, %v843_v5  ;;  %v952_v11 = vrot.slane %v951_v8, 2 }
 0x19f   : > { %v846_v50 = vrot.slane %v845_v9, 1  ;;  %v953_v10 = vadd.f32 %v952_v11, %v951_v8 }
 0x1a1   : > { %v847_v57 = vadd.f32 %v846_v50, %v845_v9  ;;  %v954_v15 = vrot.slane %v953_v10, 1 }
 0x1a3   : > { %v848_v16 = vadd.f32 %v847_v57, %v792_v13  ;;  %v955_v0 = vadd.f32 %v954_v15, %v953_v10 }
 0x1a5   : > { %849 = vst [vmem:[#allocation3] sm:$0x1] %v848_v16  ;;  %v956_v17 = vadd.f32 %v955_v0, %v850_v22 }
 0x1a7   : > { %957 = vst [vmem:[#allocation4] sm:$0x1] %v956_v17 }
 0x1a8 PF: > { %p1660_p5 = scmp.ne.s32.totalorder %s2156_s15, 1 }
 0x1a9   : > { %v974_v21 = vld [vmem:[%s2725_s2] sm:$0x1] (!%p1660_p5)  ;;  %v985_v33 = vld [vmem:[#allocation2 + $0x8] sm:$0xff] (!%p1660_p5)  ;;  %v986_v34 = vld [vmem:[#allocation2 + $0x10] sm:$0xff] (!%p1660_p5) }
 0x1aa   : > { %961 = sbr.rel (%p1660_p5) target bundleno = 534 (0x216), region = 48  ;;  %v979_v28 = vld [vmem:[%s2726_s3] sm:$0x1] (!%p1660_p5)  ;;  %v987_v44 = vld [vmem:[#allocation2 + $0x18] sm:$0xff] (!%p1660_p5)  ;;  %v989_v39 = vld [vmem:[#allocation2 + $0x28] sm:$0xff] (!%p1660_p5) }
 0x1ab   : > { %v984_v35 = vld [vmem:[#allocation2] sm:$0xff] (!%p1660_p5)  ;;  %v990_v52 = vld [vmem:[#allocation2 + $0x30] sm:$0xff] (!%p1660_p5)  ;;  %v991_v40 = vld [vmem:[#allocation2 + $0x38] sm:$0xff] (!%p1660_p5) }
 0x1ac   : > { %v966_v31 = vld [vmem:[#allocation3] sm:$0x1] (!%p1660_p5)  ;;  %v988_v37 = vld [vmem:[#allocation2 + $0x20] sm:$0xff] (!%p1660_p5)  ;;  %v993_v60 = vld [vmem:[#allocation2 + $0x48] sm:$0xff] (!%p1660_p5) }
 0x1ad   : > { %v968_v7 = vmul.f32 (!%p1660_p5), 0.0025510204, %v966_v31  ;;  %v992_v41 = vld [vmem:[#allocation2 + $0x40] sm:$0xff] (!%p1660_p5)  ;;  %v994_v42 = vld [vmem:[#allocation2 + $0x50] sm:$0xff] (!%p1660_p5)  ;;  %v995_v46 = vld [vmem:[#allocation2 + $0x58] sm:$0xff] (!%p1660_p5) }
 0x1ae   : > { %v969_v18 = vld [vmem:[#allocation4] sm:$0x1] (!%p1660_p5)  ;;  %v996_v4 = vld [vmem:[#allocation2 + $0x60] sm:$0xff] (!%p1660_p5)  ;;  %v997_v53 = vld [vmem:[#allocation2 + $0x68] sm:$0xff] (!%p1660_p5) }
 0x1af   : > { %v970_v19 = vmul.f32 (!%p1660_p5), 0.0025510204, %v969_v18  ;;  %v971_v23 = vmul.f32 (!%p1660_p5), %v968_v7, %v968_v7  ;;  %v998_v20 = vld [vmem:[#allocation2 + $0x70] sm:$0xff] (!%p1660_p5)  ;;  %v999_v54 = vld [vmem:[#allocation2 + $0x78] sm:$0xff] (!%p1660_p5) }
 0x1b1   : > { %v972_v14 = vsub.f32 %v970_v19, %v971_v23 }
 0x1b3   : > { %v973_v24 = vmax.f32 %v972_v14, 0.0 }
 0x1b5   : > { %v975_v25 = vadd.f32 1e-05, %v973_v24 }
 0x1b7   : > { %2140 = vrsqrt.f32 %v975_v25 }
 0x1c1   : > { %v2141_v26 = vpop.eup %2140 }
 0x1c2   : > { %v977_v27 = vmul.f32 %v2141_v26, %v974_v21 }
 0x1c4   : > { %978 = vst [vmem:[#allocation5] sm:$0x1] %v977_v27  ;;  %v980_v30 = vmul.f32 %v977_v27, %v968_v7 }
 0x1c6   : > { %v981_v32 = vsub.f32 %v979_v28, %v980_v30 }
 0x1c8   : > { %982 = vst [vmem:[#allocation6] sm:$0x1] %v981_v32 }
 0x1cb   : > { %v2532_v45 = vld [vmem:[#allocation5] ss:$0 sm:$0xff] }
 0x1cc   : > { %v1041_v48 = vmul.f32 %v2532_v45, %v984_v35  ;;  %v1042_v49 = vmul.f32 %v2532_v45, %v985_v33  ;;  %v1043_v12 = vmul.f32 %v2532_v45, %v986_v34  ;;  %v1044_v51 = vmul.f32 %v2532_v45, %v987_v44 }
 0x1cd   : > { %v1045_v55 = vmul.f32 %v2532_v45, %v988_v37  ;;  %v1046_v29 = vmul.f32 %v2532_v45, %v989_v39  ;;  %v1047_v58 = vmul.f32 %v2532_v45, %v990_v52  ;;  %v1048_v59 = vmul.f32 %v2532_v45, %v991_v40 }
 0x1ce   : > { %v1049_v38 = vmul.f32 %v2532_v45, %v992_v41  ;;  %v1050_v61 = vmul.f32 %v2532_v45, %v993_v60  ;;  %v1051_v47 = vmul.f32 %v2532_v45, %v994_v42  ;;  %v1052_v62 = vmul.f32 %v2532_v45, %v995_v46 }
 0x1cf   : > { %v2546_v63 = vld [vmem:[#allocation6] ss:$0 sm:$0xff]  ;;  %v1053_v1 = vmul.f32 %v2532_v45, %v996_v4  ;;  %v1054_v56 = vmul.f32 %v2532_v45, %v997_v53  ;;  %v1055_v3 = vmul.f32 %v2532_v45, %v998_v20  ;;  %v2552_v36 = vmul.f32 %v2532_v45, %v999_v54 }
 0x1d0   : > { %v1098_v2 = vadd.f32 %v2546_v63, %v1041_v48  ;;  %v1099_v5 = vadd.f32 %v2546_v63, %v1042_v49  ;;  %v1100_v6 = vadd.f32 %v2546_v63, %v1043_v12  ;;  %v1101_v43 = vadd.f32 %v2546_v63, %v1044_v51  ;;  %v1000_v49 = vld [vmem:[#allocation2 + $0x80] sm:$0xff]  ;;  %v1001_v12 = vld [vmem:[#allocation2 + $0x88] sm:$0xff]  ;;  %v1002_v51 = vld [vmem:[#allocation2 + $0x90] sm:$0xff] }
 0x1d1   : > { %v1102_v8 = vadd.f32 %v2546_v63, %v1045_v55  ;;  %v1103_v9 = vadd.f32 %v2546_v63, %v1046_v29  ;;  %v1104_v11 = vadd.f32 %v2546_v63, %v1047_v58  ;;  %v1105_v50 = vadd.f32 %v2546_v63, %v1048_v59  ;;  %v1003_v58 = vld [vmem:[#allocation2 + $0x98] sm:$0xff] }
 0x1d2   : > { %vm1148_vm1 = vcmp.gt.f32.partialorder %v1098_v2, 0.0  ;;  %vm1149_vm2 = vcmp.gt.f32.partialorder %v1099_v5, 0.0  ;;  %v1198_v10 = vmul.f32 0.2, %v1098_v2  ;;  %v1199_v13 = vmul.f32 0.2, %v1099_v5 }
 0x1d3   : > { %vm1150_vm3 = vcmp.gt.f32.partialorder %v1100_v6, 0.0  ;;  %vm1151_vm4 = vcmp.gt.f32.partialorder %v1101_v43, 0.0  ;;  %v1200_v57 = vmul.f32 0.2, %v1100_v6  ;;  %v1201_v15 = vmul.f32 0.2, %v1101_v43 }
 0x1d4   : > { %v1248_v22 = vsel %vm1148_vm1, %v1098_v2, %v1198_v10  ;;  %v1249_v16 = vsel %vm1149_vm2, %v1099_v5, %v1199_v13  ;;  %vm1152_vm5 = vcmp.gt.f32.partialorder %v1102_v8, 0.0  ;;  %vm1153_vm6 = vcmp.gt.f32.partialorder %v1103_v9, 0.0  ;;  %v1006_v10 = vld [vmem:[#allocation2 + $0xb0] sm:$0xff] }
 0x1d5   : > { %v1770_v0 = vpack.c.bf16 %v1249_v16, %v1248_v22  ;;  %v1250_v17 = vsel %vm1150_vm3, %v1100_v6, %v1200_v57  ;;  %v1251_v31 = vsel %vm1151_vm4, %v1101_v43, %v1201_v15  ;;  %v1202_v18 = vmul.f32 0.2, %v1102_v8 }
 0x1d6   : > { %v1775_v7 = vpack.c.bf16 %v1251_v31, %v1250_v17  ;;  %v1203_v19 = vmul.f32 0.2, %v1103_v9  ;;  %vm1154_vm7 = vcmp.gt.f32.partialorder %v1104_v11, 0.0  ;;  %vm1155_vm8 = vcmp.gt.f32.partialorder %v1105_v50, 0.0 }
 0x1d7   : > { %1771 = vst [vmem:[%s2727_s4] sm:$0xff] %v1770_v0   ;;  %v1252_v23 = vsel %vm1152_vm5, %v1102_v8, %v1202_v18  ;;  %v1204_v14 = vmul.f32 0.2, %v1104_v11  ;;  %v1205_v24 = vmul.f32 0.2, %v1105_v50  ;;  %v1106_v25 = vadd.f32 %v2546_v63, %v1049_v38  ;;  %v1007_v18 = vld [vmem:[#allocation2 + $0xb8] sm:$0xff] }
 0x1d8   : > { %1892 = vst [vmem:[%s2727_s4 + $0x8] sm:$0xff] %v1775_v7   ;;  %v1253_v21 = vsel %vm1153_vm6, %v1103_v9, %v1203_v19  ;;  %v1107_v26 = vadd.f32 %v2546_v63, %v1050_v61  ;;  %v1108_v27 = vadd.f32 %v2546_v63, %v1051_v47  ;;  %v1109_v28 = vadd.f32 %v2546_v63, %v1052_v62  ;;  %v1004_v62 = vld [vmem:[#allocation2 + $0xa0] sm:$0xff] }
 0x1d9   : > { %v1780_v30 = vpack.c.bf16 %v1253_v21, %v1252_v23  ;;  %v1254_v32 = vsel %vm1154_vm7, %v1104_v11, %v1204_v14  ;;  %v1255_v35 = vsel %vm1155_vm8, %v1105_v50, %v1205_v24  ;;  %vm1156_vm9 = vcmp.gt.f32.partialorder %v1106_v25, 0.0  ;;  %v1008_v24 = vld [vmem:[#allocation2 + $0xc0] sm:$0xff] }
 0x1da   : > { %v1785_v33 = vpack.c.bf16 %v1255_v35, %v1254_v32  ;;  %vm1157_vm10 = vcmp.gt.f32.partialorder %v1107_v26, 0.0  ;;  %v1206_v34 = vmul.f32 0.2, %v1106_v25  ;;  %v1207_v44 = vmul.f32 0.2, %v1107_v26  ;;  %v1010_v35 = vld [vmem:[#allocation2 + $0xd0] sm:$0xff] }
 0x1db   : > { %1893 = vst [vmem:[%s2727_s4 + $0x10] sm:$0xff] %v1780_v30   ;;  %vm1158_vm11 = vcmp.gt.f32.partialorder %v1108_v27, 0.0  ;;  %vm1159_vm12 = vcmp.gt.f32.partialorder %v1109_v28, 0.0  ;;  %v1208_v37 = vmul.f32 0.2, %v1108_v27  ;;  %v1110_v41 = vadd.f32 %v2546_v63, %v1053_v1  ;;  %v1005_v1 = vld [vmem:[#allocation2 + $0xa8] sm:$0xff] }
 0x1dc   : > { %v1209_v39 = vmul.f32 0.2, %v1109_v28  ;;  %1894 = vst [vmem:[%s2727_s4 + $0x18] sm:$0xff] %v1785_v33   ;;  %v1256_v52 = vsel %vm1156_vm9, %v1106_v25, %v1206_v34  ;;  %v1257_v40 = vsel %vm1157_vm10, %v1107_v26, %v1207_v44  ;;  %v1111_v60 = vadd.f32 %v2546_v63, %v1054_v56  ;;  %v1009_v25 = vld [vmem:[#allocation2 + $0xc8] sm:$0xff] }
 0x1dd   : > { %v1790_v42 = vpack.c.bf16 %v1257_v40, %v1256_v52  ;;  %v1258_v46 = vsel %vm1158_vm11, %v1108_v27, %v1208_v37  ;;  %v1112_v48 = vadd.f32 %v2546_v63, %v1055_v3  ;;  %vm1160_vm13 = vcmp.gt.f32.partialorder %v1110_v41, 0.0 }
 0x1de   : > { %v1259_v4 = vsel %vm1159_vm12, %v1109_v28, %v1209_v39  ;;  %vm1161_vm14 = vcmp.gt.f32.partialorder %v1111_v60, 0.0  ;;  %v1210_v20 = vmul.f32 0.2, %v1110_v41  ;;  %v1211_v54 = vmul.f32 0.2, %v1111_v60  ;;  %v1011_v39 = vld [vmem:[#allocation2 + $0xd8] sm:$0xff] }
 0x1df   : > { %v1795_v53 = vpack.c.bf16 %v1259_v4, %v1258_v46  ;;  %1895 = vst [vmem:[%s2727_s4 + $0x20] sm:$0xff] %v1790_v42   ;;  %v1113_v55 = vadd.f32 %v2546_v63, %v2552_v36  ;;  %vm1162_vm15 = vcmp.gt.f32.partialorder %v1112_v48, 0.0  ;;  %v1212_v29 = vmul.f32 0.2, %v1112_v48 }
 0x1e0   : > { %v1260_v59 = vsel %vm1160_vm13, %v1110_v41, %v1210_v20  ;;  %v1057_v38 = vmul.f32 %v2532_v45, %v1000_v49  ;;  %v1058_v61 = vmul.f32 %v2532_v45, %v1001_v12  ;;  %v1059_v47 = vmul.f32 %v2532_v45, %v1002_v51 }
 0x1e1   : > { %1896 = vst [vmem:[%s2727_s4 + $0x28] sm:$0xff] %v1795_v53   ;;  %v1261_v56 = vsel %vm1161_vm14, %v1111_v60, %v1211_v54  ;;  %vm1163_vm0 = vcmp.gt.f32.partialorder %v1113_v55, 0.0  ;;  %v1213_v3 = vmul.f32 0.2, %v1113_v55  ;;  %v1262_v36 = vsel %vm1162_vm15, %v1112_v48, %v1212_v29  ;;  %v1012_v48 = vld [vmem:[#allocation2 + $0xe0] sm:$0xff]  ;;  %v1013_v53 = vld [vmem:[#allocation2 + $0xe8] sm:$0xff] }
 0x1e2   : > { %v1800_v2 = vpack.c.bf16 %v1261_v56, %v1260_v59  ;;  %v1114_v5 = vadd.f32 %v2546_v63, %v1057_v38  ;;  %v1115_v6 = vadd.f32 %v2546_v63, %v1058_v61  ;;  %v1060_v43 = vmul.f32 %v2532_v45, %v1003_v58  ;;  %v1014_v38 = vld [vmem:[#allocation2 + $0xf0] sm:$0xff]  ;;  %v1015_v56 = vld [vmem:[#allocation2 + $0xf8] sm:$0xff] }
 0x1e3   : > { %v1263_v8 = vsel %vm1163_vm0, %v1113_v55, %v1213_v3  ;;  %v1116_v9 = vadd.f32 %v2546_v63, %v1059_v47  ;;  %v1061_v11 = vmul.f32 %v2532_v45, %v1004_v62  ;;  %v1062_v50 = vmul.f32 %v2532_v45, %v1005_v1  ;;  %v1016_v3 = vld [vmem:[#allocation2 + $0x100] sm:$0xff] }
 0x1e4   : > { %1897 = vst [vmem:[%s2727_s4 + $0x30] sm:$0xff] %v1800_v2   ;;  %v1805_v13 = vpack.c.bf16 %v1263_v8, %v1262_v36  ;;  %vm1164_vm1 = vcmp.gt.f32.partialorder %v1114_v5, 0.0  ;;  %vm1165_vm2 = vcmp.gt.f32.partialorder %v1115_v6, 0.0  ;;  %v1214_v57 = vmul.f32 0.2, %v1114_v5  ;;  %v1017_v36 = vld [vmem:[#allocation2 + $0x108] sm:$0xff] }
 0x1e5   : > { %v1215_v15 = vmul.f32 0.2, %v1115_v6  ;;  %v1117_v22 = vadd.f32 %v2546_v63, %v1060_v43  ;;  %vm1166_vm3 = vcmp.gt.f32.partialorder %v1116_v9, 0.0  ;;  %v1216_v16 = vmul.f32 0.2, %v1116_v9 }
 0x1e6   : > { %1898 = vst [vmem:[%s2727_s4 + $0x38] sm:$0xff] %v1805_v13   ;;  %v1264_v0 = vsel %vm1164_vm1, %v1114_v5, %v1214_v57  ;;  %v1118_v17 = vadd.f32 %v2546_v63, %v1061_v11  ;;  %v1119_v31 = vadd.f32 %v2546_v63, %v1062_v50  ;;  %v1063_v7 = vmul.f32 %v2532_v45, %v1006_v10  ;;  %v1018_v57 = vld [vmem:[#allocation2 + $0x110] sm:$0xff] }
 0x1e7   : > { %v1265_v19 = vsel %vm1165_vm2, %v1115_v6, %v1215_v15  ;;  %vm1167_vm4 = vcmp.gt.f32.partialorder %v1117_v22, 0.0  ;;  %v1217_v23 = vmul.f32 0.2, %v1117_v22  ;;  %v1266_v14 = vsel %vm1166_vm3, %v1116_v9, %v1216_v16 }
 0x1e8   : > { %v1810_v21 = vpack.c.bf16 %v1265_v19, %v1264_v0  ;;  %vm1168_vm5 = vcmp.gt.f32.partialorder %v1118_v17, 0.0  ;;  %vm1169_vm6 = vcmp.gt.f32.partialorder %v1119_v31, 0.0  ;;  %v1218_v26 = vmul.f32 0.2, %v1118_v17 }
 0x1e9   : > { %v1267_v27 = vsel %vm1167_vm4, %v1117_v22, %v1217_v23  ;;  %v1219_v28 = vmul.f32 0.2, %v1119_v31  ;;  %v1064_v30 = vmul.f32 %v2532_v45, %v1007_v18  ;;  %v1120_v32 = vadd.f32 %v2546_v63, %v1063_v7  ;;  %v1019_v23 = vld [vmem:[#allocation2 + $0x118] sm:$0xff] }
 0x1ea   : > { %1899 = vst [vmem:[%s2727_s4 + $0x40] sm:$0xff] %v1810_v21   ;;  %v1815_v33 = vpack.c.bf16 %v1267_v27, %v1266_v14  ;;  %v1268_v34 = vsel %vm1168_vm5, %v1118_v17, %v1218_v26  ;;  %v1065_v44 = vmul.f32 %v2532_v45, %v1008_v24  ;;  %v1066_v37 = vmul.f32 %v2532_v45, %v1009_v25  ;;  %v1020_v21 = vld [vmem:[#allocation2 + $0x120] sm:$0xff]  ;;  %v1021_v26 = vld [vmem:[#allocation2 + $0x128] sm:$0xff] }
 0x1eb   : > { %v1269_v52 = vsel %vm1169_vm6, %v1119_v31, %v1219_v28  ;;  %v1121_v40 = vadd.f32 %v2546_v63, %v1064_v30  ;;  %vm1170_vm7 = vcmp.gt.f32.partialorder %v1120_v32, 0.0  ;;  %v1220_v41 = vmul.f32 0.2, %v1120_v32 }
 0x1ec   : > { %1900 = vst [vmem:[%s2727_s4 + $0x48] sm:$0xff] %v1815_v33   ;;  %v1820_v60 = vpack.c.bf16 %v1269_v52, %v1268_v34  ;;  %v1122_v42 = vadd.f32 %v2546_v63, %v1065_v44  ;;  %v1123_v46 = vadd.f32 %v2546_v63, %v1066_v37  ;;  %v1067_v4 = vmul.f32 %v2532_v45, %v1010_v35  ;;  %v1022_v52 = vld [vmem:[#allocation2 + $0x130] sm:$0xff] }
 0x1ed   : > { %vm1171_vm8 = vcmp.gt.f32.partialorder %v1121_v40, 0.0  ;;  %v1221_v49 = vmul.f32 0.2, %v1121_v40  ;;  %v1270_v12 = vsel %vm1170_vm7, %v1120_v32, %v1220_v41  ;;  %v1068_v51 = vmul.f32 %v2532_v45, %v1011_v39 }
 0x1ee   : > { %1901 = vst [vmem:[%s2727_s4 + $0x50] sm:$0xff] %v1820_v60   ;;  %vm1172_vm9 = vcmp.gt.f32.partialorder %v1122_v42, 0.0  ;;  %vm1173_vm10 = vcmp.gt.f32.partialorder %v1123_v46, 0.0  ;;  %v1222_v20 = vmul.f32 0.2, %v1122_v42  ;;  %v1124_v29 = vadd.f32 %v2546_v63, %v1067_v4 }
 0x1ef   : > { %v1223_v54 = vmul.f32 0.2, %v1123_v46  ;;  %v1271_v55 = vsel %vm1171_vm8, %v1121_v40, %v1221_v49  ;;  %v1125_v58 = vadd.f32 %v2546_v63, %v1068_v51  ;;  %v1069_v59 = vmul.f32 %v2532_v45, %v1012_v48 }
 0x1f0   : > { %v1825_v61 = vpack.c.bf16 %v1271_v55, %v1270_v12  ;;  %v1272_v47 = vsel %vm1172_vm9, %v1122_v42, %v1222_v20  ;;  %v1070_v1 = vmul.f32 %v2532_v45, %v1013_v53  ;;  %vm1174_vm11 = vcmp.gt.f32.partialorder %v1124_v29, 0.0  ;;  %v1024_v20 = vld [vmem:[#allocation2 + $0x140] sm:$0xff] }
 0x1f1   : > { %v1273_v62 = vsel %vm1173_vm10, %v1123_v46, %v1223_v54  ;;  %vm1175_vm12 = vcmp.gt.f32.partialorder %v1125_v58, 0.0  ;;  %v1224_v5 = vmul.f32 0.2, %v1124_v29  ;;  %v1225_v6 = vmul.f32 0.2, %v1125_v58  ;;  %v1023_v46 = vld [vmem:[#allocation2 + $0x138] sm:$0xff] }
 0x1f2   : > { %v1830_v2 = vpack.c.bf16 %v1273_v62, %v1272_v47  ;;  %1902 = vst [vmem:[%s2727_s4 + $0x58] sm:$0xff] %v1825_v61   ;;  %v1126_v43 = vadd.f32 %v2546_v63, %v1069_v59  ;;  %v1127_v8 = vadd.f32 %v2546_v63, %v1070_v1  ;;  %v1071_v9 = vmul.f32 %v2532_v45, %v1014_v38 }
 0x1f3   : > { %v1274_v11 = vsel %vm1174_vm11, %v1124_v29, %v1224_v5  ;;  %v1072_v50 = vmul.f32 %v2532_v45, %v1015_v56  ;;  %v1073_v10 = vmul.f32 %v2532_v45, %v1016_v3  ;;  %v1074_v13 = vmul.f32 %v2532_v45, %v1017_v36  ;;  %v1026_v3 = vld [vmem:[#allocation2 + $0x150] sm:$0xff]  ;;  %v1027_v36 = vld [vmem:[#allocation2 + $0x158] sm:$0xff] }
 0x1f4   : > { %1903 = vst [vmem:[%s2727_s4 + $0x60] sm:$0xff] %v1830_v2   ;;  %v1275_v15 = vsel %vm1175_vm12, %v1125_v58, %v1225_v6  ;;  %vm1176_vm13 = vcmp.gt.f32.partialorder %v1126_v43, 0.0  ;;  %vm1177_vm14 = vcmp.gt.f32.partialorder %v1127_v8, 0.0  ;;  %v1226_v22 = vmul.f32 0.2, %v1126_v43  ;;  %v1025_v58 = vld [vmem:[#allocation2 + $0x148] sm:$0xff] }
 0x1f5   : > { %v1835_v16 = vpack.c.bf16 %v1275_v15, %v1274_v11  ;;  %v1227_v0 = vmul.f32 0.2, %v1127_v8  ;;  %v1128_v17 = vadd.f32 %v2546_v63, %v1071_v9  ;;  %v1129_v31 = vadd.f32 %v2546_v63, %v1072_v50  ;;  %v1029_v15 = vld [vmem:[#allocation2 + $0x168] sm:$0xff] }
 0x1f6   : > { %v1276_v18 = vsel %vm1176_vm13, %v1126_v43, %v1226_v22  ;;  %v1130_v7 = vadd.f32 %v2546_v63, %v1073_v10  ;;  %v1131_v19 = vadd.f32 %v2546_v63, %v1074_v13  ;;  %v1075_v14 = vmul.f32 %v2532_v45, %v1018_v57  ;;  %v1028_v43 = vld [vmem:[#allocation2 + $0x160] sm:$0xff] }
 0x1f7   : > { %1904 = vst [vmem:[%s2727_s4 + $0x68] sm:$0xff] %v1835_v16   ;;  %v1277_v24 = vsel %vm1177_vm14, %v1127_v8, %v1227_v0  ;;  %vm1178_vm15 = vcmp.gt.f32.partialorder %v1128_v17, 0.0  ;;  %vm1179_vm0 = vcmp.gt.f32.partialorder %v1129_v31, 0.0  ;;  %v1228_v25 = vmul.f32 0.2, %v1128_v17 }
 0x1f8   : > { %v1840_v27 = vpack.c.bf16 %v1277_v24, %v1276_v18  ;;  %v1229_v28 = vmul.f32 0.2, %v1129_v31  ;;  %vm1180_vm1 = vcmp.gt.f32.partialorder %v1130_v7, 0.0  ;;  %vm1181_vm2 = vcmp.gt.f32.partialorder %v1131_v19, 0.0 }
 0x1f9   : > { %v1278_v30 = vsel %vm1178_vm15, %v1128_v17, %v1228_v25  ;;  %v1230_v32 = vmul.f32 0.2, %v1130_v7  ;;  %v1231_v35 = vmul.f32 0.2, %v1131_v19  ;;  %v1076_v33 = vmul.f32 %v2532_v45, %v1019_v23  ;;  %v1030_v17 = vld [vmem:[#allocation2 + $0x170] sm:$0xff]  ;;  %v1031_v25 = vld [vmem:[#allocation2 + $0x178] sm:$0xff] }
 0x1fa   : > { %1905 = vst [vmem:[%s2727_s4 + $0x70] sm:$0xff] %v1840_v27   ;;  %v1279_v34 = vsel %vm1179_vm0, %v1129_v31, %v1229_v28  ;;  %v1132_v44 = vadd.f32 %v2546_v63, %v1075_v14  ;;  %v1077_v37 = vmul.f32 %v2532_v45, %v1020_v21  ;;  %v1078_v39 = vmul.f32 %v2532_v45, %v1021_v26 }
 0x1fb   : > { %v1845_v40 = vpack.c.bf16 %v1279_v34, %v1278_v30  ;;  %v1280_v41 = vsel %vm1180_vm1, %v1130_v7, %v1230_v32  ;;  %v1281_v60 = vsel %vm1181_vm2, %v1131_v19, %v1231_v35  ;;  %v1133_v42 = vadd.f32 %v2546_v63, %v1076_v33  ;;  %v1032_v35 = vld [vmem:[#allocation2 + $0x180] sm:$0xff] }
 0x1fc   : > { %v1850_v4 = vpack.c.bf16 %v1281_v60, %v1280_v41  ;;  %vm1182_vm3 = vcmp.gt.f32.partialorder %v1132_v44, 0.0  ;;  %v1232_v48 = vmul.f32 0.2, %v1132_v44  ;;  %v1134_v49 = vadd.f32 %v2546_v63, %v1077_v37  ;;  %v1033_v37 = vld [vmem:[#allocation2 + $0x188] sm:$0xff] }
 0x1fd   : > { %1906 = vst [vmem:[%s2727_s4 + $0x78] sm:$0xff] %v1845_v40   ;;  %vm1183_vm4 = vcmp.gt.f32.partialorder %v1133_v42, 0.0  ;;  %v1233_v12 = vmul.f32 0.2, %v1133_v42  ;;  %v1135_v51 = vadd.f32 %v2546_v63, %v1078_v39  ;;  %v1079_v53 = vmul.f32 %v2532_v45, %v1022_v52 }
 0x1fe   : > { %1907 = vst [vmem:[%s2727_s4 + $0x80] sm:$0xff] %v1850_v4   ;;  %v1282_v54 = vsel %vm1182_vm3, %v1132_v44, %v1232_v48  ;;  %vm1184_vm5 = vcmp.gt.f32.partialorder %v1134_v49, 0.0  ;;  %v1234_v55 = vmul.f32 0.2, %v1134_v49  ;;  %v1080_v29 = vmul.f32 %v2532_v45, %v1023_v46 }
 0x1ff   : > { %v1283_v59 = vsel %vm1183_vm4, %v1133_v42, %v1233_v12  ;;  %vm1185_vm6 = vcmp.gt.f32.partialorder %v1135_v51, 0.0  ;;  %v1235_v38 = vmul.f32 0.2, %v1135_v51  ;;  %v1136_v61 = vadd.f32 %v2546_v63, %v1079_v53 }
 0x200   : > { %v1855_v47 = vpack.c.bf16 %v1283_v59, %v1282_v54  ;;  %v1284_v62 = vsel %vm1184_vm5, %v1134_v49, %v1234_v55  ;;  %v1137_v1 = vadd.f32 %v2546_v63, %v1080_v29  ;;  %v1081_v56 = vmul.f32 %v2532_v45, %v1024_v20 }
 0x201   : > { %v1285_v2 = vsel %vm1185_vm6, %v1135_v51, %v1235_v38  ;;  %vm1186_vm7 = vcmp.gt.f32.partialorder %v1136_v61, 0.0  ;;  %v1236_v5 = vmul.f32 0.2, %v1136_v61  ;;  %v1082_v6 = vmul.f32 %v2532_v45, %v1025_v58 }
 0x202   : > { %1908 = vst [vmem:[%s2727_s4 + $0x88] sm:$0xff] %v1855_v47   ;;  %v1860_v8 = vpack.c.bf16 %v1285_v2, %v1284_v62  ;;  %vm1187_vm8 = vcmp.gt.f32.partialorder %v1137_v1, 0.0  ;;  %v1237_v9 = vmul.f32 0.2, %v1137_v1  ;;  %v1138_v11 = vadd.f32 %v2546_v63, %v1081_v56 }
 0x203   : > { %v1286_v50 = vsel %vm1186_vm7, %v1136_v61, %v1236_v5  ;;  %v1139_v10 = vadd.f32 %v2546_v63, %v1082_v6  ;;  %v1083_v13 = vmul.f32 %v2532_v45, %v1026_v3  ;;  %v1084_v57 = vmul.f32 %v2532_v45, %v1027_v36 }
 0x204   : > { %1909 = vst [vmem:[%s2727_s4 + $0x90] sm:$0xff] %v1860_v8   ;;  %v1287_v22 = vsel %vm1187_vm8, %v1137_v1, %v1237_v9  ;;  %vm1188_vm9 = vcmp.gt.f32.partialorder %v1138_v11, 0.0  ;;  %v1238_v16 = vmul.f32 0.2, %v1138_v11  ;;  %v1085_v0 = vmul.f32 %v2532_v45, %v1028_v43 }
 0x205   : > { %v1865_v31 = vpack.c.bf16 %v1287_v22, %v1286_v50  ;;  %vm1189_vm10 = vcmp.gt.f32.partialorder %v1139_v10, 0.0  ;;  %v1239_v18 = vmul.f32 0.2, %v1139_v10  ;;  %v1140_v7 = vadd.f32 %v2546_v63, %v1083_v13 }
 0x206   : > { %v1288_v19 = vsel %vm1188_vm9, %v1138_v11, %v1238_v16  ;;  %v1141_v23 = vadd.f32 %v2546_v63, %v1084_v57  ;;  %v1086_v14 = vmul.f32 %v2532_v45, %v1029_v15  ;;  %v1142_v24 = vadd.f32 %v2546_v63, %v1085_v0 }
 0x207   : > { %1910 = vst [vmem:[%s2727_s4 + $0x98] sm:$0xff] %v1865_v31   ;;  %v1289_v21 = vsel %vm1189_vm10, %v1139_v10, %v1239_v18  ;;  %vm1190_vm11 = vcmp.gt.f32.partialorder %v1140_v7, 0.0  ;;  %v1240_v26 = vmul.f32 0.2, %v1140_v7  ;;  %v1087_v27 = vmul.f32 %v2532_v45, %v1030_v17 }
 0x208   : > { %v1870_v28 = vpack.c.bf16 %v1289_v21, %v1288_v19  ;;  %vm1191_vm12 = vcmp.gt.f32.partialorder %v1141_v23, 0.0  ;;  %v1241_v30 = vmul.f32 0.2, %v1141_v23  ;;  %v1143_v32 = vadd.f32 %v2546_v63, %v1086_v14 }
 0x209   : > { %v1290_v33 = vsel %vm1190_vm11, %v1140_v7, %v1240_v26  ;;  %vm1192_vm13 = vcmp.gt.f32.partialorder %v1142_v24, 0.0  ;;  %v1242_v34 = vmul.f32 0.2, %v1142_v24  ;;  %v1088_v44 = vmul.f32 %v2532_v45, %v1031_v25 }
 0x20a   : > { %1911 = vst [vmem:[%s2727_s4 + $0xa0] sm:$0xff] %v1870_v28   ;;  %v1291_v39 = vsel %vm1191_vm12, %v1141_v23, %v1241_v30  ;;  %vm1193_vm14 = vcmp.gt.f32.partialorder %v1143_v32, 0.0  ;;  %v1243_v52 = vmul.f32 0.2, %v1143_v32  ;;  %v1144_v40 = vadd.f32 %v2546_v63, %v1087_v27 }
 0x20b   : > { %v1875_v41 = vpack.c.bf16 %v1291_v39, %v1290_v33  ;;  %v1292_v60 = vsel %vm1192_vm13, %v1142_v24, %v1242_v34  ;;  %v1145_v42 = vadd.f32 %v2546_v63, %v1088_v44  ;;  %v1089_v46 = vmul.f32 %v2532_v45, %v1032_v35 }
 0x20c   : > { %v1293_v4 = vsel %vm1193_vm14, %v1143_v32, %v1243_v52  ;;  %vm1194_vm15 = vcmp.gt.f32.partialorder %v1144_v40, 0.0  ;;  %v1244_v48 = vmul.f32 0.2, %v1144_v40  ;;  %v1090_v49 = vmul.f32 %v2532_v45, %v1033_v37 }
 0x20d   : > { %1912 = vst [vmem:[%s2727_s4 + $0xa8] sm:$0xff] %v1875_v41   ;;  %v1880_v12 = vpack.c.bf16 %v1293_v4, %v1292_v60  ;;  %vm1195_vm0 = vcmp.gt.f32.partialorder %v1145_v42, 0.0  ;;  %v1245_v51 = vmul.f32 0.2, %v1145_v42  ;;  %v1146_v53 = vadd.f32 %v2546_v63, %v1089_v46 }
 0x20e   : > { %v1294_v20 = vsel %vm1194_vm15, %v1144_v40, %v1244_v48  ;;  %v1147_v54 = vadd.f32 %v2546_v63, %v1090_v49 }
 0x20f   : > { %1913 = vst [vmem:[%s2727_s4 + $0xb0] sm:$0xff] %v1880_v12   ;;  %v1295_v55 = vsel %vm1195_vm0, %v1145_v42, %v1245_v51  ;;  %vm1196_vm1 = vcmp.gt.f32.partialorder %v1146_v53, 0.0  ;;  %v1246_v29 = vmul.f32 0.2, %v1146_v53 }
 0x210   : > { %v1885_v45 = vpack.c.bf16 %v1295_v55, %v1294_v20  ;;  %vm1197_vm2 = vcmp.gt.f32.partialorder %v1147_v54, 0.0  ;;  %v1247_v58 = vmul.f32 0.2, %v1147_v54 }
 0x211   : > { %v1296_v59 = vsel %vm1196_vm1, %v1146_v53, %v1246_v29 }
 0x212   : > { %1914 = vst [vmem:[%s2727_s4 + $0xb8] sm:$0xff] %v1885_v45   ;;  %v1297_v38 = vsel %vm1197_vm2, %v1147_v54, %v1247_v58 }
 0x213   : > { %v1890_v61 = vpack.c.bf16 %v1297_v38, %v1296_v59 }
 0x215   : > { %1915 = vst [vmem:[%s2727_s4 + $0xc0] sm:$0xff] %v1890_v61  }
 0x216 PF: > { %s14_s17 = sadd.s32 1, %s2164_s17   ;;  %s2728_s15 = smov %s2160_s16 }
 0x217   : > { %p11_p6 = scmp.ge.s32.totalorder %s14_s17, 4   ;;  %s2729_s16 = smov %s2731_s18 }
 0x219   :  { %13 = sbr.rel (!%p11_p6) target bundleno = 2 (0x2), region = 84 }

// kernel: discriminator_forward.6
= control target key start
LH: loop header
LB: loop body
LE: loop exit
PB: predicated region body
PF: predicated region fallthrough
CT: control target
= control target key end

     0   :  { %s1188_s15 = smov 0   ;;  %s1190_s16 = smov 0   ;;  %s1348_s0 = inlined_call_operand.vmem [shape: bf16[112,256], index: 0, kind: input, shape index: {}]   ;;  %s1349_s1 = inlined_call_operand.vmem [shape: bf16[256,128], index: 1, kind: input, shape index: {}]   ;;  %s1350_s2 = inlined_call_operand.vmem [shape: f32[1,128], index: 2, kind: input, shape index: {}]   ;;  %s1351_s3 = inlined_call_operand.vmem [shape: f32[1,128], index: 3, kind: input, shape index: {}]   ;;  %s1352_s4 = inlined_call_operand.vmem [shape: bf16[112,128], index: 4, kind: output, shape index: {}]  }
   0x1   :  { %s1192_s17 = smov 0  }
   0x2 LB: > { %s26_s18 = sadd.s32 1, %s1156_s16  ;;  %p892_p0 = scmp.ge.s32.totalorder %s1160_s17, 1  ;;  %s1160_s17 = sphi %s1192_s17, %s14_s17   ;;  %s1156_s16 = sphi %s1190_s16, %s1354_s16   ;;  %s1152_s15 = sphi %s1188_s15, %s1353_s15  }
   0x3   : > { %p28_p1 = scmp.ge.s32.totalorder %s26_s18, 2  ;;  %p186_p2 = scmp.lt.s32.totalorder %s1160_s17, 3 }
   0x5   : > { %s1356_s18 = smov (%p28_p1, %s26_s18), 0  ;;  %p187_p3 = pnand %p892_p0, %p186_p2 }
   0x6   : > { %p893_p4 = scmp.ne.s32.totalorder (!%p187_p3), %s1152_s15, 0 }
   0x7   : > { %190 = sbr.rel (%p187_p3) target bundleno = 379 (0x17b), region = 36 }
   0xe   : > { %240 = sbr.rel (%p893_p4) target bundleno = 319 (0x13f), region = 40  ;;  %v1099_v0 = vld [vmem:[%s1349_s1 + $0x40] sm:$0xff] (!%p893_p4)   ;;  %v1101_v2 = vld [vmem:[%s1349_s1 + $0x48] sm:$0xff] (!%p893_p4)   ;;  %v1103_v4 = vld [vmem:[%s1349_s1 + $0x50] sm:$0xff] (!%p893_p4)   ;;  %v1162_v30 = vmov (!%p893_p4), 0.0  }
   0xf   : > { %v1100_v1 = vld [vmem:[%s1349_s1] sm:$0xff] (!%p893_p4)   ;;  %1000 = vmatprep.subr.bf16.mxu0 (!%p893_p4), %v1099_v0  ;;  %1058 = vmatprep.subr.bf16.mxu1 (!%p893_p4), %v1099_v0  ;;  %v1102_v3 = vld [vmem:[%s1349_s1 + $0x8] sm:$0xff] (!%p893_p4)   ;;  %v1104_v5 = vld [vmem:[%s1349_s1 + $0x10] sm:$0xff] (!%p893_p4)   ;;  %561 = vst [vmem:[#allocation3] sm:$0x1] (!%p893_p4), %v1162_v30 }
  0x10   : > { %1001 = vmatpush3.bf16.msra.mxu0 (!%p893_p4), %v1100_v1  ;;  %1066 = vmatpush3.bf16.msra.mxu1 (!%p893_p4), %v1100_v1  ;;  %v1105_v6 = vld [vmem:[%s1349_s1 + $0x58] sm:$0xff] (!%p893_p4)   ;;  %v1107_v8 = vld [vmem:[%s1349_s1 + $0x60] sm:$0xff] (!%p893_p4)   ;;  %v1109_v10 = vld [vmem:[%s1349_s1 + $0x68] sm:$0xff] (!%p893_p4)   ;;  %562 = vst [vmem:[#allocation4] sm:$0x1] (!%p893_p4), %v1162_v30 }
  0x11   : > { %1002 = vmatprep.subr.bf16.mxu0 (!%p893_p4), %v1101_v2  ;;  %1059 = vmatprep.subr.bf16.mxu1 (!%p893_p4), %v1101_v2  ;;  %v1106_v7 = vld [vmem:[%s1349_s1 + $0x18] sm:$0xff] (!%p893_p4)   ;;  %v1108_v9 = vld [vmem:[%s1349_s1 + $0x20] sm:$0xff] (!%p893_p4)   ;;  %v1110_v12 = vld [vmem:[%s1349_s1 + $0x28] sm:$0xff] (!%p893_p4)  }
  0x12   : > { %v1117_v11 = vld [vmem:[%s1348_s0 + $0x4] ss:$8 sps:$4 sm:$0xff] (!%p893_p4)   ;;  %v1111_v13 = vld [vmem:[%s1349_s1 + $0x70] sm:$0xff] (!%p893_p4)   ;;  %v1113_v16 = vld [vmem:[%s1349_s1 + $0x78] sm:$0xff] (!%p893_p4)  }
  0x13   : > { %485 = vmatprep.mubr.bf16.mxu0 (!%p893_p4), %v1117_v11  ;;  %v1126_v14 = vld [vmem:[%s1348_s0 + $0x44] ss:$8 sps:$4 sm:$0xff] (!%p893_p4)   ;;  %v1112_v15 = vld [vmem:[%s1349_s1 + $0x30] sm:$0xff] (!%p893_p4)   ;;  %v1114_v17 = vld [vmem:[%s1349_s1 + $0x38] sm:$0xff] (!%p893_p4)  }
  0x14   : > { %1003 = vmatpush3.bf16.msra.mxu0 (!%p893_p4), %v1102_v3  ;;  %1067 = vmatpush3.bf16.msra.mxu1 (!%p893_p4), %v1102_v3  ;;  %v1115_v18 = vld [vmem:[%s1348_s0] ss:$8 sps:$4 sm:$0xff] (!%p893_p4)   ;;  %v1118_v19 = vld [vmem:[%s1348_s0 + $0x14] ss:$8 sps:$4 sm:$0xff] (!%p893_p4)   ;;  %v1120_v22 = vld [vmem:[%s1348_s0 + $0x10] ss:$8 sps:$4 sm:$0xff] (!%p893_p4)  }
  0x15   : > { %1004 = vmatprep.subr.bf16.mxu0 %v1103_v4  ;;  %1060 = vmatprep.subr.bf16.mxu1 %v1103_v4  ;;  %v1124_v20 = vld [vmem:[%s1348_s0 + $0x40] ss:$8 sps:$4 sm:$0xff]   ;;  %v1130_v21 = vld [vmem:[%s1348_s0 + $0x54] ss:$8 sps:$4 sm:$0xff]   ;;  %v1121_v23 = vld [vmem:[%s1348_s0 + $0x24] ss:$8 sps:$4 sm:$0xff]  }
  0x16   : > { %517 = vmatprep.mubr.bf16.mxu1 %v1126_v14  ;;  %v1132_v24 = vld [vmem:[%s1348_s0 + $0x50] ss:$8 sps:$4 sm:$0xff]   ;;  %v1133_v25 = vld [vmem:[%s1348_s0 + $0x64] ss:$8 sps:$4 sm:$0xff]   ;;  %v1123_v26 = vld [vmem:[%s1348_s0 + $0x20] ss:$8 sps:$4 sm:$0xff]  }
  0x17   : > { %v1127_v27 = vld [vmem:[%s1348_s0 + $0x34] ss:$8 sps:$4 sm:$0xff]   ;;  %v1135_v28 = vld [vmem:[%s1348_s0 + $0x60] ss:$8 sps:$4 sm:$0xff]   ;;  %v1129_v29 = vld [vmem:[%s1348_s0 + $0x30] ss:$8 sps:$4 sm:$0xff]  }
  0x18   : > { %1005 = vmatpush3.bf16.msra.mxu0 %v1104_v5  ;;  %1068 = vmatpush3.bf16.msra.mxu1 %v1104_v5 }
  0x19   : > { %1006 = vmatprep.subr.bf16.mxu0 %v1105_v6  ;;  %1061 = vmatprep.subr.bf16.mxu1 %v1105_v6 }
  0x1c   : > { %1007 = vmatpush3.bf16.msra.mxu0 %v1106_v7  ;;  %1069 = vmatpush3.bf16.msra.mxu1 %v1106_v7 }
  0x1d   : > { %1008 = vmatprep.subr.bf16.mxu0 %v1107_v8  ;;  %1062 = vmatprep.subr.bf16.mxu1 %v1107_v8 }
  0x20   : > { %1009 = vmatpush3.bf16.msra.mxu0 %v1108_v9  ;;  %1070 = vmatpush3.bf16.msra.mxu1 %v1108_v9 }
  0x21   : > { %1010 = vmatprep.subr.bf16.mxu0 %v1109_v10  ;;  %1063 = vmatprep.subr.bf16.mxu1 %v1109_v10 }
  0x24   : > { %1011 = vmatpush3.bf16.msra.mxu0 %v1110_v12  ;;  %1071 = vmatpush3.bf16.msra.mxu1 %v1110_v12 }
  0x25   : > { %1012 = vmatprep.subr.bf16.mxu0 %v1111_v13  ;;  %1064 = vmatprep.subr.bf16.mxu1 %v1111_v13 }
  0x28   : > { %1013 = vmatpush3.bf16.msra.mxu0 %v1112_v15  ;;  %1072 = vmatpush3.bf16.msra.mxu1 %v1112_v15 }
  0x29   : > { %1014 = vmatprep.subr.bf16.mxu0 %v1113_v16  ;;  %1065 = vmatprep.subr.bf16.mxu1 %v1113_v16 }
  0x2c   : > { %1015 = vmatpush3.bf16.msra.mxu0 %v1114_v17  ;;  %1073 = vmatpush3.bf16.msra.mxu1 %v1114_v17 }
  0x2f   : > { %486 = vmatmul.mubr.bf16.vlgmr.msra.gmra.mrb[0].mxu0 %v1115_v18  ;;  %518 = vmatmul.mubr.bf16.vlgmr.msra.gmra.mrb[0].mxu1 %v1124_v20 }
  0x30   : > { %493 = vmatprep.mubr.bf16.mxu0 %v1118_v19  ;;  %525 = vmatprep.mubr.bf16.mxu1 %v1130_v21 }
  0x37   : > { %494 = vmatmul.mubr.bf16.gmra.mrb[4].mxu0 %v1120_v22  ;;  %526 = vmatmul.mubr.bf16.gmra.mrb[4].mxu1 %v1132_v24 }
  0x38   : > { %501 = vmatprep.mubr.bf16.mxu0 %v1121_v23  ;;  %533 = vmatprep.mubr.bf16.mxu1 %v1133_v25 }
  0x3f   : > { %502 = vmatmul.mubr.bf16.gmra.mrb[8].mxu0 %v1123_v26  ;;  %534 = vmatmul.mubr.bf16.gmra.mrb[8].mxu1 %v1135_v28 }
  0x40   : > { %509 = vmatprep.mubr.bf16.mxu0 %v1127_v27 }
  0x47   : > { %510 = vmatmul.mubr.bf16.gmra.mrb[12].mxu0 %v1129_v29 }
 0x102   : > { %v1016_v31 = vpop.f32.mrb[0].mxu0  ;;  %v1040_v33 = vpop.f32.mrb[0].mxu1 }
 0x103   : > { %v1017_v32 = vpop.f32.mrb[1].mxu0  ;;  %v1041_v36 = vpop.f32.mrb[1].mxu1 }
 0x104   : > { %v1018_v34 = vadd.f32 %v1017_v32, %v1016_v31  ;;  %v1019_v35 = vpop.f32.mrb[2].mxu0  ;;  %v1299_v38 = vadd.f32 %v1041_v36, %v1040_v33  ;;  %v1043_v39 = vpop.f32.mrb[2].mxu1 }
 0x105   : > { %v1020_v37 = vpop.f32.mrb[3].mxu0  ;;  %v1044_v41 = vpop.f32.mrb[3].mxu1 }
 0x106   : > { %543 = vst [vmem:[#allocation2] sm:$0xff] %v1018_v34  ;;  %v1021_v40 = vadd.f32 %v1020_v37, %v1019_v35  ;;  %551 = vst [vmem:[#allocation2 + $0x40] sm:$0xff] %v1299_v38  ;;  %v1302_v42 = vadd.f32 %v1044_v41, %v1043_v39  ;;  %v586_v43 = vmul.f32 %v1018_v34, %v1018_v34 }
 0x107   : > { %v594_v30 = vmul.f32 %v1299_v38, %v1299_v38 }
 0x108   : > { %544 = vst [vmem:[#allocation2 + $0x8] sm:$0xff] %v1021_v40  ;;  %v564_v44 = vadd.f32 %v1021_v40, %v1018_v34  ;;  %v587_v45 = vmul.f32 %v1021_v40, %v1021_v40  ;;  %552 = vst [vmem:[#allocation2 + $0x48] sm:$0xff] %v1302_v42  ;;  %v595_v33 = vmul.f32 %v1302_v42, %v1302_v42 }
 0x10a   : > { %v600_v46 = vadd.f32 %v587_v45, %v586_v43  ;;  %v1022_v47 = vpop.f32.mrb[4].mxu0  ;;  %v1046_v49 = vpop.f32.mrb[4].mxu1 }
 0x10b   : > { %v1023_v48 = vpop.f32.mrb[5].mxu0  ;;  %v1047_v52 = vpop.f32.mrb[5].mxu1 }
 0x10c   : > { %v1024_v50 = vadd.f32 %v1023_v48, %v1022_v47  ;;  %v1025_v51 = vpop.f32.mrb[6].mxu0  ;;  %v1048_v54 = vadd.f32 %v1047_v52, %v1046_v49  ;;  %v1049_v55 = vpop.f32.mrb[6].mxu1 }
 0x10d   : > { %v1026_v53 = vpop.f32.mrb[7].mxu0  ;;  %v1050_v59 = vpop.f32.mrb[7].mxu1 }
 0x10e   : > { %545 = vst [vmem:[#allocation2 + $0x10] sm:$0xff] %v1024_v50  ;;  %v565_v56 = vadd.f32 %v1024_v50, %v564_v44  ;;  %v588_v57 = vmul.f32 %v1024_v50, %v1024_v50  ;;  %v1027_v58 = vadd.f32 %v1026_v53, %v1025_v51  ;;  %553 = vst [vmem:[#allocation2 + $0x50] sm:$0xff] %v1048_v54 }
 0x10f   : > { %v1051_v60 = vadd.f32 %v1050_v59, %v1049_v55  ;;  %v596_v36 = vmul.f32 %v1048_v54, %v1048_v54 }
 0x110   : > { %v601_v61 = vadd.f32 %v600_v46, %v588_v57  ;;  %546 = vst [vmem:[#allocation2 + $0x18] sm:$0xff] %v1027_v58  ;;  %v566_v62 = vadd.f32 %v1027_v58, %v565_v56  ;;  %v589_v63 = vmul.f32 %v1027_v58, %v1027_v58  ;;  %v563_v58 = vld [vmem:[#allocation3] sm:$0x1] }
 0x111   : > { %554 = vst [vmem:[#allocation2 + $0x58] sm:$0xff] %v1051_v60  ;;  %v597_v41 = vmul.f32 %v1051_v60, %v1051_v60 }
 0x112   : > { %v602_v0 = vadd.f32 %v601_v61, %v589_v63  ;;  %v1028_v1 = vpop.f32.mrb[8].mxu0  ;;  %v1052_v3 = vpop.f32.mrb[8].mxu1  ;;  %v585_v61 = vld [vmem:[#allocation4] sm:$0x1] }
 0x113   : > { %v1029_v2 = vpop.f32.mrb[9].mxu0  ;;  %v1053_v6 = vpop.f32.mrb[9].mxu1 }
 0x114   : > { %v1030_v4 = vadd.f32 %v1029_v2, %v1028_v1  ;;  %v1031_v5 = vpop.f32.mrb[10].mxu0  ;;  %v1054_v8 = vadd.f32 %v1053_v6, %v1052_v3  ;;  %v1055_v9 = vpop.f32.mrb[10].mxu1 }
 0x115   : > { %v1032_v7 = vpop.f32.mrb[11].mxu0  ;;  %v1056_v13 = vpop.f32.mrb[11].mxu1 }
 0x116   : > { %547 = vst [vmem:[#allocation2 + $0x20] sm:$0xff] %v1030_v4  ;;  %v567_v10 = vadd.f32 %v1030_v4, %v566_v62  ;;  %v590_v11 = vmul.f32 %v1030_v4, %v1030_v4  ;;  %v1033_v12 = vadd.f32 %v1032_v7, %v1031_v5  ;;  %555 = vst [vmem:[#allocation2 + $0x60] sm:$0xff] %v1054_v8 }
 0x117   : > { %v1057_v14 = vadd.f32 %v1056_v13, %v1055_v9  ;;  %v598_v44 = vmul.f32 %v1054_v8, %v1054_v8 }
 0x118   : > { %v603_v15 = vadd.f32 %v602_v0, %v590_v11  ;;  %548 = vst [vmem:[#allocation2 + $0x28] sm:$0xff] %v1033_v12  ;;  %v568_v16 = vadd.f32 %v1033_v12, %v567_v10  ;;  %v591_v17 = vmul.f32 %v1033_v12, %v1033_v12 }
 0x119   : > { %556 = vst [vmem:[#allocation2 + $0x68] sm:$0xff] %v1057_v14  ;;  %v599_v49 = vmul.f32 %v1057_v14, %v1057_v14 }
 0x11a   : > { %v604_v18 = vadd.f32 %v603_v15, %v591_v17  ;;  %v1034_v19 = vpop.f32.mrb[12].mxu0 }
 0x11b   : > { %v1035_v20 = vpop.f32.mrb[13].mxu0 }
 0x11c   : > { %v1036_v21 = vadd.f32 %v1035_v20, %v1034_v19  ;;  %v1037_v22 = vpop.f32.mrb[14].mxu0 }
 0x11d   : > { %v1038_v23 = vpop.f32.mrb[15].mxu0 }
 0x11e   : > { %549 = vst [vmem:[#allocation2 + $0x30] sm:$0xff] %v1036_v21  ;;  %v569_v24 = vadd.f32 %v1036_v21, %v568_v16  ;;  %v592_v25 = vmul.f32 %v1036_v21, %v1036_v21  ;;  %v1039_v26 = vadd.f32 %v1038_v23, %v1037_v22 }
 0x120   : > { %v605_v27 = vadd.f32 %v604_v18, %v592_v25  ;;  %550 = vst [vmem:[#allocation2 + $0x38] sm:$0xff] %v1039_v26  ;;  %v570_v28 = vadd.f32 %v1039_v26, %v569_v24  ;;  %v593_v29 = vmul.f32 %v1039_v26, %v1039_v26 }
 0x122   : > { %v571_v31 = vadd.f32 %v1299_v38, %v570_v28  ;;  %v606_v32 = vadd.f32 %v605_v27, %v593_v29 }
 0x124   : > { %v607_v34 = vadd.f32 %v606_v32, %v594_v30  ;;  %v572_v35 = vadd.f32 %v1302_v42, %v571_v31 }
 0x126   : > { %v573_v37 = vadd.f32 %v1048_v54, %v572_v35  ;;  %v608_v39 = vadd.f32 %v607_v34, %v595_v33 }
 0x128   : > { %v574_v40 = vadd.f32 %v1051_v60, %v573_v37  ;;  %v609_v43 = vadd.f32 %v608_v39, %v596_v36 }
 0x12a   : > { %v610_v45 = vadd.f32 %v609_v43, %v597_v41  ;;  %v575_v46 = vadd.f32 %v1054_v8, %v574_v40 }
 0x12c   : > { %v611_v47 = vadd.f32 %v610_v45, %v598_v44  ;;  %v576_v48 = vadd.f32 %v1057_v14, %v575_v46 }
 0x12e   : > { %v577_v38 = vrot.slane %v576_v48, 4  ;;  %v612_v50 = vadd.f32 %v611_v47, %v599_v49 }
 0x130   : > { %v578_v51 = vadd.f32 %v577_v38, %v576_v48  ;;  %v613_v52 = vrot.slane %v612_v50, 4 }
 0x132   : > { %v579_v53 = vrot.slane %v578_v51, 2  ;;  %v614_v55 = vadd.f32 %v613_v52, %v612_v50 }
 0x134   : > { %v580_v56 = vadd.f32 %v579_v53, %v578_v51  ;;  %v615_v42 = vrot.slane %v614_v55, 2 }
 0x136   : > { %v581_v57 = vrot.slane %v580_v56, 1  ;;  %v616_v54 = vadd.f32 %v615_v42, %v614_v55 }
 0x138   : > { %v582_v59 = vadd.f32 %v581_v57, %v580_v56  ;;  %v617_v60 = vrot.slane %v616_v54, 1 }
 0x13a   : > { %v583_v62 = vadd.f32 %v582_v59, %v563_v58  ;;  %v618_v63 = vadd.f32 %v617_v60, %v616_v54 }
 0x13c   : > { %584 = vst [vmem:[#allocation3] sm:$0x1] %v583_v62  ;;  %v619_v0 = vadd.f32 %v618_v63, %v585_v61 }
 0x13e   : > { %620 = vst [vmem:[#allocation4] sm:$0x1] %v619_v0 }
 0x13f PF: > { %p924_p5 = scmp.ne.s32.totalorder %s1152_s15, 1 }
 0x140   : > { %v637_v9 = vld [vmem:[%s1350_s2] sm:$0x1] (!%p924_p5)  ;;  %v648_v16 = vld [vmem:[#allocation2 + $0x8] sm:$0xff] (!%p924_p5)  ;;  %v649_v17 = vld [vmem:[#allocation2 + $0x10] sm:$0xff] (!%p924_p5) }
 0x141   : > { %624 = sbr.rel (%p924_p5) target bundleno = 379 (0x17b), region = 48  ;;  %v642_v12 = vld [vmem:[%s1351_s3] sm:$0x1] (!%p924_p5)  ;;  %v650_v18 = vld [vmem:[#allocation2 + $0x18] sm:$0xff] (!%p924_p5)  ;;  %v652_v20 = vld [vmem:[#allocation2 + $0x28] sm:$0xff] (!%p924_p5) }
 0x142   : > { %v647_v15 = vld [vmem:[#allocation2] sm:$0xff] (!%p924_p5)  ;;  %v653_v21 = vld [vmem:[#allocation2 + $0x30] sm:$0xff] (!%p924_p5)  ;;  %v654_v22 = vld [vmem:[#allocation2 + $0x38] sm:$0xff] (!%p924_p5) }
 0x143   : > { %v629_v1 = vld [vmem:[#allocation3] sm:$0x1] (!%p924_p5)  ;;  %v651_v19 = vld [vmem:[#allocation2 + $0x20] sm:$0xff] (!%p924_p5)  ;;  %v656_v25 = vld [vmem:[#allocation2 + $0x48] sm:$0xff] (!%p924_p5) }
 0x144   : > { %v631_v3 = vmul.f32 (!%p924_p5), 0.010204081, %v629_v1  ;;  %v655_v23 = vld [vmem:[#allocation2 + $0x40] sm:$0xff] (!%p924_p5)  ;;  %v657_v26 = vld [vmem:[#allocation2 + $0x50] sm:$0xff] (!%p924_p5)  ;;  %v658_v31 = vld [vmem:[#allocation2 + $0x58] sm:$0xff] (!%p924_p5) }
 0x145   : > { %v632_v2 = vld [vmem:[#allocation4] sm:$0x1] (!%p924_p5)  ;;  %v659_v32 = vld [vmem:[#allocation2 + $0x60] sm:$0xff] (!%p924_p5)  ;;  %v660_v33 = vld [vmem:[#allocation2 + $0x68] sm:$0xff] (!%p924_p5) }
 0x146   : > { %v633_v4 = vmul.f32 (!%p924_p5), 0.010204081, %v632_v2  ;;  %v634_v5 = vmul.f32 (!%p924_p5), %v631_v3, %v631_v3 }
 0x148   : > { %v635_v6 = vsub.f32 %v633_v4, %v634_v5 }
 0x14a   : > { %v636_v7 = vmax.f32 %v635_v6, 0.0 }
 0x14c   : > { %v638_v8 = vadd.f32 1e-05, %v636_v7 }
 0x14e   : > { %1136 = vrsqrt.f32 %v638_v8 }
 0x158   : > { %v1137_v10 = vpop.eup %1136 }
 0x159   : > { %v640_v11 = vmul.f32 %v1137_v10, %v637_v9 }
 0x15b   : > { %641 = vst [vmem:[#allocation5] sm:$0x1] %v640_v11  ;;  %v643_v13 = vmul.f32 %v640_v11, %v631_v3 }
 0x15d   : > { %v644_v14 = vsub.f32 %v642_v12, %v643_v13 }
 0x15f   : > { %645 = vst [vmem:[#allocation6] sm:$0x1] %v644_v14 }
 0x162   : > { %v925_v24 = vld [vmem:[#allocation5] ss:$0 sm:$0xff] }
 0x163   : > { %v668_v27 = vmul.f32 %v925_v24, %v647_v15  ;;  %v669_v28 = vmul.f32 %v925_v24, %v648_v16  ;;  %v670_v29 = vmul.f32 %v925_v24, %v649_v17  ;;  %v671_v30 = vmul.f32 %v925_v24, %v650_v18 }
 0x164   : > { %v672_v34 = vmul.f32 %v925_v24, %v651_v19  ;;  %v673_v35 = vmul.f32 %v925_v24, %v652_v20  ;;  %v674_v36 = vmul.f32 %v925_v24, %v653_v21  ;;  %v675_v37 = vmul.f32 %v925_v24, %v654_v22 }
 0x165   : > { %v676_v39 = vmul.f32 %v925_v24, %v655_v23  ;;  %v677_v40 = vmul.f32 %v925_v24, %v656_v25  ;;  %v678_v43 = vmul.f32 %v925_v24, %v657_v26  ;;  %v679_v44 = vmul.f32 %v925_v24, %v658_v31 }
 0x166   : > { %v926_v41 = vld [vmem:[#allocation6] ss:$0 sm:$0xff]  ;;  %v680_v45 = vmul.f32 %v925_v24, %v659_v32  ;;  %v681_v46 = vmul.f32 %v925_v24, %v660_v33 }
 0x167   : > { %v689_v47 = vadd.f32 %v926_v41, %v668_v27  ;;  %v690_v48 = vadd.f32 %v926_v41, %v669_v28  ;;  %v691_v49 = vadd.f32 %v926_v41, %v670_v29  ;;  %v692_v38 = vadd.f32 %v926_v41, %v671_v30 }
 0x168   : > { %v693_v50 = vadd.f32 %v926_v41, %v672_v34  ;;  %v694_v51 = vadd.f32 %v926_v41, %v673_v35  ;;  %v695_v52 = vadd.f32 %v926_v41, %v674_v36  ;;  %v696_v53 = vadd.f32 %v926_v41, %v675_v37 }
 0x169   : > { %vm703_vm0 = vcmp.gt.f32.partialorder %v689_v47, 0.0  ;;  %vm704_vm1 = vcmp.gt.f32.partialorder %v690_v48, 0.0  ;;  %v717_v55 = vmul.f32 0.2, %v689_v47  ;;  %v718_v56 = vmul.f32 0.2, %v690_v48 }
 0x16a   : > { %vm705_vm2 = vcmp.gt.f32.partialorder %v691_v49, 0.0  ;;  %vm706_vm3 = vcmp.gt.f32.partialorder %v692_v38, 0.0  ;;  %v719_v42 = vmul.f32 0.2, %v691_v49  ;;  %v720_v57 = vmul.f32 0.2, %v692_v38 }
 0x16b   : > { %v731_v54 = vsel %vm703_vm0, %v689_v47, %v717_v55  ;;  %v732_v58 = vsel %vm704_vm1, %v690_v48, %v718_v56  ;;  %vm707_vm4 = vcmp.gt.f32.partialorder %v693_v50, 0.0  ;;  %vm708_vm5 = vcmp.gt.f32.partialorder %v694_v51, 0.0 }
 0x16c   : > { %v962_v59 = vpack.c.bf16 %v732_v58, %v731_v54  ;;  %v733_v60 = vsel %vm705_vm2, %v691_v49, %v719_v42  ;;  %v734_v61 = vsel %vm706_vm3, %v692_v38, %v720_v57  ;;  %v721_v62 = vmul.f32 0.2, %v693_v50 }
 0x16d   : > { %v967_v63 = vpack.c.bf16 %v734_v61, %v733_v60  ;;  %v722_v0 = vmul.f32 0.2, %v694_v51  ;;  %vm709_vm6 = vcmp.gt.f32.partialorder %v695_v52, 0.0  ;;  %vm710_vm7 = vcmp.gt.f32.partialorder %v696_v53, 0.0 }
 0x16e   : > { %963 = vst [vmem:[%s1352_s4] sm:$0xff] %v962_v59   ;;  %v735_v1 = vsel %vm707_vm4, %v693_v50, %v721_v62  ;;  %v723_v2 = vmul.f32 0.2, %v695_v52  ;;  %v724_v3 = vmul.f32 0.2, %v696_v53  ;;  %v697_v4 = vadd.f32 %v926_v41, %v676_v39 }
 0x16f   : > { %994 = vst [vmem:[%s1352_s4 + $0x8] sm:$0xff] %v967_v63   ;;  %v736_v5 = vsel %vm708_vm5, %v694_v51, %v722_v0  ;;  %v698_v6 = vadd.f32 %v926_v41, %v677_v40  ;;  %v699_v7 = vadd.f32 %v926_v41, %v678_v43  ;;  %v700_v8 = vadd.f32 %v926_v41, %v679_v44 }
 0x170   : > { %v972_v9 = vpack.c.bf16 %v736_v5, %v735_v1  ;;  %v737_v10 = vsel %vm709_vm6, %v695_v52, %v723_v2  ;;  %v738_v11 = vsel %vm710_vm7, %v696_v53, %v724_v3  ;;  %vm711_vm8 = vcmp.gt.f32.partialorder %v697_v4, 0.0 }
 0x171   : > { %v977_v12 = vpack.c.bf16 %v738_v11, %v737_v10  ;;  %vm712_vm9 = vcmp.gt.f32.partialorder %v698_v6, 0.0  ;;  %v725_v13 = vmul.f32 0.2, %v697_v4  ;;  %v726_v14 = vmul.f32 0.2, %v698_v6 }
 0x172   : > { %995 = vst [vmem:[%s1352_s4 + $0x10] sm:$0xff] %v972_v9   ;;  %vm713_vm10 = vcmp.gt.f32.partialorder %v699_v7, 0.0  ;;  %vm714_vm11 = vcmp.gt.f32.partialorder %v700_v8, 0.0  ;;  %v727_v15 = vmul.f32 0.2, %v699_v7  ;;  %v701_v19 = vadd.f32 %v926_v41, %v680_v45 }
 0x173   : > { %v728_v16 = vmul.f32 0.2, %v700_v8  ;;  %996 = vst [vmem:[%s1352_s4 + $0x18] sm:$0xff] %v977_v12   ;;  %v739_v17 = vsel %vm711_vm8, %v697_v4, %v725_v13  ;;  %v740_v18 = vsel %vm712_vm9, %v698_v6, %v726_v14  ;;  %v702_v20 = vadd.f32 %v926_v41, %v681_v46 }
 0x174   : > { %v982_v21 = vpack.c.bf16 %v740_v18, %v739_v17  ;;  %v741_v22 = vsel %vm713_vm10, %v699_v7, %v727_v15  ;;  %vm715_vm12 = vcmp.gt.f32.partialorder %v701_v19, 0.0  ;;  %v729_v25 = vmul.f32 0.2, %v701_v19 }
 0x175   : > { %v742_v23 = vsel %vm714_vm11, %v700_v8, %v728_v16  ;;  %vm716_vm13 = vcmp.gt.f32.partialorder %v702_v20, 0.0  ;;  %v730_v26 = vmul.f32 0.2, %v702_v20 }
 0x176   : > { %v987_v24 = vpack.c.bf16 %v742_v23, %v741_v22  ;;  %997 = vst [vmem:[%s1352_s4 + $0x20] sm:$0xff] %v982_v21   ;;  %v743_v27 = vsel %vm715_vm12, %v701_v19, %v729_v25 }
 0x177   : > { %v744_v28 = vsel %vm716_vm13, %v702_v20, %v730_v26 }
 0x178   : > { %998 = vst [vmem:[%s1352_s4 + $0x28] sm:$0xff] %v987_v24   ;;  %v992_v29 = vpack.c.bf16 %v744_v28, %v743_v27 }
 0x17a   : > { %999 = vst [vmem:[%s1352_s4 + $0x30] sm:$0xff] %v992_v29  }
 0x17b PF: > { %s14_s17 = sadd.s32 1, %s1160_s17   ;;  %s1353_s15 = smov %s1156_s16 }
 0x17c   : > { %p11_p6 = scmp.ge.s32.totalorder %s14_s17, 4   ;;  %s1354_s16 = smov %s1356_s18 }
 0x17e   :  { %13 = sbr.rel (!%p11_p6) target bundleno = 2 (0x2), region = 84 }

// kernel: discriminator_forward.7
= control target key start
LH: loop header
LB: loop body
LE: loop exit
PB: predicated region body
PF: predicated region fallthrough
CT: control target
= control target key end

     0   :  { %v763_v40 = vmov 0.0|0.0   ;;  %vm764_vm0 = vmmov 0   ;;  %v765_v41 = vmov 0.0   ;;  %vm502_vm5 = vcmask 261120   ;;  %s947_s1 = inlined_call_operand.vmem [shape: bf16[512,128], index: 1, kind: input, shape index: {}]   ;;  %s948_s0 = inlined_call_operand.vmem [shape: bf16[32,512], index: 0, kind: input, shape index: {}]   ;;  %s949_s2 = inlined_call_operand.vmem [shape: f32[1,128], index: 2, kind: input, shape index: {}]   ;;  %s950_s3 = inlined_call_operand.vmem [shape: f32[1,128], index: 3, kind: input, shape index: {}]   ;;  %s951_s4 = inlined_call_operand.vmem [shape: f32[32,128], index: 4, kind: input, shape index: {}]   ;;  %s952_s5 = inlined_call_operand.vmem [shape: f32[8,32], index: 5, kind: input, shape index: {}]   ;;  %s953_s6 = inlined_call_operand.vmem [shape: f32[8,1], index: 6, kind: output, shape index: {}]  }
   0x1   :  { %v713_v0 = vld [vmem:[%s947_s1 + $0x40] sm:$0xff]   ;;  %v717_v4 = vld [vmem:[%s947_s1 + $0x48] sm:$0xff]   ;;  %v721_v8 = vld [vmem:[%s947_s1 + $0x50] sm:$0xff]   ;;  %vm584_vm6 = vcmask 7168  }
   0x2   :  { %v714_v1 = vld [vmem:[%s947_s1 + $0xc0] sm:$0xff]   ;;  %632 = vmatprep.subr.bf16.mxu0 %v713_v0  ;;  %v718_v5 = vld [vmem:[%s947_s1 + $0xc8] sm:$0xff]   ;;  %v722_v9 = vld [vmem:[%s947_s1 + $0xd0] sm:$0xff]  }
   0x3   :  { %v715_v2 = vld [vmem:[%s947_s1] sm:$0xff]   ;;  %660 = vmatprep.subr.bf16.mxu1 %v714_v1  ;;  %v719_v6 = vld [vmem:[%s947_s1 + $0x8] sm:$0xff]   ;;  %v723_v10 = vld [vmem:[%s947_s1 + $0x10] sm:$0xff]  }
   0x4   :  { %v716_v3 = vld [vmem:[%s947_s1 + $0x80] sm:$0xff]   ;;  %633 = vmatpush3.bf16.msra.mxu0 %v715_v2  ;;  %v720_v7 = vld [vmem:[%s947_s1 + $0x88] sm:$0xff]   ;;  %v724_v11 = vld [vmem:[%s947_s1 + $0x90] sm:$0xff]  }
   0x5   :  { %661 = vmatpush3.bf16.msra.mxu1 %v716_v3  ;;  %634 = vmatprep.subr.bf16.mxu0 %v717_v4  ;;  %v725_v12 = vld [vmem:[%s947_s1 + $0x58] sm:$0xff]   ;;  %v729_v16 = vld [vmem:[%s947_s1 + $0x60] sm:$0xff]   ;;  %v733_v20 = vld [vmem:[%s947_s1 + $0x68] sm:$0xff]  }
   0x6   :  { %662 = vmatprep.subr.bf16.mxu1 %v718_v5  ;;  %v726_v13 = vld [vmem:[%s947_s1 + $0xd8] sm:$0xff]   ;;  %v730_v17 = vld [vmem:[%s947_s1 + $0xe0] sm:$0xff]   ;;  %v734_v21 = vld [vmem:[%s947_s1 + $0xe8] sm:$0xff]  }
   0x7   :  { %v727_v14 = vld [vmem:[%s947_s1 + $0x18] sm:$0xff]   ;;  %v731_v18 = vld [vmem:[%s947_s1 + $0x20] sm:$0xff]   ;;  %v735_v22 = vld [vmem:[%s947_s1 + $0x28] sm:$0xff]  }
   0x8   :  { %635 = vmatpush3.bf16.msra.mxu0 %v719_v6  ;;  %v728_v15 = vld [vmem:[%s947_s1 + $0x98] sm:$0xff]   ;;  %v732_v19 = vld [vmem:[%s947_s1 + $0xa0] sm:$0xff]   ;;  %v736_v23 = vld [vmem:[%s947_s1 + $0xa8] sm:$0xff]  }
   0x9   :  { %663 = vmatpush3.bf16.msra.mxu1 %v720_v7  ;;  %636 = vmatprep.subr.bf16.mxu0 %v721_v8  ;;  %v737_v24 = vld [vmem:[%s947_s1 + $0x70] sm:$0xff]   ;;  %v741_v28 = vld [vmem:[%s947_s1 + $0x78] sm:$0xff]  }
   0xa   :  { %664 = vmatprep.subr.bf16.mxu1 %v722_v9  ;;  %v738_v25 = vld [vmem:[%s947_s1 + $0xf0] sm:$0xff]   ;;  %v742_v29 = vld [vmem:[%s947_s1 + $0xf8] sm:$0xff]  }
   0xb   :  { %v739_v26 = vld [vmem:[%s947_s1 + $0x30] sm:$0xff]   ;;  %v743_v30 = vld [vmem:[%s947_s1 + $0x38] sm:$0xff]  }
   0xc   :  { %637 = vmatpush3.bf16.msra.mxu0 %v723_v10  ;;  %v740_v27 = vld [vmem:[%s947_s1 + $0xb0] sm:$0xff]   ;;  %v744_v31 = vld [vmem:[%s947_s1 + $0xb8] sm:$0xff]  }
   0xd   :  { %665 = vmatpush3.bf16.msra.mxu1 %v724_v11  ;;  %638 = vmatprep.subr.bf16.mxu0 %v725_v12  ;;  %v745_v32 = vld [vmem:[%s948_s0] ss:$16 sps:$4 sm:$0xff]   ;;  %v747_v33 = vld [vmem:[%s948_s0 + $0x4] ss:$16 sps:$4 sm:$0xff]   ;;  %v748_v34 = vld [vmem:[%s948_s0 + $0x8] ss:$16 sps:$4 sm:$0xff]  }
   0xe   :  { %666 = vmatprep.subr.bf16.mxu1 %v726_v13  ;;  %v750_v35 = vld [vmem:[%s948_s0 + $0xc] ss:$16 sps:$4 sm:$0xff]   ;;  %360 = vmatprep.mubr.bf16.mxu0 %v747_v33  ;;  %v751_v36 = vld [vmem:[%s948_s0 + $0x24] ss:$16 sps:$4 sm:$0xff]   ;;  %v755_v38 = vld [vmem:[%s948_s0 + $0x20] ss:$16 sps:$4 sm:$0xff]  }
   0xf   :  { %409 = vmatprep.mubr.bf16.mxu1 %v750_v35  ;;  %v753_v37 = vld [vmem:[%s948_s0 + $0x2c] ss:$16 sps:$4 sm:$0xff]   ;;  %v756_v39 = vld [vmem:[%s948_s0 + $0x28] ss:$16 sps:$4 sm:$0xff]  }
  0x10   :  { %639 = vmatpush3.bf16.msra.mxu0 %v727_v14 }
  0x11   :  { %667 = vmatpush3.bf16.msra.mxu1 %v728_v15  ;;  %640 = vmatprep.subr.bf16.mxu0 %v729_v16 }
  0x12   :  { %668 = vmatprep.subr.bf16.mxu1 %v730_v17 }
  0x14   :  { %641 = vmatpush3.bf16.msra.mxu0 %v731_v18 }
  0x15   :  { %669 = vmatpush3.bf16.msra.mxu1 %v732_v19  ;;  %642 = vmatprep.subr.bf16.mxu0 %v733_v20 }
  0x16   :  { %670 = vmatprep.subr.bf16.mxu1 %v734_v21 }
  0x18   :  { %643 = vmatpush3.bf16.msra.mxu0 %v735_v22 }
  0x19   :  { %671 = vmatpush3.bf16.msra.mxu1 %v736_v23  ;;  %644 = vmatprep.subr.bf16.mxu0 %v737_v24 }
  0x1a   :  { %672 = vmatprep.subr.bf16.mxu1 %v738_v25 }
  0x1c   :  { %645 = vmatpush3.bf16.msra.mxu0 %v739_v26 }
  0x1d   :  { %673 = vmatpush3.bf16.msra.mxu1 %v740_v27  ;;  %646 = vmatprep.subr.bf16.mxu0 %v741_v28 }
  0x1e   :  { %674 = vmatprep.subr.bf16.mxu1 %v742_v29 }
  0x20   :  { %647 = vmatpush3.bf16.msra.mxu0 %v743_v30 }
  0x21   :  { %675 = vmatpush3.bf16.msra.mxu1 %v744_v31  ;;  %704 = vmatprep.subr.bf16.mxu0 %v763_v40 }
  0x23   :  { %361 = vmatmul.mubr.bf16.vlgmr.msra.gmra.mrb[0].mxu0 %v745_v32 }
  0x24   :  { %410 = vmatmul.mubr.bf16.vlgmr.msra.gmra.mrb[0].mxu1 %v748_v34  ;;  %368 = vmatprep.mubr.bf16.mxu0 %v751_v36  ;;  %v462_v34 = vlaneseq  ;;  %v454_v36 = vld [vmem:[%s949_s2] sm:$0x1] }
  0x25   :  { %417 = vmatprep.mubr.bf16.mxu1 %v753_v37 }
  0x26   :  { %v463_v35 = vshrl.u32 %v462_v34, 7 }
  0x28   :  { %v464_v37 = vsub.s32 0, %v463_v35 }
  0x2b   :  { %369 = vmatmul.mubr.bf16.gmra.mrb[4].mxu0 %v755_v38 }
  0x2c   :  { %418 = vmatmul.mubr.bf16.gmra.mrb[4].mxu1 %v756_v39  ;;  %701 = vmatprep.mubr.msk.f32.mxu0 %vm764_vm0, %v765_v41  ;;  %v458_v41 = vld [vmem:[%s950_s3] sm:$0x1] }
  0xf6   :  { %v648_v42 = vpop.f32.mrb[0].mxu0 }
  0xf7   :  { %v676_v43 = vpop.f32.mrb[0].mxu1  ;;  %v649_v44 = vpop.f32.mrb[1].mxu0 }
  0xf8   :  { %v650_v45 = vadd.f32 %v649_v44, %v648_v42  ;;  %v677_v46 = vpop.f32.mrb[1].mxu1  ;;  %v651_v47 = vpop.f32.mrb[2].mxu0 }
  0xf9   :  { %v678_v48 = vadd.f32 %v677_v46, %v676_v43  ;;  %v679_v49 = vpop.f32.mrb[2].mxu1  ;;  %v652_v50 = vpop.f32.mrb[3].mxu0 }
  0xfa   :  { %v653_v51 = vadd.f32 %v652_v50, %v651_v47  ;;  %v680_v52 = vpop.f32.mrb[3].mxu1 }
  0xfb   :  { %v412_v53 = vadd.f32 %v678_v48, %v650_v45  ;;  %v681_v54 = vadd.f32 %v680_v52, %v679_v49 }
  0xfd   :  { %v415_v55 = vadd.f32 %v681_v54, %v653_v51  ;;  %v437_v57 = vmul.f32 %v412_v53, %v412_v53  ;;  %v493_v54 = vld [vmem:[%s951_s4] sm:$0xff] }
  0xfe   :  { %v654_v56 = vpop.f32.mrb[4].mxu0 }
  0xff   :  { %v426_v58 = vadd.f32 %v415_v55, %v412_v53  ;;  %v438_v59 = vmul.f32 %v415_v55, %v415_v55  ;;  %v682_v60 = vpop.f32.mrb[4].mxu1  ;;  %v655_v61 = vpop.f32.mrb[5].mxu0 }
 0x100   :  { %v656_v62 = vadd.f32 %v655_v61, %v654_v56  ;;  %v683_v63 = vpop.f32.mrb[5].mxu1  ;;  %v657_v0 = vpop.f32.mrb[6].mxu0 }
 0x101   :  { %v441_v1 = vadd.f32 %v438_v59, %v437_v57  ;;  %v684_v2 = vadd.f32 %v683_v63, %v682_v60  ;;  %v685_v3 = vpop.f32.mrb[6].mxu1  ;;  %v658_v4 = vpop.f32.mrb[7].mxu0  ;;  %v494_v57 = vld [vmem:[%s951_s4 + $0x8] sm:$0xff] }
 0x102   :  { %v659_v5 = vadd.f32 %v658_v4, %v657_v0  ;;  %v686_v6 = vpop.f32.mrb[7].mxu1 }
 0x103   :  { %v420_v7 = vadd.f32 %v684_v2, %v656_v62  ;;  %v687_v8 = vadd.f32 %v686_v6, %v685_v3 }
 0x105   :  { %v427_v9 = vadd.f32 %v426_v58, %v420_v7  ;;  %v439_v10 = vmul.f32 %v420_v7, %v420_v7  ;;  %v423_v11 = vadd.f32 %v687_v8, %v659_v5  ;;  %v495_v58 = vld [vmem:[%s951_s4 + $0x10] sm:$0xff]  ;;  %v501_v8 = vld [vmem:[%s952_s5] sm:$0xff] }
 0x107   :  { %v442_v12 = vadd.f32 %v441_v1, %v439_v10  ;;  %v428_v13 = vadd.f32 %v427_v9, %v423_v11  ;;  %v440_v14 = vmul.f32 %v423_v11, %v423_v11 }
 0x109   :  { %v429_v15 = vrot.slane %v428_v13, 4  ;;  %v443_v16 = vadd.f32 %v442_v12, %v440_v14 }
 0x10b   :  { %v430_v17 = vadd.f32 %v429_v15, %v428_v13  ;;  %v444_v18 = vrot.slane %v443_v16, 4 }
 0x10d   :  { %v431_v19 = vrot.slane %v430_v17, 2  ;;  %v445_v20 = vadd.f32 %v444_v18, %v443_v16 }
 0x10f   :  { %v432_v21 = vadd.f32 %v431_v19, %v430_v17  ;;  %v446_v22 = vrot.slane %v445_v20, 2 }
 0x111   :  { %v433_v23 = vrot.slane %v432_v21, 1  ;;  %v447_v24 = vadd.f32 %v446_v22, %v445_v20 }
 0x113   :  { %v434_v25 = vadd.f32 %v433_v23, %v432_v21  ;;  %v448_v26 = vrot.slane %v447_v24, 1 }
 0x115   :  { %v436_v27 = vmul.f32 0.03125, %v434_v25  ;;  %v449_v28 = vadd.f32 %v448_v26, %v447_v24 }
 0x117   :  { %v450_v29 = vmul.f32 0.03125, %v449_v28  ;;  %v451_v30 = vmul.f32 %v436_v27, %v436_v27 }
 0x119   :  { %v452_v31 = vsub.f32 %v450_v29, %v451_v30 }
 0x11b   :  { %v453_v32 = vmax.f32 %v452_v31, 0.0 }
 0x11d   :  { %v455_v33 = vadd.f32 1e-05, %v453_v32 }
 0x11f   :  { %757 = vrsqrt.f32 %v455_v33 }
 0x129   :  { %v758_v38 = vpop.eup %757 }
 0x12a   :  { %v457_v39 = vmul.f32 %v758_v38, %v454_v36 }
 0x12c   :  { %v459_v42 = vmul.f32 %v457_v39, %v436_v27  ;;  %v465_v43 = vrot.slane %v457_v39, %v464_v37 }
 0x12e   :  { %v460_v44 = vsub.f32 %v458_v41, %v459_v42  ;;  %v470_v45 = vmul.f32 %v465_v43, %v423_v11  ;;  %v467_v46 = vmul.f32 %v465_v43, %v412_v53  ;;  %v468_v47 = vmul.f32 %v465_v43, %v415_v55  ;;  %v496_v53 = vld [vmem:[%s951_s4 + $0x18] sm:$0xff] }
 0x12f   :  { %v469_v48 = vmul.f32 %v465_v43, %v420_v7 }
 0x130   :  { %v475_v49 = vrot.slane %v460_v44, %v464_v37 }
 0x132   :  { %v480_v50 = vadd.f32 %v475_v49, %v470_v45  ;;  %v477_v51 = vadd.f32 %v475_v49, %v467_v46  ;;  %v478_v52 = vadd.f32 %v475_v49, %v468_v47  ;;  %v479_v56 = vadd.f32 %v475_v49, %v469_v48 }
 0x134   :  { %v488_v55 = vmul.f32 0.2, %v480_v50  ;;  %vm481_vm1 = vcmp.gt.f32.partialorder %v477_v51, 0.0  ;;  %vm482_vm2 = vcmp.gt.f32.partialorder %v478_v52, 0.0  ;;  %v485_v59 = vmul.f32 0.2, %v477_v51 }
 0x135   :  { %v486_v60 = vmul.f32 0.2, %v478_v52  ;;  %vm483_vm3 = vcmp.gt.f32.partialorder %v479_v56, 0.0  ;;  %vm484_vm4 = vcmp.gt.f32.partialorder %v480_v50, 0.0  ;;  %v487_v61 = vmul.f32 0.2, %v479_v56 }
 0x136   :  { %v489_v62 = vsel %vm481_vm1, %v477_v51, %v485_v59  ;;  %v492_v63 = vsel %vm484_vm4, %v480_v50, %v488_v55 }
 0x137   :  { %v490_v0 = vsel %vm482_vm2, %v478_v52, %v486_v60  ;;  %v497_v1 = vmul.f32 %v493_v54, %v489_v62  ;;  %v491_v2 = vsel %vm483_vm3, %v479_v56, %v487_v61  ;;  %v500_v3 = vmul.f32 %v496_v53, %v492_v63 }
 0x138   :  { %v498_v4 = vmul.f32 %v494_v57, %v490_v0  ;;  %v499_v5 = vmul.f32 %v495_v58, %v491_v2 }
 0x13a   :  { %v705_v6 = vpack.c.bf16 %v498_v4, %v497_v1  ;;  %v708_v7 = vpack.c.bf16 %v500_v3, %v499_v5 }
 0x13c   :  { %706 = vmatpush3.bf16.msra.mxu0 %v705_v6 }
 0x13d   :  { %707 = vmatprep.subr.bf16.mxu0 %v763_v40 }
 0x140   :  { %709 = vmatpush3.bf16.msra.mxu0 %v708_v7 }
 0x143   :  { %702 = vmatmul.mubr.msk.f32.vlgmr.msra.gmra.mrb[8].mxu0 %vm502_vm5, %v501_v8 }
 0x216   :  { %v572_v9 = vpop.f32.mrb[8].mxu0 }
 0x217   :  { %v703_v10 = vpop.f32.mrb[9].mxu0  ;;  %576 = vadd.xlane.f32.xlu0 %v572_v9 }
 0x2a4   :  { %v577_v11 = vpop.xlane.xlu0 %576 }
 0x2a5   :  { %v631_v12 = vmul.f32 -1.442695, %v577_v11 }
 0x2a7   :  { %759 = vpow2.f32 %v631_v12 }
 0x2b1   :  { %v760_v13 = vpop.eup %759 }
 0x2b2   :  { %v581_v14 = vadd.f32 1.0, %v760_v13 }
 0x2b4   :  { %761 = vrcp.f32 %v581_v14 }
 0x2be   :  { %v762_v15 = vpop.eup %761 }
 0x2bf   :  { %585 = vst.msk [vmem:[%s953_s6] sm:$0xff] %vm584_vm6, %v762_v15 }

</bundles_post_ra>
